<compile_context>
chip_gen: v7x
topology: tpu7x:2x2x1
jax: 0.10.0
libtpu: 0.0.40
codegen_flags: <defaults>
</compile_context>

<pallas_src>
import jax
import jax.numpy as jnp
from jax.experimental import pallas as pl
from jax.experimental.pallas import tpu as pltpu


POOL_OUT = 10  # AdaptiveMaxPool1d(output_size=10)
KSIZE = 3      # all three Conv1d layers use kernel_size=3


def cnn_kernel(x_ref,
               w1_ref, b1_ref,
               w2_ref, b2_ref,
               w3_ref, b3_ref,
               wf1_ref, bf1_ref,
               wf2_ref, bf2_ref,
               out_ref):
    TB = x_ref.shape[0]

    # Hoist all weight/bias loads out of the per-sample loop.
    w1, b1 = w1_ref[...], b1_ref[...]
    w2, b2 = w2_ref[...], b2_ref[...]
    w3, b3 = w3_ref[...], b3_ref[...]

    def conv_relu(h, w_flat, b):
        # h: (Lin, Cin) f32, w_flat: (K*Cin, Cout), b: (1, Cout)
        cin = h.shape[1]
        cout = w_flat.shape[1]
        k = w_flat.shape[0] // cin
        lout = h.shape[0] - k + 1
        # im2col: concat the K shifted slices along the lane (channel) axis -> one matmul.
        # NOTE: for large channel counts on v6e/v7x, cast cols/w_flat to bf16 here
        # (keep preferred_element_type=f32) for ~2x MXU throughput.
        cols = jnp.concatenate([h[kk:kk + lout, :] for kk in range(k)], axis=-1)
        acc = jnp.dot(cols, w_flat, preferred_element_type=jnp.float32) + b
        return jnp.maximum(acc, 0.0)

    flat_rows = []
    for i in range(TB):                       # static unroll over the batch tile
        h = x_ref[i].astype(jnp.float32)      # (L, Cin), 2-D throughout -> no B*L reshapes
        h = conv_relu(h, w1, b1)              # (L-2, C1)
        h = conv_relu(h, w2, b2)              # (L-4, C2)
        h = conv_relu(h, w3, b3)              # (L-6, C3)

        # AdaptiveMaxPool1d(10): bin p covers [floor(p*L3/10), ceil((p+1)*L3/10)).
        L3 = h.shape[0]
        bins = []
        for p in range(POOL_OUT):
            s = (p * L3) // POOL_OUT
            e = -((-(p + 1) * L3) // POOL_OUT)
            bins.append(jnp.max(h[s:e, :], axis=0, keepdims=True))   # (1, C3)
        # Lane-dense flat row, position-major order p*C3 + c (wf1 rows pre-permuted to match).
        flat_rows.append(jnp.concatenate(bins, axis=-1))              # (1, 10*C3)

    flat = jnp.concatenate(flat_rows, axis=0)                          # (TB, 10*C3)

    h1 = jnp.dot(flat, wf1_ref[...], preferred_element_type=jnp.float32) + bf1_ref[...]
    h1 = jnp.maximum(h1, 0.0)
    # Dropout is identity at inference time (eval mode) -- no-op here.
    out = jnp.dot(h1, wf2_ref[...], preferred_element_type=jnp.float32) + bf2_ref[...]
    out_ref[...] = out.astype(out_ref.dtype)                           # (TB, 1)


@jax.jit
def cnn_forward(x_ncl, params):
    """x_ncl: (B, Cin, L) as in PyTorch. Returns (B, 1)."""
    B, Cin, L = x_ncl.shape
    assert L - 2 * (KSIZE - 1) >= POOL_OUT, "sequence too short for AdaptiveMaxPool1d(10)"

    # Batch tile: 8 keeps the (8,128)-aligned output block; fall back to full batch if small.
    tb = 8 if B % 8 == 0 else B
    assert B % tb == 0

    x = jnp.transpose(x_ncl, (0, 2, 1)).astype(jnp.float32)   # NCL -> (B, L, Cin)

    c1 = params["w1"].shape[2]
    c2 = params["w2"].shape[2]
    c3 = params["w3"].shape[2]

    # One-time (trace-level) weight reshapes for the im2col matmuls.
    w1 = params["w1"].reshape(KSIZE * Cin, c1)
    w2 = params["w2"].reshape(KSIZE * c1, c2)
    w3 = params["w3"].reshape(KSIZE * c2, c3)

    # Kernel builds the flat feature position-major (p*C3 + c); PyTorch flatten is
    # channel-major (c*10 + p). Fold the difference into a one-time wf1 row permutation.
    perm = jnp.arange(c3 * POOL_OUT).reshape(c3, POOL_OUT).T.reshape(-1)
    wf1 = params["wf1"][perm]

    args = (x,
            w1, params["b1"],
            w2, params["b2"],
            w3, params["b3"],
            wf1, params["bf1"],
            params["wf2"], params["bf2"])

    def full_block(a):
        # Grid-invariant full-array VMEM block (weights / biases).
        return pl.BlockSpec(a.shape, lambda i, _nd=a.ndim: (0,) * _nd)

    in_specs = [pl.BlockSpec((tb, L, Cin), lambda i: (i, 0, 0))]
    in_specs += [full_block(a) for a in args[1:]]

    return pl.pallas_call(
        cnn_kernel,
        out_shape=jax.ShapeDtypeStruct((B, 1), jnp.float32),
        grid=(B // tb,),
        in_specs=in_specs,
        out_specs=pl.BlockSpec((tb, 1), lambda i: (i, 0)),
        compiler_params=pltpu.CompilerParams(dimension_semantics=("parallel",)),
    )(*args)


def ref_forward(x_ncl, params):
    """Pure-JAX reference mirroring the PyTorch forward (eval mode)."""
    hp = jax.lax.Precision.HIGHEST
    x = jnp.transpose(x_ncl, (0, 2, 1)).astype(jnp.float32)

    def conv_relu(h, w, b):
        K = w.shape[0]
        Lout = h.shape[1] - K + 1
        acc = sum(jnp.einsum("bld,df->blf", h[:, k:k + Lout, :], w[k], precision=hp)
                  for k in range(K)) + b
        return jnp.maximum(acc, 0.0)

    h = conv_relu(x, params["w1"], params["b1"])
    h = conv_relu(h, params["w2"], params["b2"])
    h = conv_relu(h, params["w3"], params["b3"])
    B, L3, C3 = h.shape
    pooled = jnp.stack(
        [jnp.max(h[:, (i * L3) // POOL_OUT: -((-(i + 1) * L3) // POOL_OUT), :], axis=1)
         for i in range(POOL_OUT)], axis=1)                       # (B, 10, C3)
    flat = jnp.transpose(pooled, (0, 2, 1)).reshape(B, C3 * POOL_OUT)   # channel-major
    h1 = jnp.maximum(jnp.dot(flat, params["wf1"], precision=hp) + params["bf1"], 0.0)
    return jnp.dot(h1, params["wf2"], precision=hp) + params["bf2"]


def init_params(key, input_channels, conv_filters):
    c1, c2, c3 = conv_filters
    ks = jax.random.split(key, 10)
    scale = 0.1
    return {
        "w1": scale * jax.random.normal(ks[0], (KSIZE, input_channels, c1), jnp.float32),
        "b1": scale * jax.random.normal(ks[1], (1, c1), jnp.float32),
        "w2": scale * jax.random.normal(ks[2], (KSIZE, c1, c2), jnp.float32),
        "b2": scale * jax.random.normal(ks[3], (1, c2), jnp.float32),
        "w3": scale * jax.random.normal(ks[4], (KSIZE, c2, c3), jnp.float32),
        "b3": scale * jax.random.normal(ks[5], (1, c3), jnp.float32),
        "wf1": scale * jax.random.normal(ks[6], (c3 * POOL_OUT, 64), jnp.float32),
        "bf1": scale * jax.random.normal(ks[7], (1, 64), jnp.float32),
        "wf2": scale * jax.random.normal(ks[8], (64, 1), jnp.float32),
        "bf2": scale * jax.random.normal(ks[9], (1, 1), jnp.float32),
    }


if __name__ == "__main__":
    key = jax.random.PRNGKey(0)
    k_x, k_p = jax.random.split(key)

    B, CIN, L = 16, 4, 32                # small; B multiple of 8 -> grid=(2,), L-6 >= 10
    conv_filters = (8, 16, 32)

    x = jax.random.normal(k_x, (B, CIN, L), jnp.float32)     # PyTorch NCL layout
    params = init_params(k_p, CIN, conv_filters)

    out = jax.block_until_ready(cnn_forward(x, params))

    ref = ref_forward(x, params)
    assert out.shape == (B, 1)
    assert jnp.allclose(out, ref, rtol=1e-3, atol=1e-3), (out, ref)

    print("KERNEL_OK")
</pallas_src>

<mosaic_0001>
module attributes {stable_mosaic.version = 11 : i64} {
  func.func @cnn_kernel(%arg0: i32, %arg1: memref<8x32x4xf32, #tpu.memory_space<vmem>>, %arg2: memref<12x8xf32, #tpu.memory_space<vmem>>, %arg3: memref<1x8xf32, #tpu.memory_space<vmem>>, %arg4: memref<24x16xf32, #tpu.memory_space<vmem>>, %arg5: memref<1x16xf32, #tpu.memory_space<vmem>>, %arg6: memref<48x32xf32, #tpu.memory_space<vmem>>, %arg7: memref<1x32xf32, #tpu.memory_space<vmem>>, %arg8: memref<320x64xf32, #tpu.memory_space<vmem>>, %arg9: memref<1x64xf32, #tpu.memory_space<vmem>>, %arg10: memref<64x1xf32, #tpu.memory_space<vmem>>, %arg11: memref<1x1xf32, #tpu.memory_space<vmem>>, %arg12: memref<8x1xf32, #tpu.memory_space<vmem>>) attributes {dimension_semantics = [#tpu.dimension_semantics<parallel>], iteration_bounds = array<i64: 2>, scalar_prefetch = 0 : i64, scratch_operands = 0 : i64, tpu.core_type = #tpu.core_type<tc>, window_params = [{transform_indices = @transform_0, window_bounds = array<i64: 8, 32, 4>}, {pipeline_mode = #tpu.pipeline_mode<synchronous>, transform_indices = @transform_1, window_bounds = array<i64: 12, 8>}, {pipeline_mode = #tpu.pipeline_mode<synchronous>, transform_indices = @transform_2, window_bounds = array<i64: 1, 8>}, {pipeline_mode = #tpu.pipeline_mode<synchronous>, transform_indices = @transform_3, window_bounds = array<i64: 24, 16>}, {pipeline_mode = #tpu.pipeline_mode<synchronous>, transform_indices = @transform_4, window_bounds = array<i64: 1, 16>}, {pipeline_mode = #tpu.pipeline_mode<synchronous>, transform_indices = @transform_5, window_bounds = array<i64: 48, 32>}, {pipeline_mode = #tpu.pipeline_mode<synchronous>, transform_indices = @transform_6, window_bounds = array<i64: 1, 32>}, {pipeline_mode = #tpu.pipeline_mode<synchronous>, transform_indices = @transform_7, window_bounds = array<i64: 320, 64>}, {pipeline_mode = #tpu.pipeline_mode<synchronous>, transform_indices = @transform_8, window_bounds = array<i64: 1, 64>}, {pipeline_mode = #tpu.pipeline_mode<synchronous>, transform_indices = @transform_9, window_bounds = array<i64: 64, 1>}, {pipeline_mode = #tpu.pipeline_mode<synchronous>, transform_indices = @transform_10, window_bounds = array<i64: 1, 1>}, {transform_indices = @transform_11, window_bounds = array<i64: 8, 1>}]} {
    %c0 = arith.constant 0 : index
    %c0_0 = arith.constant 0 : index
    %0 = vector.load %arg2[%c0, %c0_0] : memref<12x8xf32, #tpu.memory_space<vmem>>, vector<12x8xf32>
    %c0_1 = arith.constant 0 : index
    %c0_2 = arith.constant 0 : index
    %1 = vector.load %arg3[%c0_1, %c0_2] : memref<1x8xf32, #tpu.memory_space<vmem>>, vector<1x8xf32>
    %c0_3 = arith.constant 0 : index
    %c0_4 = arith.constant 0 : index
    %2 = vector.load %arg4[%c0_3, %c0_4] : memref<24x16xf32, #tpu.memory_space<vmem>>, vector<24x16xf32>
    %c0_5 = arith.constant 0 : index
    %c0_6 = arith.constant 0 : index
    %3 = vector.load %arg5[%c0_5, %c0_6] : memref<1x16xf32, #tpu.memory_space<vmem>>, vector<1x16xf32>
    %c0_7 = arith.constant 0 : index
    %c0_8 = arith.constant 0 : index
    %4 = vector.load %arg6[%c0_7, %c0_8] : memref<48x32xf32, #tpu.memory_space<vmem>>, vector<48x32xf32>
    %c0_9 = arith.constant 0 : index
    %c0_10 = arith.constant 0 : index
    %5 = vector.load %arg7[%c0_9, %c0_10] : memref<1x32xf32, #tpu.memory_space<vmem>>, vector<1x32xf32>
    %c0_11 = arith.constant 0 : index
    %c0_12 = arith.constant 0 : index
    %c0_13 = arith.constant 0 : index
    %6 = vector.load %arg1[%c0_11, %c0_12, %c0_13] : memref<8x32x4xf32, #tpu.memory_space<vmem>>, vector<1x32x4xf32>
    %7 = vector.shape_cast %6 : vector<1x32x4xf32> to vector<32x4xf32>
    %8 = vector.extract_strided_slice %7 {offsets = [0, 0], sizes = [30, 4], strides = [1, 1]} : vector<32x4xf32> to vector<30x4xf32>
    %9 = vector.extract_strided_slice %7 {offsets = [1, 0], sizes = [30, 4], strides = [1, 1]} : vector<32x4xf32> to vector<30x4xf32>
    %10 = vector.extract_strided_slice %7 {offsets = [2, 0], sizes = [30, 4], strides = [1, 1]} : vector<32x4xf32> to vector<30x4xf32>
    %11 = tpu.concatenate %8, %9, %10 in 1 : vector<30x4xf32>, vector<30x4xf32>, vector<30x4xf32> -> vector<30x12xf32>
    %cst = arith.constant dense<0.000000e+00> : vector<30x8xf32>
    %12 = tpu.matmul %11, %0, %cst {dimension_numbers = #tpu.dot_dimension_numbers<[1], [0], [0], [1], [0, 0, 1, 1], [], []>} : vector<30x12xf32>, vector<12x8xf32>, vector<30x8xf32> -> vector<30x8xf32>
    %13 = vector.broadcast %1 : vector<1x8xf32> to vector<30x8xf32>
    %14 = arith.addf %12, %13 : vector<30x8xf32>
    %cst_14 = arith.constant 0.000000e+00 : f32
    %15 = vector.broadcast %cst_14 : f32 to vector<30x8xf32>
    %16 = arith.maximumf %14, %15 : vector<30x8xf32>
    %17 = vector.extract_strided_slice %16 {offsets = [0, 0], sizes = [28, 8], strides = [1, 1]} : vector<30x8xf32> to vector<28x8xf32>
    %18 = vector.extract_strided_slice %16 {offsets = [1, 0], sizes = [28, 8], strides = [1, 1]} : vector<30x8xf32> to vector<28x8xf32>
    %19 = vector.extract_strided_slice %16 {offsets = [2, 0], sizes = [28, 8], strides = [1, 1]} : vector<30x8xf32> to vector<28x8xf32>
    %20 = tpu.concatenate %17, %18, %19 in 1 : vector<28x8xf32>, vector<28x8xf32>, vector<28x8xf32> -> vector<28x24xf32>
    %cst_15 = arith.constant dense<0.000000e+00> : vector<28x16xf32>
    %21 = tpu.matmul %20, %2, %cst_15 {dimension_numbers = #tpu.dot_dimension_numbers<[1], [0], [0], [1], [0, 0, 1, 1], [], []>} : vector<28x24xf32>, vector<24x16xf32>, vector<28x16xf32> -> vector<28x16xf32>
    %22 = vector.broadcast %3 : vector<1x16xf32> to vector<28x16xf32>
    %23 = arith.addf %21, %22 : vector<28x16xf32>
    %cst_16 = arith.constant 0.000000e+00 : f32
    %24 = vector.broadcast %cst_16 : f32 to vector<28x16xf32>
    %25 = arith.maximumf %23, %24 : vector<28x16xf32>
    %26 = vector.extract_strided_slice %25 {offsets = [0, 0], sizes = [26, 16], strides = [1, 1]} : vector<28x16xf32> to vector<26x16xf32>
    %27 = vector.extract_strided_slice %25 {offsets = [1, 0], sizes = [26, 16], strides = [1, 1]} : vector<28x16xf32> to vector<26x16xf32>
    %28 = vector.extract_strided_slice %25 {offsets = [2, 0], sizes = [26, 16], strides = [1, 1]} : vector<28x16xf32> to vector<26x16xf32>
    %29 = tpu.concatenate %26, %27, %28 in 1 : vector<26x16xf32>, vector<26x16xf32>, vector<26x16xf32> -> vector<26x48xf32>
    %cst_17 = arith.constant dense<0.000000e+00> : vector<26x32xf32>
    %30 = tpu.matmul %29, %4, %cst_17 {dimension_numbers = #tpu.dot_dimension_numbers<[1], [0], [0], [1], [0, 0, 1, 1], [], []>} : vector<26x48xf32>, vector<48x32xf32>, vector<26x32xf32> -> vector<26x32xf32>
    %31 = vector.broadcast %5 : vector<1x32xf32> to vector<26x32xf32>
    %32 = arith.addf %30, %31 : vector<26x32xf32>
    %cst_18 = arith.constant 0.000000e+00 : f32
    %33 = vector.broadcast %cst_18 : f32 to vector<26x32xf32>
    %34 = arith.maximumf %32, %33 : vector<26x32xf32>
    %35 = vector.extract_strided_slice %34 {offsets = [0, 0], sizes = [3, 32], strides = [1, 1]} : vector<26x32xf32> to vector<3x32xf32>
    %cst_19 = arith.constant dense<0xFF800000> : vector<32xf32>
    %36 = vector.multi_reduction <maximumf>, %35, %cst_19 [0] : vector<3x32xf32> to vector<32xf32>
    %37 = vector.shape_cast %36 : vector<32xf32> to vector<1x32xf32>
    %38 = vector.extract_strided_slice %34 {offsets = [2, 0], sizes = [4, 32], strides = [1, 1]} : vector<26x32xf32> to vector<4x32xf32>
    %cst_20 = arith.constant dense<0xFF800000> : vector<32xf32>
    %39 = vector.multi_reduction <maximumf>, %38, %cst_20 [0] : vector<4x32xf32> to vector<32xf32>
    %40 = vector.shape_cast %39 : vector<32xf32> to vector<1x32xf32>
    %41 = vector.extract_strided_slice %34 {offsets = [5, 0], sizes = [3, 32], strides = [1, 1]} : vector<26x32xf32> to vector<3x32xf32>
    %cst_21 = arith.constant dense<0xFF800000> : vector<32xf32>
    %42 = vector.multi_reduction <maximumf>, %41, %cst_21 [0] : vector<3x32xf32> to vector<32xf32>
    %43 = vector.shape_cast %42 : vector<32xf32> to vector<1x32xf32>
    %44 = vector.extract_strided_slice %34 {offsets = [7, 0], sizes = [4, 32], strides = [1, 1]} : vector<26x32xf32> to vector<4x32xf32>
    %cst_22 = arith.constant dense<0xFF800000> : vector<32xf32>
    %45 = vector.multi_reduction <maximumf>, %44, %cst_22 [0] : vector<4x32xf32> to vector<32xf32>
    %46 = vector.shape_cast %45 : vector<32xf32> to vector<1x32xf32>
    %47 = vector.extract_strided_slice %34 {offsets = [10, 0], sizes = [3, 32], strides = [1, 1]} : vector<26x32xf32> to vector<3x32xf32>
    %cst_23 = arith.constant dense<0xFF800000> : vector<32xf32>
    %48 = vector.multi_reduction <maximumf>, %47, %cst_23 [0] : vector<3x32xf32> to vector<32xf32>
    %49 = vector.shape_cast %48 : vector<32xf32> to vector<1x32xf32>
    %50 = vector.extract_strided_slice %34 {offsets = [13, 0], sizes = [3, 32], strides = [1, 1]} : vector<26x32xf32> to vector<3x32xf32>
    %cst_24 = arith.constant dense<0xFF800000> : vector<32xf32>
    %51 = vector.multi_reduction <maximumf>, %50, %cst_24 [0] : vector<3x32xf32> to vector<32xf32>
    %52 = vector.shape_cast %51 : vector<32xf32> to vector<1x32xf32>
    %53 = vector.extract_strided_slice %34 {offsets = [15, 0], sizes = [4, 32], strides = [1, 1]} : vector<26x32xf32> to vector<4x32xf32>
    %cst_25 = arith.constant dense<0xFF800000> : vector<32xf32>
    %54 = vector.multi_reduction <maximumf>, %53, %cst_25 [0] : vector<4x32xf32> to vector<32xf32>
    %55 = vector.shape_cast %54 : vector<32xf32> to vector<1x32xf32>
    %56 = vector.extract_strided_slice %34 {offsets = [18, 0], sizes = [3, 32], strides = [1, 1]} : vector<26x32xf32> to vector<3x32xf32>
    %cst_26 = arith.constant dense<0xFF800000> : vector<32xf32>
    %57 = vector.multi_reduction <maximumf>, %56, %cst_26 [0] : vector<3x32xf32> to vector<32xf32>
    %58 = vector.shape_cast %57 : vector<32xf32> to vector<1x32xf32>
    %59 = vector.extract_strided_slice %34 {offsets = [20, 0], sizes = [4, 32], strides = [1, 1]} : vector<26x32xf32> to vector<4x32xf32>
    %cst_27 = arith.constant dense<0xFF800000> : vector<32xf32>
    %60 = vector.multi_reduction <maximumf>, %59, %cst_27 [0] : vector<4x32xf32> to vector<32xf32>
    %61 = vector.shape_cast %60 : vector<32xf32> to vector<1x32xf32>
    %62 = vector.extract_strided_slice %34 {offsets = [23, 0], sizes = [3, 32], strides = [1, 1]} : vector<26x32xf32> to vector<3x32xf32>
    %cst_28 = arith.constant dense<0xFF800000> : vector<32xf32>
    %63 = vector.multi_reduction <maximumf>, %62, %cst_28 [0] : vector<3x32xf32> to vector<32xf32>
    %64 = vector.shape_cast %63 : vector<32xf32> to vector<1x32xf32>
    %65 = tpu.concatenate %37, %40, %43, %46, %49, %52, %55, %58, %61, %64 in 1 : vector<1x32xf32>, vector<1x32xf32>, vector<1x32xf32>, vector<1x32xf32>, vector<1x32xf32>, vector<1x32xf32>, vector<1x32xf32>, vector<1x32xf32>, vector<1x32xf32>, vector<1x32xf32> -> vector<1x320xf32>
    %c1 = arith.constant 1 : index
    %c0_29 = arith.constant 0 : index
    %c0_30 = arith.constant 0 : index
    %66 = vector.load %arg1[%c1, %c0_29, %c0_30] : memref<8x32x4xf32, #tpu.memory_space<vmem>>, vector<1x32x4xf32>
    %67 = vector.shape_cast %66 : vector<1x32x4xf32> to vector<32x4xf32>
    %68 = vector.extract_strided_slice %67 {offsets = [0, 0], sizes = [30, 4], strides = [1, 1]} : vector<32x4xf32> to vector<30x4xf32>
    %69 = vector.extract_strided_slice %67 {offsets = [1, 0], sizes = [30, 4], strides = [1, 1]} : vector<32x4xf32> to vector<30x4xf32>
    %70 = vector.extract_strided_slice %67 {offsets = [2, 0], sizes = [30, 4], strides = [1, 1]} : vector<32x4xf32> to vector<30x4xf32>
    %71 = tpu.concatenate %68, %69, %70 in 1 : vector<30x4xf32>, vector<30x4xf32>, vector<30x4xf32> -> vector<30x12xf32>
    %cst_31 = arith.constant dense<0.000000e+00> : vector<30x8xf32>
    %72 = tpu.matmul %71, %0, %cst_31 {dimension_numbers = #tpu.dot_dimension_numbers<[1], [0], [0], [1], [0, 0, 1, 1], [], []>} : vector<30x12xf32>, vector<12x8xf32>, vector<30x8xf32> -> vector<30x8xf32>
    %73 = vector.broadcast %1 : vector<1x8xf32> to vector<30x8xf32>
    %74 = arith.addf %72, %73 : vector<30x8xf32>
    %cst_32 = arith.constant 0.000000e+00 : f32
    %75 = vector.broadcast %cst_32 : f32 to vector<30x8xf32>
    %76 = arith.maximumf %74, %75 : vector<30x8xf32>
    %77 = vector.extract_strided_slice %76 {offsets = [0, 0], sizes = [28, 8], strides = [1, 1]} : vector<30x8xf32> to vector<28x8xf32>
    %78 = vector.extract_strided_slice %76 {offsets = [1, 0], sizes = [28, 8], strides = [1, 1]} : vector<30x8xf32> to vector<28x8xf32>
    %79 = vector.extract_strided_slice %76 {offsets = [2, 0], sizes = [28, 8], strides = [1, 1]} : vector<30x8xf32> to vector<28x8xf32>
    %80 = tpu.concatenate %77, %78, %79 in 1 : vector<28x8xf32>, vector<28x8xf32>, vector<28x8xf32> -> vector<28x24xf32>
    %cst_33 = arith.constant dense<0.000000e+00> : vector<28x16xf32>
    %81 = tpu.matmul %80, %2, %cst_33 {dimension_numbers = #tpu.dot_dimension_numbers<[1], [0], [0], [1], [0, 0, 1, 1], [], []>} : vector<28x24xf32>, vector<24x16xf32>, vector<28x16xf32> -> vector<28x16xf32>
    %82 = vector.broadcast %3 : vector<1x16xf32> to vector<28x16xf32>
    %83 = arith.addf %81, %82 : vector<28x16xf32>
    %cst_34 = arith.constant 0.000000e+00 : f32
    %84 = vector.broadcast %cst_34 : f32 to vector<28x16xf32>
    %85 = arith.maximumf %83, %84 : vector<28x16xf32>
    %86 = vector.extract_strided_slice %85 {offsets = [0, 0], sizes = [26, 16], strides = [1, 1]} : vector<28x16xf32> to vector<26x16xf32>
    %87 = vector.extract_strided_slice %85 {offsets = [1, 0], sizes = [26, 16], strides = [1, 1]} : vector<28x16xf32> to vector<26x16xf32>
    %88 = vector.extract_strided_slice %85 {offsets = [2, 0], sizes = [26, 16], strides = [1, 1]} : vector<28x16xf32> to vector<26x16xf32>
    %89 = tpu.concatenate %86, %87, %88 in 1 : vector<26x16xf32>, vector<26x16xf32>, vector<26x16xf32> -> vector<26x48xf32>
    %cst_35 = arith.constant dense<0.000000e+00> : vector<26x32xf32>
    %90 = tpu.matmul %89, %4, %cst_35 {dimension_numbers = #tpu.dot_dimension_numbers<[1], [0], [0], [1], [0, 0, 1, 1], [], []>} : vector<26x48xf32>, vector<48x32xf32>, vector<26x32xf32> -> vector<26x32xf32>
    %91 = vector.broadcast %5 : vector<1x32xf32> to vector<26x32xf32>
    %92 = arith.addf %90, %91 : vector<26x32xf32>
    %cst_36 = arith.constant 0.000000e+00 : f32
    %93 = vector.broadcast %cst_36 : f32 to vector<26x32xf32>
    %94 = arith.maximumf %92, %93 : vector<26x32xf32>
    %95 = vector.extract_strided_slice %94 {offsets = [0, 0], sizes = [3, 32], strides = [1, 1]} : vector<26x32xf32> to vector<3x32xf32>
    %cst_37 = arith.constant dense<0xFF800000> : vector<32xf32>
    %96 = vector.multi_reduction <maximumf>, %95, %cst_37 [0] : vector<3x32xf32> to vector<32xf32>
    %97 = vector.shape_cast %96 : vector<32xf32> to vector<1x32xf32>
    %98 = vector.extract_strided_slice %94 {offsets = [2, 0], sizes = [4, 32], strides = [1, 1]} : vector<26x32xf32> to vector<4x32xf32>
    %cst_38 = arith.constant dense<0xFF800000> : vector<32xf32>
    %99 = vector.multi_reduction <maximumf>, %98, %cst_38 [0] : vector<4x32xf32> to vector<32xf32>
    %100 = vector.shape_cast %99 : vector<32xf32> to vector<1x32xf32>
    %101 = vector.extract_strided_slice %94 {offsets = [5, 0], sizes = [3, 32], strides = [1, 1]} : vector<26x32xf32> to vector<3x32xf32>
    %cst_39 = arith.constant dense<0xFF800000> : vector<32xf32>
    %102 = vector.multi_reduction <maximumf>, %101, %cst_39 [0] : vector<3x32xf32> to vector<32xf32>
    %103 = vector.shape_cast %102 : vector<32xf32> to vector<1x32xf32>
    %104 = vector.extract_strided_slice %94 {offsets = [7, 0], sizes = [4, 32], strides = [1, 1]} : vector<26x32xf32> to vector<4x32xf32>
    %cst_40 = arith.constant dense<0xFF800000> : vector<32xf32>
    %105 = vector.multi_reduction <maximumf>, %104, %cst_40 [0] : vector<4x32xf32> to vector<32xf32>
    %106 = vector.shape_cast %105 : vector<32xf32> to vector<1x32xf32>
    %107 = vector.extract_strided_slice %94 {offsets = [10, 0], sizes = [3, 32], strides = [1, 1]} : vector<26x32xf32> to vector<3x32xf32>
    %cst_41 = arith.constant dense<0xFF800000> : vector<32xf32>
    %108 = vector.multi_reduction <maximumf>, %107, %cst_41 [0] : vector<3x32xf32> to vector<32xf32>
    %109 = vector.shape_cast %108 : vector<32xf32> to vector<1x32xf32>
    %110 = vector.extract_strided_slice %94 {offsets = [13, 0], sizes = [3, 32], strides = [1, 1]} : vector<26x32xf32> to vector<3x32xf32>
    %cst_42 = arith.constant dense<0xFF800000> : vector<32xf32>
    %111 = vector.multi_reduction <maximumf>, %110, %cst_42 [0] : vector<3x32xf32> to vector<32xf32>
    %112 = vector.shape_cast %111 : vector<32xf32> to vector<1x32xf32>
    %113 = vector.extract_strided_slice %94 {offsets = [15, 0], sizes = [4, 32], strides = [1, 1]} : vector<26x32xf32> to vector<4x32xf32>
    %cst_43 = arith.constant dense<0xFF800000> : vector<32xf32>
    %114 = vector.multi_reduction <maximumf>, %113, %cst_43 [0] : vector<4x32xf32> to vector<32xf32>
    %115 = vector.shape_cast %114 : vector<32xf32> to vector<1x32xf32>
    %116 = vector.extract_strided_slice %94 {offsets = [18, 0], sizes = [3, 32], strides = [1, 1]} : vector<26x32xf32> to vector<3x32xf32>
    %cst_44 = arith.constant dense<0xFF800000> : vector<32xf32>
    %117 = vector.multi_reduction <maximumf>, %116, %cst_44 [0] : vector<3x32xf32> to vector<32xf32>
    %118 = vector.shape_cast %117 : vector<32xf32> to vector<1x32xf32>
    %119 = vector.extract_strided_slice %94 {offsets = [20, 0], sizes = [4, 32], strides = [1, 1]} : vector<26x32xf32> to vector<4x32xf32>
    %cst_45 = arith.constant dense<0xFF800000> : vector<32xf32>
    %120 = vector.multi_reduction <maximumf>, %119, %cst_45 [0] : vector<4x32xf32> to vector<32xf32>
    %121 = vector.shape_cast %120 : vector<32xf32> to vector<1x32xf32>
    %122 = vector.extract_strided_slice %94 {offsets = [23, 0], sizes = [3, 32], strides = [1, 1]} : vector<26x32xf32> to vector<3x32xf32>
    %cst_46 = arith.constant dense<0xFF800000> : vector<32xf32>
    %123 = vector.multi_reduction <maximumf>, %122, %cst_46 [0] : vector<3x32xf32> to vector<32xf32>
    %124 = vector.shape_cast %123 : vector<32xf32> to vector<1x32xf32>
    %125 = tpu.concatenate %97, %100, %103, %106, %109, %112, %115, %118, %121, %124 in 1 : vector<1x32xf32>, vector<1x32xf32>, vector<1x32xf32>, vector<1x32xf32>, vector<1x32xf32>, vector<1x32xf32>, vector<1x32xf32>, vector<1x32xf32>, vector<1x32xf32>, vector<1x32xf32> -> vector<1x320xf32>
    %c2 = arith.constant 2 : index
    %c0_47 = arith.constant 0 : index
    %c0_48 = arith.constant 0 : index
    %126 = vector.load %arg1[%c2, %c0_47, %c0_48] : memref<8x32x4xf32, #tpu.memory_space<vmem>>, vector<1x32x4xf32>
    %127 = vector.shape_cast %126 : vector<1x32x4xf32> to vector<32x4xf32>
    %128 = vector.extract_strided_slice %127 {offsets = [0, 0], sizes = [30, 4], strides = [1, 1]} : vector<32x4xf32> to vector<30x4xf32>
    %129 = vector.extract_strided_slice %127 {offsets = [1, 0], sizes = [30, 4], strides = [1, 1]} : vector<32x4xf32> to vector<30x4xf32>
    %130 = vector.extract_strided_slice %127 {offsets = [2, 0], sizes = [30, 4], strides = [1, 1]} : vector<32x4xf32> to vector<30x4xf32>
    %131 = tpu.concatenate %128, %129, %130 in 1 : vector<30x4xf32>, vector<30x4xf32>, vector<30x4xf32> -> vector<30x12xf32>
    %cst_49 = arith.constant dense<0.000000e+00> : vector<30x8xf32>
    %132 = tpu.matmul %131, %0, %cst_49 {dimension_numbers = #tpu.dot_dimension_numbers<[1], [0], [0], [1], [0, 0, 1, 1], [], []>} : vector<30x12xf32>, vector<12x8xf32>, vector<30x8xf32> -> vector<30x8xf32>
    %133 = vector.broadcast %1 : vector<1x8xf32> to vector<30x8xf32>
    %134 = arith.addf %132, %133 : vector<30x8xf32>
    %cst_50 = arith.constant 0.000000e+00 : f32
    %135 = vector.broadcast %cst_50 : f32 to vector<30x8xf32>
    %136 = arith.maximumf %134, %135 : vector<30x8xf32>
    %137 = vector.extract_strided_slice %136 {offsets = [0, 0], sizes = [28, 8], strides = [1, 1]} : vector<30x8xf32> to vector<28x8xf32>
    %138 = vector.extract_strided_slice %136 {offsets = [1, 0], sizes = [28, 8], strides = [1, 1]} : vector<30x8xf32> to vector<28x8xf32>
    %139 = vector.extract_strided_slice %136 {offsets = [2, 0], sizes = [28, 8], strides = [1, 1]} : vector<30x8xf32> to vector<28x8xf32>
    %140 = tpu.concatenate %137, %138, %139 in 1 : vector<28x8xf32>, vector<28x8xf32>, vector<28x8xf32> -> vector<28x24xf32>
    %cst_51 = arith.constant dense<0.000000e+00> : vector<28x16xf32>
    %141 = tpu.matmul %140, %2, %cst_51 {dimension_numbers = #tpu.dot_dimension_numbers<[1], [0], [0], [1], [0, 0, 1, 1], [], []>} : vector<28x24xf32>, vector<24x16xf32>, vector<28x16xf32> -> vector<28x16xf32>
    %142 = vector.broadcast %3 : vector<1x16xf32> to vector<28x16xf32>
    %143 = arith.addf %141, %142 : vector<28x16xf32>
    %cst_52 = arith.constant 0.000000e+00 : f32
    %144 = vector.broadcast %cst_52 : f32 to vector<28x16xf32>
    %145 = arith.maximumf %143, %144 : vector<28x16xf32>
    %146 = vector.extract_strided_slice %145 {offsets = [0, 0], sizes = [26, 16], strides = [1, 1]} : vector<28x16xf32> to vector<26x16xf32>
    %147 = vector.extract_strided_slice %145 {offsets = [1, 0], sizes = [26, 16], strides = [1, 1]} : vector<28x16xf32> to vector<26x16xf32>
    %148 = vector.extract_strided_slice %145 {offsets = [2, 0], sizes = [26, 16], strides = [1, 1]} : vector<28x16xf32> to vector<26x16xf32>
    %149 = tpu.concatenate %146, %147, %148 in 1 : vector<26x16xf32>, vector<26x16xf32>, vector<26x16xf32> -> vector<26x48xf32>
    %cst_53 = arith.constant dense<0.000000e+00> : vector<26x32xf32>
    %150 = tpu.matmul %149, %4, %cst_53 {dimension_numbers = #tpu.dot_dimension_numbers<[1], [0], [0], [1], [0, 0, 1, 1], [], []>} : vector<26x48xf32>, vector<48x32xf32>, vector<26x32xf32> -> vector<26x32xf32>
    %151 = vector.broadcast %5 : vector<1x32xf32> to vector<26x32xf32>
    %152 = arith.addf %150, %151 : vector<26x32xf32>
    %cst_54 = arith.constant 0.000000e+00 : f32
    %153 = vector.broadcast %cst_54 : f32 to vector<26x32xf32>
    %154 = arith.maximumf %152, %153 : vector<26x32xf32>
    %155 = vector.extract_strided_slice %154 {offsets = [0, 0], sizes = [3, 32], strides = [1, 1]} : vector<26x32xf32> to vector<3x32xf32>
    %cst_55 = arith.constant dense<0xFF800000> : vector<32xf32>
    %156 = vector.multi_reduction <maximumf>, %155, %cst_55 [0] : vector<3x32xf32> to vector<32xf32>
    %157 = vector.shape_cast %156 : vector<32xf32> to vector<1x32xf32>
    %158 = vector.extract_strided_slice %154 {offsets = [2, 0], sizes = [4, 32], strides = [1, 1]} : vector<26x32xf32> to vector<4x32xf32>
    %cst_56 = arith.constant dense<0xFF800000> : vector<32xf32>
    %159 = vector.multi_reduction <maximumf>, %158, %cst_56 [0] : vector<4x32xf32> to vector<32xf32>
    %160 = vector.shape_cast %159 : vector<32xf32> to vector<1x32xf32>
    %161 = vector.extract_strided_slice %154 {offsets = [5, 0], sizes = [3, 32], strides = [1, 1]} : vector<26x32xf32> to vector<3x32xf32>
    %cst_57 = arith.constant dense<0xFF800000> : vector<32xf32>
    %162 = vector.multi_reduction <maximumf>, %161, %cst_57 [0] : vector<3x32xf32> to vector<32xf32>
    %163 = vector.shape_cast %162 : vector<32xf32> to vector<1x32xf32>
    %164 = vector.extract_strided_slice %154 {offsets = [7, 0], sizes = [4, 32], strides = [1, 1]} : vector<26x32xf32> to vector<4x32xf32>
    %cst_58 = arith.constant dense<0xFF800000> : vector<32xf32>
    %165 = vector.multi_reduction <maximumf>, %164, %cst_58 [0] : vector<4x32xf32> to vector<32xf32>
    %166 = vector.shape_cast %165 : vector<32xf32> to vector<1x32xf32>
    %167 = vector.extract_strided_slice %154 {offsets = [10, 0], sizes = [3, 32], strides = [1, 1]} : vector<26x32xf32> to vector<3x32xf32>
    %cst_59 = arith.constant dense<0xFF800000> : vector<32xf32>
    %168 = vector.multi_reduction <maximumf>, %167, %cst_59 [0] : vector<3x32xf32> to vector<32xf32>
    %169 = vector.shape_cast %168 : vector<32xf32> to vector<1x32xf32>
    %170 = vector.extract_strided_slice %154 {offsets = [13, 0], sizes = [3, 32], strides = [1, 1]} : vector<26x32xf32> to vector<3x32xf32>
    %cst_60 = arith.constant dense<0xFF800000> : vector<32xf32>
    %171 = vector.multi_reduction <maximumf>, %170, %cst_60 [0] : vector<3x32xf32> to vector<32xf32>
    %172 = vector.shape_cast %171 : vector<32xf32> to vector<1x32xf32>
    %173 = vector.extract_strided_slice %154 {offsets = [15, 0], sizes = [4, 32], strides = [1, 1]} : vector<26x32xf32> to vector<4x32xf32>
    %cst_61 = arith.constant dense<0xFF800000> : vector<32xf32>
    %174 = vector.multi_reduction <maximumf>, %173, %cst_61 [0] : vector<4x32xf32> to vector<32xf32>
    %175 = vector.shape_cast %174 : vector<32xf32> to vector<1x32xf32>
    %176 = vector.extract_strided_slice %154 {offsets = [18, 0], sizes = [3, 32], strides = [1, 1]} : vector<26x32xf32> to vector<3x32xf32>
    %cst_62 = arith.constant dense<0xFF800000> : vector<32xf32>
    %177 = vector.multi_reduction <maximumf>, %176, %cst_62 [0] : vector<3x32xf32> to vector<32xf32>
    %178 = vector.shape_cast %177 : vector<32xf32> to vector<1x32xf32>
    %179 = vector.extract_strided_slice %154 {offsets = [20, 0], sizes = [4, 32], strides = [1, 1]} : vector<26x32xf32> to vector<4x32xf32>
    %cst_63 = arith.constant dense<0xFF800000> : vector<32xf32>
    %180 = vector.multi_reduction <maximumf>, %179, %cst_63 [0] : vector<4x32xf32> to vector<32xf32>
    %181 = vector.shape_cast %180 : vector<32xf32> to vector<1x32xf32>
    %182 = vector.extract_strided_slice %154 {offsets = [23, 0], sizes = [3, 32], strides = [1, 1]} : vector<26x32xf32> to vector<3x32xf32>
    %cst_64 = arith.constant dense<0xFF800000> : vector<32xf32>
    %183 = vector.multi_reduction <maximumf>, %182, %cst_64 [0] : vector<3x32xf32> to vector<32xf32>
    %184 = vector.shape_cast %183 : vector<32xf32> to vector<1x32xf32>
    %185 = tpu.concatenate %157, %160, %163, %166, %169, %172, %175, %178, %181, %184 in 1 : vector<1x32xf32>, vector<1x32xf32>, vector<1x32xf32>, vector<1x32xf32>, vector<1x32xf32>, vector<1x32xf32>, vector<1x32xf32>, vector<1x32xf32>, vector<1x32xf32>, vector<1x32xf32> -> vector<1x320xf32>
    %c3 = arith.constant 3 : index
    %c0_65 = arith.constant 0 : index
    %c0_66 = arith.constant 0 : index
    %186 = vector.load %arg1[%c3, %c0_65, %c0_66] : memref<8x32x4xf32, #tpu.memory_space<vmem>>, vector<1x32x4xf32>
    %187 = vector.shape_cast %186 : vector<1x32x4xf32> to vector<32x4xf32>
    %188 = vector.extract_strided_slice %187 {offsets = [0, 0], sizes = [30, 4], strides = [1, 1]} : vector<32x4xf32> to vector<30x4xf32>
    %189 = vector.extract_strided_slice %187 {offsets = [1, 0], sizes = [30, 4], strides = [1, 1]} : vector<32x4xf32> to vector<30x4xf32>
    %190 = vector.extract_strided_slice %187 {offsets = [2, 0], sizes = [30, 4], strides = [1, 1]} : vector<32x4xf32> to vector<30x4xf32>
    %191 = tpu.concatenate %188, %189, %190 in 1 : vector<30x4xf32>, vector<30x4xf32>, vector<30x4xf32> -> vector<30x12xf32>
    %cst_67 = arith.constant dense<0.000000e+00> : vector<30x8xf32>
    %192 = tpu.matmul %191, %0, %cst_67 {dimension_numbers = #tpu.dot_dimension_numbers<[1], [0], [0], [1], [0, 0, 1, 1], [], []>} : vector<30x12xf32>, vector<12x8xf32>, vector<30x8xf32> -> vector<30x8xf32>
    %193 = vector.broadcast %1 : vector<1x8xf32> to vector<30x8xf32>
    %194 = arith.addf %192, %193 : vector<30x8xf32>
    %cst_68 = arith.constant 0.000000e+00 : f32
    %195 = vector.broadcast %cst_68 : f32 to vector<30x8xf32>
    %196 = arith.maximumf %194, %195 : vector<30x8xf32>
    %197 = vector.extract_strided_slice %196 {offsets = [0, 0], sizes = [28, 8], strides = [1, 1]} : vector<30x8xf32> to vector<28x8xf32>
    %198 = vector.extract_strided_slice %196 {offsets = [1, 0], sizes = [28, 8], strides = [1, 1]} : vector<30x8xf32> to vector<28x8xf32>
    %199 = vector.extract_strided_slice %196 {offsets = [2, 0], sizes = [28, 8], strides = [1, 1]} : vector<30x8xf32> to vector<28x8xf32>
    %200 = tpu.concatenate %197, %198, %199 in 1 : vector<28x8xf32>, vector<28x8xf32>, vector<28x8xf32> -> vector<28x24xf32>
    %cst_69 = arith.constant dense<0.000000e+00> : vector<28x16xf32>
    %201 = tpu.matmul %200, %2, %cst_69 {dimension_numbers = #tpu.dot_dimension_numbers<[1], [0], [0], [1], [0, 0, 1, 1], [], []>} : vector<28x24xf32>, vector<24x16xf32>, vector<28x16xf32> -> vector<28x16xf32>
    %202 = vector.broadcast %3 : vector<1x16xf32> to vector<28x16xf32>
    %203 = arith.addf %201, %202 : vector<28x16xf32>
    %cst_70 = arith.constant 0.000000e+00 : f32
    %204 = vector.broadcast %cst_70 : f32 to vector<28x16xf32>
    %205 = arith.maximumf %203, %204 : vector<28x16xf32>
    %206 = vector.extract_strided_slice %205 {offsets = [0, 0], sizes = [26, 16], strides = [1, 1]} : vector<28x16xf32> to vector<26x16xf32>
    %207 = vector.extract_strided_slice %205 {offsets = [1, 0], sizes = [26, 16], strides = [1, 1]} : vector<28x16xf32> to vector<26x16xf32>
    %208 = vector.extract_strided_slice %205 {offsets = [2, 0], sizes = [26, 16], strides = [1, 1]} : vector<28x16xf32> to vector<26x16xf32>
    %209 = tpu.concatenate %206, %207, %208 in 1 : vector<26x16xf32>, vector<26x16xf32>, vector<26x16xf32> -> vector<26x48xf32>
    %cst_71 = arith.constant dense<0.000000e+00> : vector<26x32xf32>
    %210 = tpu.matmul %209, %4, %cst_71 {dimension_numbers = #tpu.dot_dimension_numbers<[1], [0], [0], [1], [0, 0, 1, 1], [], []>} : vector<26x48xf32>, vector<48x32xf32>, vector<26x32xf32> -> vector<26x32xf32>
    %211 = vector.broadcast %5 : vector<1x32xf32> to vector<26x32xf32>
    %212 = arith.addf %210, %211 : vector<26x32xf32>
    %cst_72 = arith.constant 0.000000e+00 : f32
    %213 = vector.broadcast %cst_72 : f32 to vector<26x32xf32>
    %214 = arith.maximumf %212, %213 : vector<26x32xf32>
    %215 = vector.extract_strided_slice %214 {offsets = [0, 0], sizes = [3, 32], strides = [1, 1]} : vector<26x32xf32> to vector<3x32xf32>
    %cst_73 = arith.constant dense<0xFF800000> : vector<32xf32>
    %216 = vector.multi_reduction <maximumf>, %215, %cst_73 [0] : vector<3x32xf32> to vector<32xf32>
    %217 = vector.shape_cast %216 : vector<32xf32> to vector<1x32xf32>
    %218 = vector.extract_strided_slice %214 {offsets = [2, 0], sizes = [4, 32], strides = [1, 1]} : vector<26x32xf32> to vector<4x32xf32>
    %cst_74 = arith.constant dense<0xFF800000> : vector<32xf32>
    %219 = vector.multi_reduction <maximumf>, %218, %cst_74 [0] : vector<4x32xf32> to vector<32xf32>
    %220 = vector.shape_cast %219 : vector<32xf32> to vector<1x32xf32>
    %221 = vector.extract_strided_slice %214 {offsets = [5, 0], sizes = [3, 32], strides = [1, 1]} : vector<26x32xf32> to vector<3x32xf32>
    %cst_75 = arith.constant dense<0xFF800000> : vector<32xf32>
    %222 = vector.multi_reduction <maximumf>, %221, %cst_75 [0] : vector<3x32xf32> to vector<32xf32>
    %223 = vector.shape_cast %222 : vector<32xf32> to vector<1x32xf32>
    %224 = vector.extract_strided_slice %214 {offsets = [7, 0], sizes = [4, 32], strides = [1, 1]} : vector<26x32xf32> to vector<4x32xf32>
    %cst_76 = arith.constant dense<0xFF800000> : vector<32xf32>
    %225 = vector.multi_reduction <maximumf>, %224, %cst_76 [0] : vector<4x32xf32> to vector<32xf32>
    %226 = vector.shape_cast %225 : vector<32xf32> to vector<1x32xf32>
    %227 = vector.extract_strided_slice %214 {offsets = [10, 0], sizes = [3, 32], strides = [1, 1]} : vector<26x32xf32> to vector<3x32xf32>
    %cst_77 = arith.constant dense<0xFF800000> : vector<32xf32>
    %228 = vector.multi_reduction <maximumf>, %227, %cst_77 [0] : vector<3x32xf32> to vector<32xf32>
    %229 = vector.shape_cast %228 : vector<32xf32> to vector<1x32xf32>
    %230 = vector.extract_strided_slice %214 {offsets = [13, 0], sizes = [3, 32], strides = [1, 1]} : vector<26x32xf32> to vector<3x32xf32>
    %cst_78 = arith.constant dense<0xFF800000> : vector<32xf32>
    %231 = vector.multi_reduction <maximumf>, %230, %cst_78 [0] : vector<3x32xf32> to vector<32xf32>
    %232 = vector.shape_cast %231 : vector<32xf32> to vector<1x32xf32>
    %233 = vector.extract_strided_slice %214 {offsets = [15, 0], sizes = [4, 32], strides = [1, 1]} : vector<26x32xf32> to vector<4x32xf32>
    %cst_79 = arith.constant dense<0xFF800000> : vector<32xf32>
    %234 = vector.multi_reduction <maximumf>, %233, %cst_79 [0] : vector<4x32xf32> to vector<32xf32>
    %235 = vector.shape_cast %234 : vector<32xf32> to vector<1x32xf32>
    %236 = vector.extract_strided_slice %214 {offsets = [18, 0], sizes = [3, 32], strides = [1, 1]} : vector<26x32xf32> to vector<3x32xf32>
    %cst_80 = arith.constant dense<0xFF800000> : vector<32xf32>
    %237 = vector.multi_reduction <maximumf>, %236, %cst_80 [0] : vector<3x32xf32> to vector<32xf32>
    %238 = vector.shape_cast %237 : vector<32xf32> to vector<1x32xf32>
    %239 = vector.extract_strided_slice %214 {offsets = [20, 0], sizes = [4, 32], strides = [1, 1]} : vector<26x32xf32> to vector<4x32xf32>
    %cst_81 = arith.constant dense<0xFF800000> : vector<32xf32>
    %240 = vector.multi_reduction <maximumf>, %239, %cst_81 [0] : vector<4x32xf32> to vector<32xf32>
    %241 = vector.shape_cast %240 : vector<32xf32> to vector<1x32xf32>
    %242 = vector.extract_strided_slice %214 {offsets = [23, 0], sizes = [3, 32], strides = [1, 1]} : vector<26x32xf32> to vector<3x32xf32>
    %cst_82 = arith.constant dense<0xFF800000> : vector<32xf32>
    %243 = vector.multi_reduction <maximumf>, %242, %cst_82 [0] : vector<3x32xf32> to vector<32xf32>
    %244 = vector.shape_cast %243 : vector<32xf32> to vector<1x32xf32>
    %245 = tpu.concatenate %217, %220, %223, %226, %229, %232, %235, %238, %241, %244 in 1 : vector<1x32xf32>, vector<1x32xf32>, vector<1x32xf32>, vector<1x32xf32>, vector<1x32xf32>, vector<1x32xf32>, vector<1x32xf32>, vector<1x32xf32>, vector<1x32xf32>, vector<1x32xf32> -> vector<1x320xf32>
    %c4 = arith.constant 4 : index
    %c0_83 = arith.constant 0 : index
    %c0_84 = arith.constant 0 : index
    %246 = vector.load %arg1[%c4, %c0_83, %c0_84] : memref<8x32x4xf32, #tpu.memory_space<vmem>>, vector<1x32x4xf32>
    %247 = vector.shape_cast %246 : vector<1x32x4xf32> to vector<32x4xf32>
    %248 = vector.extract_strided_slice %247 {offsets = [0, 0], sizes = [30, 4], strides = [1, 1]} : vector<32x4xf32> to vector<30x4xf32>
    %249 = vector.extract_strided_slice %247 {offsets = [1, 0], sizes = [30, 4], strides = [1, 1]} : vector<32x4xf32> to vector<30x4xf32>
    %250 = vector.extract_strided_slice %247 {offsets = [2, 0], sizes = [30, 4], strides = [1, 1]} : vector<32x4xf32> to vector<30x4xf32>
    %251 = tpu.concatenate %248, %249, %250 in 1 : vector<30x4xf32>, vector<30x4xf32>, vector<30x4xf32> -> vector<30x12xf32>
    %cst_85 = arith.constant dense<0.000000e+00> : vector<30x8xf32>
    %252 = tpu.matmul %251, %0, %cst_85 {dimension_numbers = #tpu.dot_dimension_numbers<[1], [0], [0], [1], [0, 0, 1, 1], [], []>} : vector<30x12xf32>, vector<12x8xf32>, vector<30x8xf32> -> vector<30x8xf32>
    %253 = vector.broadcast %1 : vector<1x8xf32> to vector<30x8xf32>
    %254 = arith.addf %252, %253 : vector<30x8xf32>
    %cst_86 = arith.constant 0.000000e+00 : f32
    %255 = vector.broadcast %cst_86 : f32 to vector<30x8xf32>
    %256 = arith.maximumf %254, %255 : vector<30x8xf32>
    %257 = vector.extract_strided_slice %256 {offsets = [0, 0], sizes = [28, 8], strides = [1, 1]} : vector<30x8xf32> to vector<28x8xf32>
    %258 = vector.extract_strided_slice %256 {offsets = [1, 0], sizes = [28, 8], strides = [1, 1]} : vector<30x8xf32> to vector<28x8xf32>
    %259 = vector.extract_strided_slice %256 {offsets = [2, 0], sizes = [28, 8], strides = [1, 1]} : vector<30x8xf32> to vector<28x8xf32>
    %260 = tpu.concatenate %257, %258, %259 in 1 : vector<28x8xf32>, vector<28x8xf32>, vector<28x8xf32> -> vector<28x24xf32>
    %cst_87 = arith.constant dense<0.000000e+00> : vector<28x16xf32>
    %261 = tpu.matmul %260, %2, %cst_87 {dimension_numbers = #tpu.dot_dimension_numbers<[1], [0], [0], [1], [0, 0, 1, 1], [], []>} : vector<28x24xf32>, vector<24x16xf32>, vector<28x16xf32> -> vector<28x16xf32>
    %262 = vector.broadcast %3 : vector<1x16xf32> to vector<28x16xf32>
    %263 = arith.addf %261, %262 : vector<28x16xf32>
    %cst_88 = arith.constant 0.000000e+00 : f32
    %264 = vector.broadcast %cst_88 : f32 to vector<28x16xf32>
    %265 = arith.maximumf %263, %264 : vector<28x16xf32>
    %266 = vector.extract_strided_slice %265 {offsets = [0, 0], sizes = [26, 16], strides = [1, 1]} : vector<28x16xf32> to vector<26x16xf32>
    %267 = vector.extract_strided_slice %265 {offsets = [1, 0], sizes = [26, 16], strides = [1, 1]} : vector<28x16xf32> to vector<26x16xf32>
    %268 = vector.extract_strided_slice %265 {offsets = [2, 0], sizes = [26, 16], strides = [1, 1]} : vector<28x16xf32> to vector<26x16xf32>
    %269 = tpu.concatenate %266, %267, %268 in 1 : vector<26x16xf32>, vector<26x16xf32>, vector<26x16xf32> -> vector<26x48xf32>
    %cst_89 = arith.constant dense<0.000000e+00> : vector<26x32xf32>
    %270 = tpu.matmul %269, %4, %cst_89 {dimension_numbers = #tpu.dot_dimension_numbers<[1], [0], [0], [1], [0, 0, 1, 1], [], []>} : vector<26x48xf32>, vector<48x32xf32>, vector<26x32xf32> -> vector<26x32xf32>
    %271 = vector.broadcast %5 : vector<1x32xf32> to vector<26x32xf32>
    %272 = arith.addf %270, %271 : vector<26x32xf32>
    %cst_90 = arith.constant 0.000000e+00 : f32
    %273 = vector.broadcast %cst_90 : f32 to vector<26x32xf32>
    %274 = arith.maximumf %272, %273 : vector<26x32xf32>
    %275 = vector.extract_strided_slice %274 {offsets = [0, 0], sizes = [3, 32], strides = [1, 1]} : vector<26x32xf32> to vector<3x32xf32>
    %cst_91 = arith.constant dense<0xFF800000> : vector<32xf32>
    %276 = vector.multi_reduction <maximumf>, %275, %cst_91 [0] : vector<3x32xf32> to vector<32xf32>
    %277 = vector.shape_cast %276 : vector<32xf32> to vector<1x32xf32>
    %278 = vector.extract_strided_slice %274 {offsets = [2, 0], sizes = [4, 32], strides = [1, 1]} : vector<26x32xf32> to vector<4x32xf32>
    %cst_92 = arith.constant dense<0xFF800000> : vector<32xf32>
    %279 = vector.multi_reduction <maximumf>, %278, %cst_92 [0] : vector<4x32xf32> to vector<32xf32>
    %280 = vector.shape_cast %279 : vector<32xf32> to vector<1x32xf32>
    %281 = vector.extract_strided_slice %274 {offsets = [5, 0], sizes = [3, 32], strides = [1, 1]} : vector<26x32xf32> to vector<3x32xf32>
    %cst_93 = arith.constant dense<0xFF800000> : vector<32xf32>
    %282 = vector.multi_reduction <maximumf>, %281, %cst_93 [0] : vector<3x32xf32> to vector<32xf32>
    %283 = vector.shape_cast %282 : vector<32xf32> to vector<1x32xf32>
    %284 = vector.extract_strided_slice %274 {offsets = [7, 0], sizes = [4, 32], strides = [1, 1]} : vector<26x32xf32> to vector<4x32xf32>
    %cst_94 = arith.constant dense<0xFF800000> : vector<32xf32>
    %285 = vector.multi_reduction <maximumf>, %284, %cst_94 [0] : vector<4x32xf32> to vector<32xf32>
    %286 = vector.shape_cast %285 : vector<32xf32> to vector<1x32xf32>
    %287 = vector.extract_strided_slice %274 {offsets = [10, 0], sizes = [3, 32], strides = [1, 1]} : vector<26x32xf32> to vector<3x32xf32>
    %cst_95 = arith.constant dense<0xFF800000> : vector<32xf32>
    %288 = vector.multi_reduction <maximumf>, %287, %cst_95 [0] : vector<3x32xf32> to vector<32xf32>
    %289 = vector.shape_cast %288 : vector<32xf32> to vector<1x32xf32>
    %290 = vector.extract_strided_slice %274 {offsets = [13, 0], sizes = [3, 32], strides = [1, 1]} : vector<26x32xf32> to vector<3x32xf32>
    %cst_96 = arith.constant dense<0xFF800000> : vector<32xf32>
    %291 = vector.multi_reduction <maximumf>, %290, %cst_96 [0] : vector<3x32xf32> to vector<32xf32>
    %292 = vector.shape_cast %291 : vector<32xf32> to vector<1x32xf32>
    %293 = vector.extract_strided_slice %274 {offsets = [15, 0], sizes = [4, 32], strides = [1, 1]} : vector<26x32xf32> to vector<4x32xf32>
    %cst_97 = arith.constant dense<0xFF800000> : vector<32xf32>
    %294 = vector.multi_reduction <maximumf>, %293, %cst_97 [0] : vector<4x32xf32> to vector<32xf32>
    %295 = vector.shape_cast %294 : vector<32xf32> to vector<1x32xf32>
    %296 = vector.extract_strided_slice %274 {offsets = [18, 0], sizes = [3, 32], strides = [1, 1]} : vector<26x32xf32> to vector<3x32xf32>
    %cst_98 = arith.constant dense<0xFF800000> : vector<32xf32>
    %297 = vector.multi_reduction <maximumf>, %296, %cst_98 [0] : vector<3x32xf32> to vector<32xf32>
    %298 = vector.shape_cast %297 : vector<32xf32> to vector<1x32xf32>
    %299 = vector.extract_strided_slice %274 {offsets = [20, 0], sizes = [4, 32], strides = [1, 1]} : vector<26x32xf32> to vector<4x32xf32>
    %cst_99 = arith.constant dense<0xFF800000> : vector<32xf32>
    %300 = vector.multi_reduction <maximumf>, %299, %cst_99 [0] : vector<4x32xf32> to vector<32xf32>
    %301 = vector.shape_cast %300 : vector<32xf32> to vector<1x32xf32>
    %302 = vector.extract_strided_slice %274 {offsets = [23, 0], sizes = [3, 32], strides = [1, 1]} : vector<26x32xf32> to vector<3x32xf32>
    %cst_100 = arith.constant dense<0xFF800000> : vector<32xf32>
    %303 = vector.multi_reduction <maximumf>, %302, %cst_100 [0] : vector<3x32xf32> to vector<32xf32>
    %304 = vector.shape_cast %303 : vector<32xf32> to vector<1x32xf32>
    %305 = tpu.concatenate %277, %280, %283, %286, %289, %292, %295, %298, %301, %304 in 1 : vector<1x32xf32>, vector<1x32xf32>, vector<1x32xf32>, vector<1x32xf32>, vector<1x32xf32>, vector<1x32xf32>, vector<1x32xf32>, vector<1x32xf32>, vector<1x32xf32>, vector<1x32xf32> -> vector<1x320xf32>
    %c5 = arith.constant 5 : index
    %c0_101 = arith.constant 0 : index
    %c0_102 = arith.constant 0 : index
    %306 = vector.load %arg1[%c5, %c0_101, %c0_102] : memref<8x32x4xf32, #tpu.memory_space<vmem>>, vector<1x32x4xf32>
    %307 = vector.shape_cast %306 : vector<1x32x4xf32> to vector<32x4xf32>
    %308 = vector.extract_strided_slice %307 {offsets = [0, 0], sizes = [30, 4], strides = [1, 1]} : vector<32x4xf32> to vector<30x4xf32>
    %309 = vector.extract_strided_slice %307 {offsets = [1, 0], sizes = [30, 4], strides = [1, 1]} : vector<32x4xf32> to vector<30x4xf32>
    %310 = vector.extract_strided_slice %307 {offsets = [2, 0], sizes = [30, 4], strides = [1, 1]} : vector<32x4xf32> to vector<30x4xf32>
    %311 = tpu.concatenate %308, %309, %310 in 1 : vector<30x4xf32>, vector<30x4xf32>, vector<30x4xf32> -> vector<30x12xf32>
    %cst_103 = arith.constant dense<0.000000e+00> : vector<30x8xf32>
    %312 = tpu.matmul %311, %0, %cst_103 {dimension_numbers = #tpu.dot_dimension_numbers<[1], [0], [0], [1], [0, 0, 1, 1], [], []>} : vector<30x12xf32>, vector<12x8xf32>, vector<30x8xf32> -> vector<30x8xf32>
    %313 = vector.broadcast %1 : vector<1x8xf32> to vector<30x8xf32>
    %314 = arith.addf %312, %313 : vector<30x8xf32>
    %cst_104 = arith.constant 0.000000e+00 : f32
    %315 = vector.broadcast %cst_104 : f32 to vector<30x8xf32>
    %316 = arith.maximumf %314, %315 : vector<30x8xf32>
    %317 = vector.extract_strided_slice %316 {offsets = [0, 0], sizes = [28, 8], strides = [1, 1]} : vector<30x8xf32> to vector<28x8xf32>
    %318 = vector.extract_strided_slice %316 {offsets = [1, 0], sizes = [28, 8], strides = [1, 1]} : vector<30x8xf32> to vector<28x8xf32>
    %319 = vector.extract_strided_slice %316 {offsets = [2, 0], sizes = [28, 8], strides = [1, 1]} : vector<30x8xf32> to vector<28x8xf32>
    %320 = tpu.concatenate %317, %318, %319 in 1 : vector<28x8xf32>, vector<28x8xf32>, vector<28x8xf32> -> vector<28x24xf32>
    %cst_105 = arith.constant dense<0.000000e+00> : vector<28x16xf32>
    %321 = tpu.matmul %320, %2, %cst_105 {dimension_numbers = #tpu.dot_dimension_numbers<[1], [0], [0], [1], [0, 0, 1, 1], [], []>} : vector<28x24xf32>, vector<24x16xf32>, vector<28x16xf32> -> vector<28x16xf32>
    %322 = vector.broadcast %3 : vector<1x16xf32> to vector<28x16xf32>
    %323 = arith.addf %321, %322 : vector<28x16xf32>
    %cst_106 = arith.constant 0.000000e+00 : f32
    %324 = vector.broadcast %cst_106 : f32 to vector<28x16xf32>
    %325 = arith.maximumf %323, %324 : vector<28x16xf32>
    %326 = vector.extract_strided_slice %325 {offsets = [0, 0], sizes = [26, 16], strides = [1, 1]} : vector<28x16xf32> to vector<26x16xf32>
    %327 = vector.extract_strided_slice %325 {offsets = [1, 0], sizes = [26, 16], strides = [1, 1]} : vector<28x16xf32> to vector<26x16xf32>
    %328 = vector.extract_strided_slice %325 {offsets = [2, 0], sizes = [26, 16], strides = [1, 1]} : vector<28x16xf32> to vector<26x16xf32>
    %329 = tpu.concatenate %326, %327, %328 in 1 : vector<26x16xf32>, vector<26x16xf32>, vector<26x16xf32> -> vector<26x48xf32>
    %cst_107 = arith.constant dense<0.000000e+00> : vector<26x32xf32>
    %330 = tpu.matmul %329, %4, %cst_107 {dimension_numbers = #tpu.dot_dimension_numbers<[1], [0], [0], [1], [0, 0, 1, 1], [], []>} : vector<26x48xf32>, vector<48x32xf32>, vector<26x32xf32> -> vector<26x32xf32>
    %331 = vector.broadcast %5 : vector<1x32xf32> to vector<26x32xf32>
    %332 = arith.addf %330, %331 : vector<26x32xf32>
    %cst_108 = arith.constant 0.000000e+00 : f32
    %333 = vector.broadcast %cst_108 : f32 to vector<26x32xf32>
    %334 = arith.maximumf %332, %333 : vector<26x32xf32>
    %335 = vector.extract_strided_slice %334 {offsets = [0, 0], sizes = [3, 32], strides = [1, 1]} : vector<26x32xf32> to vector<3x32xf32>
    %cst_109 = arith.constant dense<0xFF800000> : vector<32xf32>
    %336 = vector.multi_reduction <maximumf>, %335, %cst_109 [0] : vector<3x32xf32> to vector<32xf32>
    %337 = vector.shape_cast %336 : vector<32xf32> to vector<1x32xf32>
    %338 = vector.extract_strided_slice %334 {offsets = [2, 0], sizes = [4, 32], strides = [1, 1]} : vector<26x32xf32> to vector<4x32xf32>
    %cst_110 = arith.constant dense<0xFF800000> : vector<32xf32>
    %339 = vector.multi_reduction <maximumf>, %338, %cst_110 [0] : vector<4x32xf32> to vector<32xf32>
    %340 = vector.shape_cast %339 : vector<32xf32> to vector<1x32xf32>
    %341 = vector.extract_strided_slice %334 {offsets = [5, 0], sizes = [3, 32], strides = [1, 1]} : vector<26x32xf32> to vector<3x32xf32>
    %cst_111 = arith.constant dense<0xFF800000> : vector<32xf32>
    %342 = vector.multi_reduction <maximumf>, %341, %cst_111 [0] : vector<3x32xf32> to vector<32xf32>
    %343 = vector.shape_cast %342 : vector<32xf32> to vector<1x32xf32>
    %344 = vector.extract_strided_slice %334 {offsets = [7, 0], sizes = [4, 32], strides = [1, 1]} : vector<26x32xf32> to vector<4x32xf32>
    %cst_112 = arith.constant dense<0xFF800000> : vector<32xf32>
    %345 = vector.multi_reduction <maximumf>, %344, %cst_112 [0] : vector<4x32xf32> to vector<32xf32>
    %346 = vector.shape_cast %345 : vector<32xf32> to vector<1x32xf32>
    %347 = vector.extract_strided_slice %334 {offsets = [10, 0], sizes = [3, 32], strides = [1, 1]} : vector<26x32xf32> to vector<3x32xf32>
    %cst_113 = arith.constant dense<0xFF800000> : vector<32xf32>
    %348 = vector.multi_reduction <maximumf>, %347, %cst_113 [0] : vector<3x32xf32> to vector<32xf32>
    %349 = vector.shape_cast %348 : vector<32xf32> to vector<1x32xf32>
    %350 = vector.extract_strided_slice %334 {offsets = [13, 0], sizes = [3, 32], strides = [1, 1]} : vector<26x32xf32> to vector<3x32xf32>
    %cst_114 = arith.constant dense<0xFF800000> : vector<32xf32>
    %351 = vector.multi_reduction <maximumf>, %350, %cst_114 [0] : vector<3x32xf32> to vector<32xf32>
    %352 = vector.shape_cast %351 : vector<32xf32> to vector<1x32xf32>
    %353 = vector.extract_strided_slice %334 {offsets = [15, 0], sizes = [4, 32], strides = [1, 1]} : vector<26x32xf32> to vector<4x32xf32>
    %cst_115 = arith.constant dense<0xFF800000> : vector<32xf32>
    %354 = vector.multi_reduction <maximumf>, %353, %cst_115 [0] : vector<4x32xf32> to vector<32xf32>
    %355 = vector.shape_cast %354 : vector<32xf32> to vector<1x32xf32>
    %356 = vector.extract_strided_slice %334 {offsets = [18, 0], sizes = [3, 32], strides = [1, 1]} : vector<26x32xf32> to vector<3x32xf32>
    %cst_116 = arith.constant dense<0xFF800000> : vector<32xf32>
    %357 = vector.multi_reduction <maximumf>, %356, %cst_116 [0] : vector<3x32xf32> to vector<32xf32>
    %358 = vector.shape_cast %357 : vector<32xf32> to vector<1x32xf32>
    %359 = vector.extract_strided_slice %334 {offsets = [20, 0], sizes = [4, 32], strides = [1, 1]} : vector<26x32xf32> to vector<4x32xf32>
    %cst_117 = arith.constant dense<0xFF800000> : vector<32xf32>
    %360 = vector.multi_reduction <maximumf>, %359, %cst_117 [0] : vector<4x32xf32> to vector<32xf32>
    %361 = vector.shape_cast %360 : vector<32xf32> to vector<1x32xf32>
    %362 = vector.extract_strided_slice %334 {offsets = [23, 0], sizes = [3, 32], strides = [1, 1]} : vector<26x32xf32> to vector<3x32xf32>
    %cst_118 = arith.constant dense<0xFF800000> : vector<32xf32>
    %363 = vector.multi_reduction <maximumf>, %362, %cst_118 [0] : vector<3x32xf32> to vector<32xf32>
    %364 = vector.shape_cast %363 : vector<32xf32> to vector<1x32xf32>
    %365 = tpu.concatenate %337, %340, %343, %346, %349, %352, %355, %358, %361, %364 in 1 : vector<1x32xf32>, vector<1x32xf32>, vector<1x32xf32>, vector<1x32xf32>, vector<1x32xf32>, vector<1x32xf32>, vector<1x32xf32>, vector<1x32xf32>, vector<1x32xf32>, vector<1x32xf32> -> vector<1x320xf32>
    %c6 = arith.constant 6 : index
    %c0_119 = arith.constant 0 : index
    %c0_120 = arith.constant 0 : index
    %366 = vector.load %arg1[%c6, %c0_119, %c0_120] : memref<8x32x4xf32, #tpu.memory_space<vmem>>, vector<1x32x4xf32>
    %367 = vector.shape_cast %366 : vector<1x32x4xf32> to vector<32x4xf32>
    %368 = vector.extract_strided_slice %367 {offsets = [0, 0], sizes = [30, 4], strides = [1, 1]} : vector<32x4xf32> to vector<30x4xf32>
    %369 = vector.extract_strided_slice %367 {offsets = [1, 0], sizes = [30, 4], strides = [1, 1]} : vector<32x4xf32> to vector<30x4xf32>
    %370 = vector.extract_strided_slice %367 {offsets = [2, 0], sizes = [30, 4], strides = [1, 1]} : vector<32x4xf32> to vector<30x4xf32>
    %371 = tpu.concatenate %368, %369, %370 in 1 : vector<30x4xf32>, vector<30x4xf32>, vector<30x4xf32> -> vector<30x12xf32>
    %cst_121 = arith.constant dense<0.000000e+00> : vector<30x8xf32>
    %372 = tpu.matmul %371, %0, %cst_121 {dimension_numbers = #tpu.dot_dimension_numbers<[1], [0], [0], [1], [0, 0, 1, 1], [], []>} : vector<30x12xf32>, vector<12x8xf32>, vector<30x8xf32> -> vector<30x8xf32>
    %373 = vector.broadcast %1 : vector<1x8xf32> to vector<30x8xf32>
    %374 = arith.addf %372, %373 : vector<30x8xf32>
    %cst_122 = arith.constant 0.000000e+00 : f32
    %375 = vector.broadcast %cst_122 : f32 to vector<30x8xf32>
    %376 = arith.maximumf %374, %375 : vector<30x8xf32>
    %377 = vector.extract_strided_slice %376 {offsets = [0, 0], sizes = [28, 8], strides = [1, 1]} : vector<30x8xf32> to vector<28x8xf32>
    %378 = vector.extract_strided_slice %376 {offsets = [1, 0], sizes = [28, 8], strides = [1, 1]} : vector<30x8xf32> to vector<28x8xf32>
    %379 = vector.extract_strided_slice %376 {offsets = [2, 0], sizes = [28, 8], strides = [1, 1]} : vector<30x8xf32> to vector<28x8xf32>
    %380 = tpu.concatenate %377, %378, %379 in 1 : vector<28x8xf32>, vector<28x8xf32>, vector<28x8xf32> -> vector<28x24xf32>
    %cst_123 = arith.constant dense<0.000000e+00> : vector<28x16xf32>
    %381 = tpu.matmul %380, %2, %cst_123 {dimension_numbers = #tpu.dot_dimension_numbers<[1], [0], [0], [1], [0, 0, 1, 1], [], []>} : vector<28x24xf32>, vector<24x16xf32>, vector<28x16xf32> -> vector<28x16xf32>
    %382 = vector.broadcast %3 : vector<1x16xf32> to vector<28x16xf32>
    %383 = arith.addf %381, %382 : vector<28x16xf32>
    %cst_124 = arith.constant 0.000000e+00 : f32
    %384 = vector.broadcast %cst_124 : f32 to vector<28x16xf32>
    %385 = arith.maximumf %383, %384 : vector<28x16xf32>
    %386 = vector.extract_strided_slice %385 {offsets = [0, 0], sizes = [26, 16], strides = [1, 1]} : vector<28x16xf32> to vector<26x16xf32>
    %387 = vector.extract_strided_slice %385 {offsets = [1, 0], sizes = [26, 16], strides = [1, 1]} : vector<28x16xf32> to vector<26x16xf32>
    %388 = vector.extract_strided_slice %385 {offsets = [2, 0], sizes = [26, 16], strides = [1, 1]} : vector<28x16xf32> to vector<26x16xf32>
    %389 = tpu.concatenate %386, %387, %388 in 1 : vector<26x16xf32>, vector<26x16xf32>, vector<26x16xf32> -> vector<26x48xf32>
    %cst_125 = arith.constant dense<0.000000e+00> : vector<26x32xf32>
    %390 = tpu.matmul %389, %4, %cst_125 {dimension_numbers = #tpu.dot_dimension_numbers<[1], [0], [0], [1], [0, 0, 1, 1], [], []>} : vector<26x48xf32>, vector<48x32xf32>, vector<26x32xf32> -> vector<26x32xf32>
    %391 = vector.broadcast %5 : vector<1x32xf32> to vector<26x32xf32>
    %392 = arith.addf %390, %391 : vector<26x32xf32>
    %cst_126 = arith.constant 0.000000e+00 : f32
    %393 = vector.broadcast %cst_126 : f32 to vector<26x32xf32>
    %394 = arith.maximumf %392, %393 : vector<26x32xf32>
    %395 = vector.extract_strided_slice %394 {offsets = [0, 0], sizes = [3, 32], strides = [1, 1]} : vector<26x32xf32> to vector<3x32xf32>
    %cst_127 = arith.constant dense<0xFF800000> : vector<32xf32>
    %396 = vector.multi_reduction <maximumf>, %395, %cst_127 [0] : vector<3x32xf32> to vector<32xf32>
    %397 = vector.shape_cast %396 : vector<32xf32> to vector<1x32xf32>
    %398 = vector.extract_strided_slice %394 {offsets = [2, 0], sizes = [4, 32], strides = [1, 1]} : vector<26x32xf32> to vector<4x32xf32>
    %cst_128 = arith.constant dense<0xFF800000> : vector<32xf32>
    %399 = vector.multi_reduction <maximumf>, %398, %cst_128 [0] : vector<4x32xf32> to vector<32xf32>
    %400 = vector.shape_cast %399 : vector<32xf32> to vector<1x32xf32>
    %401 = vector.extract_strided_slice %394 {offsets = [5, 0], sizes = [3, 32], strides = [1, 1]} : vector<26x32xf32> to vector<3x32xf32>
    %cst_129 = arith.constant dense<0xFF800000> : vector<32xf32>
    %402 = vector.multi_reduction <maximumf>, %401, %cst_129 [0] : vector<3x32xf32> to vector<32xf32>
    %403 = vector.shape_cast %402 : vector<32xf32> to vector<1x32xf32>
    %404 = vector.extract_strided_slice %394 {offsets = [7, 0], sizes = [4, 32], strides = [1, 1]} : vector<26x32xf32> to vector<4x32xf32>
    %cst_130 = arith.constant dense<0xFF800000> : vector<32xf32>
    %405 = vector.multi_reduction <maximumf>, %404, %cst_130 [0] : vector<4x32xf32> to vector<32xf32>
    %406 = vector.shape_cast %405 : vector<32xf32> to vector<1x32xf32>
    %407 = vector.extract_strided_slice %394 {offsets = [10, 0], sizes = [3, 32], strides = [1, 1]} : vector<26x32xf32> to vector<3x32xf32>
    %cst_131 = arith.constant dense<0xFF800000> : vector<32xf32>
    %408 = vector.multi_reduction <maximumf>, %407, %cst_131 [0] : vector<3x32xf32> to vector<32xf32>
    %409 = vector.shape_cast %408 : vector<32xf32> to vector<1x32xf32>
    %410 = vector.extract_strided_slice %394 {offsets = [13, 0], sizes = [3, 32], strides = [1, 1]} : vector<26x32xf32> to vector<3x32xf32>
    %cst_132 = arith.constant dense<0xFF800000> : vector<32xf32>
    %411 = vector.multi_reduction <maximumf>, %410, %cst_132 [0] : vector<3x32xf32> to vector<32xf32>
    %412 = vector.shape_cast %411 : vector<32xf32> to vector<1x32xf32>
    %413 = vector.extract_strided_slice %394 {offsets = [15, 0], sizes = [4, 32], strides = [1, 1]} : vector<26x32xf32> to vector<4x32xf32>
    %cst_133 = arith.constant dense<0xFF800000> : vector<32xf32>
    %414 = vector.multi_reduction <maximumf>, %413, %cst_133 [0] : vector<4x32xf32> to vector<32xf32>
    %415 = vector.shape_cast %414 : vector<32xf32> to vector<1x32xf32>
    %416 = vector.extract_strided_slice %394 {offsets = [18, 0], sizes = [3, 32], strides = [1, 1]} : vector<26x32xf32> to vector<3x32xf32>
    %cst_134 = arith.constant dense<0xFF800000> : vector<32xf32>
    %417 = vector.multi_reduction <maximumf>, %416, %cst_134 [0] : vector<3x32xf32> to vector<32xf32>
    %418 = vector.shape_cast %417 : vector<32xf32> to vector<1x32xf32>
    %419 = vector.extract_strided_slice %394 {offsets = [20, 0], sizes = [4, 32], strides = [1, 1]} : vector<26x32xf32> to vector<4x32xf32>
    %cst_135 = arith.constant dense<0xFF800000> : vector<32xf32>
    %420 = vector.multi_reduction <maximumf>, %419, %cst_135 [0] : vector<4x32xf32> to vector<32xf32>
    %421 = vector.shape_cast %420 : vector<32xf32> to vector<1x32xf32>
    %422 = vector.extract_strided_slice %394 {offsets = [23, 0], sizes = [3, 32], strides = [1, 1]} : vector<26x32xf32> to vector<3x32xf32>
    %cst_136 = arith.constant dense<0xFF800000> : vector<32xf32>
    %423 = vector.multi_reduction <maximumf>, %422, %cst_136 [0] : vector<3x32xf32> to vector<32xf32>
    %424 = vector.shape_cast %423 : vector<32xf32> to vector<1x32xf32>
    %425 = tpu.concatenate %397, %400, %403, %406, %409, %412, %415, %418, %421, %424 in 1 : vector<1x32xf32>, vector<1x32xf32>, vector<1x32xf32>, vector<1x32xf32>, vector<1x32xf32>, vector<1x32xf32>, vector<1x32xf32>, vector<1x32xf32>, vector<1x32xf32>, vector<1x32xf32> -> vector<1x320xf32>
    %c7 = arith.constant 7 : index
    %c0_137 = arith.constant 0 : index
    %c0_138 = arith.constant 0 : index
    %426 = vector.load %arg1[%c7, %c0_137, %c0_138] : memref<8x32x4xf32, #tpu.memory_space<vmem>>, vector<1x32x4xf32>
    %427 = vector.shape_cast %426 : vector<1x32x4xf32> to vector<32x4xf32>
    %428 = vector.extract_strided_slice %427 {offsets = [0, 0], sizes = [30, 4], strides = [1, 1]} : vector<32x4xf32> to vector<30x4xf32>
    %429 = vector.extract_strided_slice %427 {offsets = [1, 0], sizes = [30, 4], strides = [1, 1]} : vector<32x4xf32> to vector<30x4xf32>
    %430 = vector.extract_strided_slice %427 {offsets = [2, 0], sizes = [30, 4], strides = [1, 1]} : vector<32x4xf32> to vector<30x4xf32>
    %431 = tpu.concatenate %428, %429, %430 in 1 : vector<30x4xf32>, vector<30x4xf32>, vector<30x4xf32> -> vector<30x12xf32>
    %cst_139 = arith.constant dense<0.000000e+00> : vector<30x8xf32>
    %432 = tpu.matmul %431, %0, %cst_139 {dimension_numbers = #tpu.dot_dimension_numbers<[1], [0], [0], [1], [0, 0, 1, 1], [], []>} : vector<30x12xf32>, vector<12x8xf32>, vector<30x8xf32> -> vector<30x8xf32>
    %433 = vector.broadcast %1 : vector<1x8xf32> to vector<30x8xf32>
    %434 = arith.addf %432, %433 : vector<30x8xf32>
    %cst_140 = arith.constant 0.000000e+00 : f32
    %435 = vector.broadcast %cst_140 : f32 to vector<30x8xf32>
    %436 = arith.maximumf %434, %435 : vector<30x8xf32>
    %437 = vector.extract_strided_slice %436 {offsets = [0, 0], sizes = [28, 8], strides = [1, 1]} : vector<30x8xf32> to vector<28x8xf32>
    %438 = vector.extract_strided_slice %436 {offsets = [1, 0], sizes = [28, 8], strides = [1, 1]} : vector<30x8xf32> to vector<28x8xf32>
    %439 = vector.extract_strided_slice %436 {offsets = [2, 0], sizes = [28, 8], strides = [1, 1]} : vector<30x8xf32> to vector<28x8xf32>
    %440 = tpu.concatenate %437, %438, %439 in 1 : vector<28x8xf32>, vector<28x8xf32>, vector<28x8xf32> -> vector<28x24xf32>
    %cst_141 = arith.constant dense<0.000000e+00> : vector<28x16xf32>
    %441 = tpu.matmul %440, %2, %cst_141 {dimension_numbers = #tpu.dot_dimension_numbers<[1], [0], [0], [1], [0, 0, 1, 1], [], []>} : vector<28x24xf32>, vector<24x16xf32>, vector<28x16xf32> -> vector<28x16xf32>
    %442 = vector.broadcast %3 : vector<1x16xf32> to vector<28x16xf32>
    %443 = arith.addf %441, %442 : vector<28x16xf32>
    %cst_142 = arith.constant 0.000000e+00 : f32
    %444 = vector.broadcast %cst_142 : f32 to vector<28x16xf32>
    %445 = arith.maximumf %443, %444 : vector<28x16xf32>
    %446 = vector.extract_strided_slice %445 {offsets = [0, 0], sizes = [26, 16], strides = [1, 1]} : vector<28x16xf32> to vector<26x16xf32>
    %447 = vector.extract_strided_slice %445 {offsets = [1, 0], sizes = [26, 16], strides = [1, 1]} : vector<28x16xf32> to vector<26x16xf32>
    %448 = vector.extract_strided_slice %445 {offsets = [2, 0], sizes = [26, 16], strides = [1, 1]} : vector<28x16xf32> to vector<26x16xf32>
    %449 = tpu.concatenate %446, %447, %448 in 1 : vector<26x16xf32>, vector<26x16xf32>, vector<26x16xf32> -> vector<26x48xf32>
    %cst_143 = arith.constant dense<0.000000e+00> : vector<26x32xf32>
    %450 = tpu.matmul %449, %4, %cst_143 {dimension_numbers = #tpu.dot_dimension_numbers<[1], [0], [0], [1], [0, 0, 1, 1], [], []>} : vector<26x48xf32>, vector<48x32xf32>, vector<26x32xf32> -> vector<26x32xf32>
    %451 = vector.broadcast %5 : vector<1x32xf32> to vector<26x32xf32>
    %452 = arith.addf %450, %451 : vector<26x32xf32>
    %cst_144 = arith.constant 0.000000e+00 : f32
    %453 = vector.broadcast %cst_144 : f32 to vector<26x32xf32>
    %454 = arith.maximumf %452, %453 : vector<26x32xf32>
    %455 = vector.extract_strided_slice %454 {offsets = [0, 0], sizes = [3, 32], strides = [1, 1]} : vector<26x32xf32> to vector<3x32xf32>
    %cst_145 = arith.constant dense<0xFF800000> : vector<32xf32>
    %456 = vector.multi_reduction <maximumf>, %455, %cst_145 [0] : vector<3x32xf32> to vector<32xf32>
    %457 = vector.shape_cast %456 : vector<32xf32> to vector<1x32xf32>
    %458 = vector.extract_strided_slice %454 {offsets = [2, 0], sizes = [4, 32], strides = [1, 1]} : vector<26x32xf32> to vector<4x32xf32>
    %cst_146 = arith.constant dense<0xFF800000> : vector<32xf32>
    %459 = vector.multi_reduction <maximumf>, %458, %cst_146 [0] : vector<4x32xf32> to vector<32xf32>
    %460 = vector.shape_cast %459 : vector<32xf32> to vector<1x32xf32>
    %461 = vector.extract_strided_slice %454 {offsets = [5, 0], sizes = [3, 32], strides = [1, 1]} : vector<26x32xf32> to vector<3x32xf32>
    %cst_147 = arith.constant dense<0xFF800000> : vector<32xf32>
    %462 = vector.multi_reduction <maximumf>, %461, %cst_147 [0] : vector<3x32xf32> to vector<32xf32>
    %463 = vector.shape_cast %462 : vector<32xf32> to vector<1x32xf32>
    %464 = vector.extract_strided_slice %454 {offsets = [7, 0], sizes = [4, 32], strides = [1, 1]} : vector<26x32xf32> to vector<4x32xf32>
    %cst_148 = arith.constant dense<0xFF800000> : vector<32xf32>
    %465 = vector.multi_reduction <maximumf>, %464, %cst_148 [0] : vector<4x32xf32> to vector<32xf32>
    %466 = vector.shape_cast %465 : vector<32xf32> to vector<1x32xf32>
    %467 = vector.extract_strided_slice %454 {offsets = [10, 0], sizes = [3, 32], strides = [1, 1]} : vector<26x32xf32> to vector<3x32xf32>
    %cst_149 = arith.constant dense<0xFF800000> : vector<32xf32>
    %468 = vector.multi_reduction <maximumf>, %467, %cst_149 [0] : vector<3x32xf32> to vector<32xf32>
    %469 = vector.shape_cast %468 : vector<32xf32> to vector<1x32xf32>
    %470 = vector.extract_strided_slice %454 {offsets = [13, 0], sizes = [3, 32], strides = [1, 1]} : vector<26x32xf32> to vector<3x32xf32>
    %cst_150 = arith.constant dense<0xFF800000> : vector<32xf32>
    %471 = vector.multi_reduction <maximumf>, %470, %cst_150 [0] : vector<3x32xf32> to vector<32xf32>
    %472 = vector.shape_cast %471 : vector<32xf32> to vector<1x32xf32>
    %473 = vector.extract_strided_slice %454 {offsets = [15, 0], sizes = [4, 32], strides = [1, 1]} : vector<26x32xf32> to vector<4x32xf32>
    %cst_151 = arith.constant dense<0xFF800000> : vector<32xf32>
    %474 = vector.multi_reduction <maximumf>, %473, %cst_151 [0] : vector<4x32xf32> to vector<32xf32>
    %475 = vector.shape_cast %474 : vector<32xf32> to vector<1x32xf32>
    %476 = vector.extract_strided_slice %454 {offsets = [18, 0], sizes = [3, 32], strides = [1, 1]} : vector<26x32xf32> to vector<3x32xf32>
    %cst_152 = arith.constant dense<0xFF800000> : vector<32xf32>
    %477 = vector.multi_reduction <maximumf>, %476, %cst_152 [0] : vector<3x32xf32> to vector<32xf32>
    %478 = vector.shape_cast %477 : vector<32xf32> to vector<1x32xf32>
    %479 = vector.extract_strided_slice %454 {offsets = [20, 0], sizes = [4, 32], strides = [1, 1]} : vector<26x32xf32> to vector<4x32xf32>
    %cst_153 = arith.constant dense<0xFF800000> : vector<32xf32>
    %480 = vector.multi_reduction <maximumf>, %479, %cst_153 [0] : vector<4x32xf32> to vector<32xf32>
    %481 = vector.shape_cast %480 : vector<32xf32> to vector<1x32xf32>
    %482 = vector.extract_strided_slice %454 {offsets = [23, 0], sizes = [3, 32], strides = [1, 1]} : vector<26x32xf32> to vector<3x32xf32>
    %cst_154 = arith.constant dense<0xFF800000> : vector<32xf32>
    %483 = vector.multi_reduction <maximumf>, %482, %cst_154 [0] : vector<3x32xf32> to vector<32xf32>
    %484 = vector.shape_cast %483 : vector<32xf32> to vector<1x32xf32>
    %485 = tpu.concatenate %457, %460, %463, %466, %469, %472, %475, %478, %481, %484 in 1 : vector<1x32xf32>, vector<1x32xf32>, vector<1x32xf32>, vector<1x32xf32>, vector<1x32xf32>, vector<1x32xf32>, vector<1x32xf32>, vector<1x32xf32>, vector<1x32xf32>, vector<1x32xf32> -> vector<1x320xf32>
    %486 = tpu.concatenate %65, %125, %185, %245, %305, %365, %425, %485 in 0 : vector<1x320xf32>, vector<1x320xf32>, vector<1x320xf32>, vector<1x320xf32>, vector<1x320xf32>, vector<1x320xf32>, vector<1x320xf32>, vector<1x320xf32> -> vector<8x320xf32>
    %c0_155 = arith.constant 0 : index
    %c0_156 = arith.constant 0 : index
    %487 = vector.load %arg8[%c0_155, %c0_156] : memref<320x64xf32, #tpu.memory_space<vmem>>, vector<320x64xf32>
    %cst_157 = arith.constant dense<0.000000e+00> : vector<8x64xf32>
    %488 = tpu.matmul %486, %487, %cst_157 {dimension_numbers = #tpu.dot_dimension_numbers<[1], [0], [0], [1], [0, 0, 1, 1], [], []>} : vector<8x320xf32>, vector<320x64xf32>, vector<8x64xf32> -> vector<8x64xf32>
    %c0_158 = arith.constant 0 : index
    %c0_159 = arith.constant 0 : index
    %489 = vector.load %arg9[%c0_158, %c0_159] : memref<1x64xf32, #tpu.memory_space<vmem>>, vector<1x64xf32>
    %490 = vector.broadcast %489 : vector<1x64xf32> to vector<8x64xf32>
    %491 = arith.addf %488, %490 : vector<8x64xf32>
    %cst_160 = arith.constant 0.000000e+00 : f32
    %492 = vector.broadcast %cst_160 : f32 to vector<8x64xf32>
    %493 = arith.maximumf %491, %492 : vector<8x64xf32>
    %c0_161 = arith.constant 0 : index
    %c0_162 = arith.constant 0 : index
    %494 = vector.load %arg10[%c0_161, %c0_162] : memref<64x1xf32, #tpu.memory_space<vmem>>, vector<64x1xf32>
    %cst_163 = arith.constant dense<0.000000e+00> : vector<8x1xf32>
    %495 = tpu.matmul %493, %494, %cst_163 {dimension_numbers = #tpu.dot_dimension_numbers<[1], [0], [0], [1], [0, 0, 1, 1], [], []>} : vector<8x64xf32>, vector<64x1xf32>, vector<8x1xf32> -> vector<8x1xf32>
    %c0_164 = arith.constant 0 : index
    %c0_165 = arith.constant 0 : index
    %496 = vector.load %arg11[%c0_164, %c0_165] : memref<1x1xf32, #tpu.memory_space<vmem>>, vector<1x1xf32>
    %497 = vector.broadcast %496 : vector<1x1xf32> to vector<8x1xf32>
    %498 = arith.addf %495, %497 : vector<8x1xf32>
    %c0_166 = arith.constant 0 : index
    %c0_167 = arith.constant 0 : index
    %499 = vector.load %arg12[%c0_166, %c0_167] : memref<8x1xf32, #tpu.memory_space<vmem>>, vector<8x1xf32>
    tpu.vector_store %arg12[%c0_166, %c0_167], %498 {strides = array<i32>} : memref<8x1xf32, #tpu.memory_space<vmem>>, vector<8x1xf32>,
    return
  }
  func.func @transform_0(%arg0: i32) -> (i32, i32, i32) {
    %c0_i32 = arith.constant 0 : i32
    %c0_i32_0 = arith.constant 0 : i32
    %c0_i32_1 = arith.constant 0 : i32
    return %arg0, %c0_i32, %c0_i32_0 : i32, i32, i32
  }
  func.func @transform_1(%arg0: i32) -> (i32, i32) {
    %c0_i32 = arith.constant 0 : i32
    %c0_i32_0 = arith.constant 0 : i32
    %c0_i32_1 = arith.constant 0 : i32
    return %c0_i32, %c0_i32_0 : i32, i32
  }
  func.func @transform_2(%arg0: i32) -> (i32, i32) {
    %c0_i32 = arith.constant 0 : i32
    %c0_i32_0 = arith.constant 0 : i32
    %c0_i32_1 = arith.constant 0 : i32
    return %c0_i32, %c0_i32_0 : i32, i32
  }
  func.func @transform_3(%arg0: i32) -> (i32, i32) {
    %c0_i32 = arith.constant 0 : i32
    %c0_i32_0 = arith.constant 0 : i32
    %c0_i32_1 = arith.constant 0 : i32
    return %c0_i32, %c0_i32_0 : i32, i32
  }
  func.func @transform_4(%arg0: i32) -> (i32, i32) {
    %c0_i32 = arith.constant 0 : i32
    %c0_i32_0 = arith.constant 0 : i32
    %c0_i32_1 = arith.constant 0 : i32
    return %c0_i32, %c0_i32_0 : i32, i32
  }
  func.func @transform_5(%arg0: i32) -> (i32, i32) {
    %c0_i32 = arith.constant 0 : i32
    %c0_i32_0 = arith.constant 0 : i32
    %c0_i32_1 = arith.constant 0 : i32
    return %c0_i32, %c0_i32_0 : i32, i32
  }
  func.func @transform_6(%arg0: i32) -> (i32, i32) {
    %c0_i32 = arith.constant 0 : i32
    %c0_i32_0 = arith.constant 0 : i32
    %c0_i32_1 = arith.constant 0 : i32
    return %c0_i32, %c0_i32_0 : i32, i32
  }
  func.func @transform_7(%arg0: i32) -> (i32, i32) {
    %c0_i32 = arith.constant 0 : i32
    %c0_i32_0 = arith.constant 0 : i32
    %c0_i32_1 = arith.constant 0 : i32
    return %c0_i32, %c0_i32_0 : i32, i32
  }
  func.func @transform_8(%arg0: i32) -> (i32, i32) {
    %c0_i32 = arith.constant 0 : i32
    %c0_i32_0 = arith.constant 0 : i32
    %c0_i32_1 = arith.constant 0 : i32
    return %c0_i32, %c0_i32_0 : i32, i32
  }
  func.func @transform_9(%arg0: i32) -> (i32, i32) {
    %c0_i32 = arith.constant 0 : i32
    %c0_i32_0 = arith.constant 0 : i32
    %c0_i32_1 = arith.constant 0 : i32
    return %c0_i32, %c0_i32_0 : i32, i32
  }
  func.func @transform_10(%arg0: i32) -> (i32, i32) {
    %c0_i32 = arith.constant 0 : i32
    %c0_i32_0 = arith.constant 0 : i32
    %c0_i32_1 = arith.constant 0 : i32
    return %c0_i32, %c0_i32_0 : i32, i32
  }
  func.func @transform_11(%arg0: i32) -> (i32, i32) {
    %c0_i32 = arith.constant 0 : i32
    %c0_i32_0 = arith.constant 0 : i32
    return %arg0, %c0_i32 : i32, i32
  }
}

</mosaic_0001>

<bundles_post_ra>
// kernel: cnn_forward.1
= control target key start
LH: loop header
LB: loop body
LE: loop exit
PB: predicated region body
PF: predicated region fallthrough
CT: control target
= control target key end

     0   :  { %s6624_s19 = smov 0   ;;  %s8934_s0 = inlined_call_operand.vmem [shape: f32[16,32,4], index: 0, kind: input, shape index: {}]   ;;  %s8935_s1 = inlined_call_operand.vmem [shape: f32[12,8], index: 1, kind: input, shape index: {}]   ;;  %s8936_s2 = inlined_call_operand.vmem [shape: f32[1,8], index: 2, kind: input, shape index: {}]   ;;  %s8937_s3 = inlined_call_operand.vmem [shape: f32[24,16], index: 3, kind: input, shape index: {}]   ;;  %s8938_s4 = inlined_call_operand.vmem [shape: f32[1,16], index: 4, kind: input, shape index: {}]   ;;  %s8939_s5 = inlined_call_operand.vmem [shape: f32[48,32], index: 5, kind: input, shape index: {}]   ;;  %s8940_s6 = inlined_call_operand.vmem [shape: f32[1,32], index: 6, kind: input, shape index: {}]   ;;  %s8941_s7 = inlined_call_operand.vmem [shape: f32[320,64], index: 7, kind: input, shape index: {}]   ;;  %s8942_s8 = inlined_call_operand.vmem [shape: f32[1,64], index: 8, kind: input, shape index: {}]   ;;  %s8943_s9 = inlined_call_operand.vmem [shape: f32[64,1], index: 9, kind: input, shape index: {}]   ;;  %s8944_s10 = inlined_call_operand.<no memory space> [shape: f32[1,1], index: 10, kind: input, shape index: {}]   ;;  %s8945_s11 = inlined_call_operand.vmem [shape: f32[16,1], index: 11, kind: output, shape index: {}]  }
   0x1   :  { %v16_v0 = vstv %s8944_s10 }
   0x2   :  { %17 = vst [vmem:[#allocation2] sm:$0x1] %v16_v0 }
   0x3 LB: > { %s6630_s20 = sadd.s32 4294967295, %s6549_s19   ;;  %p5423_p0 = scmp.ge.s32.totalorder %s6549_s19, 1  ;;  %s6549_s19 = sphi %s6624_s19, %s23_s19  }
   0x4   : > { %p341_p1 = scmp.lt.s32.totalorder %s6549_s19, 3 }
   0x6   : > { %p342_p2 = pnand %p5423_p0, %p341_p1 }
   0x8   : > { %345 = sbr.rel (%p342_p2) target bundleno = 4196 (0x1064), region = 64 }
   0xf   : > { %s5424_s21 = sshll.u32 %s6630_s20, 3  ;;  %v392_v1 = vld [vmem:[%s8935_s1] sm:$0xff]  ;;  %v393_v2 = vld [vmem:[%s8935_s1 + $0x8] sm:$0xf]  ;;  %vm8946_vm0 = vcmask 1043456   ;;  %vm6551_vm1 = vmmov 1  }
  0x10   : > { %p382_p3 = scmp.lt.s32.totalorder %s5424_s21, 15  ;;  %v6641_v3 = vpack.c.bf16 %v393_v2, %v392_v1  ;;  %vm6644_vm2 = vmpackc.low %vm8946_vm0, %vm6551_vm1  ;;  %vm8983_vm3 = vcmask 1046528   ;;  %vm434_vm4 = vcmask 1045504   ;;  %s6552_s29 = smov 4   ;;  %vm454_vm5 = vcmask 31744   ;;  %v395_v57 = vld [vmem:[%s8937_s3] sm:$0xff] }
  0x11   : > { %s6553_s30 = smov 8   ;;  %vm459_vm6 = vcmask 64512   ;;  %vm470_vm7 = vcmask 97280   ;;  %v6712_v50 = vld [vmem:[%s8936_s2] ss:$0 sm:$0xff]  ;;  %v396_v58 = vld [vmem:[%s8937_s3 + $0x8] sm:$0xff] }
  0x12   : > { %s9078_s21 = smov (!%p382_p3, %s5424_s21), 15  ;;  %6167 = vmatprep.subr.msk.bf16.mxu0 %vm6644_vm2, %v6641_v3  ;;  %v6725_v60 = vpack.c.bf16 %v396_v58, %v395_v57  ;;  %s6554_s10 = smov 16   ;;  %vm622_vm8 = vcmask 130048   ;;  %vm633_vm9 = vcmask 195584   ;;  %vm781_vm10 = vcmask 261120  }
  0x13   : > { %s5569_s25 = sshll.u32 %s9078_s21, 5  ;;  %6170 = vmatpush3.bf16.msk.msra.mxu0 %vm6644_vm2, %v6641_v3  ;;  %s6555_s22 = smov 32   ;;  %vm792_vm11 = vcmask 392192   ;;  %vm894_vm12 = vcmask 256000   ;;  %vm918_vm13 = vcmask 261127   ;;  %vm968_vm14 = vcmask 254976  }
  0x14   : > { %s6657_s28 = scalar_lea.vmem %s8934_s0, %s5569_s25  ;;  %6172 = vmatprep.subr.bf16.mxu1 %v6725_v60  ;;  %vm910_vm15 = vcmask 261125   ;;  %vm902_vm1 = vcmask 259074   ;;  %vm928_vm0 = vcmask 258050   ;;  %s6557_s25 = smov 96  }
  0x15   : > { %v409_v5 = vld [vmem:[%s6657_s28 + $0x18] sm:$0xff]  ;;  %v406_v6 = vld [vmem:[%s6657_s28] sm:$0xff]  ;;  %v407_v7 = vld [vmem:[%s6657_s28 + $0x8] sm:$0xff]  ;;  %6174 = vmatpush3.bf16.msra.mxu1 %v6725_v60  ;;  %p388_p4 = scmp.lt.s32.totalorder %s6630_s20, 1 }
  0x16   : > { %v420_v8 = vrot.slane %v409_v5, 1  ;;  %v415_v9 = vrot.slane %v406_v6, 1  ;;  %v416_v10 = vrot.slane %v407_v7, 1  ;;  %v435_v11 = vrot.slane %v406_v6, 2  ;;  %v408_v12 = vld [vmem:[%s6657_s28 + $0x10] sm:$0xff]  ;;  %v6690_v39 = vld [vmem:[%s6657_s28 + $0x20] sm:$0xff] }
  0x17   : > { %v436_v13 = vrot.slane %v407_v7, 2  ;;  %v418_v14 = vrot.slane %v408_v12, 1  ;;  %v438_v17 = vrot.slane %v408_v12, 2  ;;  %v440_v21 = vrot.slane %v409_v5, 2  ;;  %v6693_v40 = vld [vmem:[%s6657_s28 + $0x28] sm:$0xff]  ;;  %v6704_v47 = vld [vmem:[%s6657_s28 + $0x30] sm:$0xff] }
  0x18   : > { %428 = vrot.lane.b32.xlu1 %v420_v8, %s6552_s29  ;;  %v417_v15 = vsel %vm8983_vm3, %v415_v9, %v416_v10  ;;  %v1023_v41 = vrot.slane %v6690_v39, 1  ;;  %v1024_v42 = vrot.slane %v6693_v40, 1  ;;  %v1042_v44 = vrot.slane %v6690_v39, 2  ;;  %s9080_s20 = smov (!%p388_p4, %s6630_s20), 1 }
  0x19   : > { %422 = vrot.lane.b32.xlu0 %v417_v15, %s6552_s29  ;;  %v437_v16 = vsel %vm434_vm4, %v435_v11, %v436_v13  ;;  %v419_v18 = vsel %vm8983_vm3, %v416_v10, %v418_v14  ;;  %v439_v19 = vsel %vm434_vm4, %v436_v13, %v438_v17  ;;  %v421_v20 = vsel %vm8983_vm3, %v418_v14, %v420_v8  ;;  %v6748_v14 = vld [vmem:[%s6657_s28 + $0x38] sm:$0xff] }
  0x1a   : > { %v441_v22 = vsel %vm434_vm4, %v438_v17, %v440_v21  ;;  %v1025_v43 = vsel %vm8983_vm3, %v1023_v41, %v1024_v42  ;;  %v1043_v45 = vrot.slane %v6693_v40, 2  ;;  %v1026_v48 = vrot.slane %v6704_v47, 1 }
  0x1b   : > { %v1028_v17 = vrot.slane %v6748_v14, 1 }
  0x1c   : > { %442 = vrot.lane.b32.xlu1 %v437_v16, %s6553_s30  ;;  %v1044_v46 = vsel %vm434_vm4, %v1042_v44, %v1043_v45  ;;  %v1027_v49 = vsel %vm8983_vm3, %v1024_v42, %v1026_v48 }
  0x1d   : > { %424 = vrot.lane.b32.xlu0 %v419_v18, %s6552_s29 }
  0x20   : > { %444 = vrot.lane.b32.xlu1 %v439_v19, %s6553_s30 }
  0x21   : > { %426 = vrot.lane.b32.xlu0 %v421_v20, %s6552_s29  ;;  %v1029_v20 = vsel %vm8983_vm3, %v1026_v48, %v1028_v17 }
  0x24   : > { %448 = vrot.lane.b32.xlu1 %v440_v21, %s6553_s30  ;;  %v1045_v21 = vrot.slane %v6704_v47, 2 }
  0x25   : > { %446 = vrot.lane.b32.xlu0 %v441_v22, %s6553_s30  ;;  %v1047_v22 = vrot.slane %v6748_v14, 2 }
  0x28   : > { %1032 = vrot.lane.b32.xlu1 %v1027_v49, %s6552_s29 }
  0x29   : > { %1030 = vrot.lane.b32.xlu0 %v1025_v43, %s6552_s29 }
  0x2d   : > { %1049 = vrot.lane.b32.xlu0 %v1044_v46, %s6553_s30 }
  0x8a   : > { %v429_v23 = vpop.permute.xlu1 %428 }
  0x8b   : > { %v423_v24 = vpop.permute.xlu0 %422  ;;  %v458_v36 = vsel %vm454_vm5, %v409_v5, %v429_v23 }
  0x8c   : > { %v455_v25 = vsel %vm454_vm5, %v406_v6, %v423_v24  ;;  %v1046_v24 = vsel %vm434_vm4, %v1043_v45, %v1045_v21 }
  0x8e   : > { %v443_v26 = vpop.permute.xlu1 %442 }
  0x8f   : > { %v425_v27 = vpop.permute.xlu0 %424  ;;  %v460_v28 = vsel %vm459_vm6, %v455_v25, %v443_v26  ;;  %v1048_v25 = vsel %vm434_vm4, %v1045_v21, %v1047_v22 }
  0x90   : > { %5811 = vmatprep.mubr.msk.f32.mxu0 %vm470_vm7, %v460_v28  ;;  %v456_v29 = vsel %vm454_vm5, %v407_v7, %v425_v27  ;;  %v6736_v7 = vld [vmem:[%s8937_s3 + $0x10] sm:$0xff] }
  0x91   : > { %5821 = vmatprep.subr.mxu1 %v6736_v7 }
  0x92   : > { %v445_v30 = vpop.permute.xlu1 %444  ;;  %5822 = vmatpush3.msra.mxu1 %v6736_v7 }
  0x93   : > { %v461_v31 = vsel %vm459_vm6, %v456_v29, %v445_v30  ;;  %v427_v32 = vpop.permute.xlu0 %426  ;;  %6189 = vmatprep.subr.msk.bf16.mxu1 %vm6644_vm2, %v6641_v3 }
  0x94   : > { %5812 = vmatmul.mubr.msk.f32.vlgmr.msra.gmra.mrb[0].mxu0 %vm470_vm7, %v461_v31  ;;  %v457_v34 = vsel %vm454_vm5, %v408_v12, %v427_v32 }
  0x96   : > { %v449_v33 = vpop.permute.xlu1 %448 }
  0x97   : > { %v447_v35 = vpop.permute.xlu0 %446  ;;  %v463_v38 = vsel %vm459_vm6, %v458_v36, %v449_v33 }
  0x98   : > { %v462_v37 = vsel %vm459_vm6, %v457_v34, %v447_v35 }
  0x99   : > { %5814 = vmatprep.mubr.msk.f32.mxu0 %vm470_vm7, %v462_v37 }
  0x9a   : > { %5815 = vmatmul.mubr.msk.f32.gmra.mrb[2].mxu0 %vm470_vm7, %v463_v38  ;;  %v1033_v28 = vpop.permute.xlu1 %1032 }
  0x9b   : > { %v1031_v26 = vpop.permute.xlu0 %1030 }
  0x9c   : > { %v1061_v46 = vsel %vm454_vm5, %v6690_v39, %v1031_v26  ;;  %v1062_v39 = vsel %vm454_vm5, %v6693_v40, %v1033_v28 }
  0x9f   : > { %v1050_v27 = vpop.permute.xlu0 %1049 }
 0x167   : > { %v5813_v51 = vpop.f32.mrb[0].mxu0 }
 0x168   : > { %v559_v52 = vadd.f32 %v5813_v51, %v6712_v50  ;;  %v553_v53 = vpop.f32.mrb[1].mxu0 }
 0x169   : > { %v554_v54 = vadd.f32 %v6712_v50, %v553_v53 }
 0x16a   : > { %v6716_v55 = vmax.f32 %v559_v52, 0.0 }
 0x16b   : > { %v572_v56 = vmax.f32 %v554_v54, 0.0  ;;  %v1065_v54 = vsel %vm459_vm6, %v1061_v46, %v1050_v27 }
 0x16c   : > { %v581_v59 = vrot.slane %v6716_v55, 1  ;;  %v600_v1 = vrot.slane %v6716_v55, 2 }
 0x16d   : > { %v580_v61 = vrot.slane %v572_v56, 1  ;;  %v5816_v62 = vpop.f32.mrb[2].mxu0  ;;  %v599_v2 = vrot.slane %v572_v56, 2 }
 0x16e   : > { %v569_v63 = vadd.f32 %v5816_v62, %v6712_v50  ;;  %v563_v0 = vpop.f32.mrb[3].mxu0 }
 0x16f   : > { %v564_v5 = vadd.f32 %v6712_v50, %v563_v0  ;;  %v582_v6 = vsel %vm8983_vm3, %v580_v61, %v581_v59  ;;  %v601_v12 = vsel %vm434_vm4, %v599_v2, %v600_v1  ;;  %v6813_v61 = vld [vmem:[%s6657_s28 + $0x48] sm:$0xff] }
 0x170   : > { %v575_v8 = vmax.f32 %v569_v63, 0.0  ;;  %587 = vrot.lane.b32.xlu0 %v582_v6, %s6553_s30  ;;  %v1593_v63 = vrot.slane %v6813_v61, 1  ;;  %v1612_v2 = vrot.slane %v6813_v61, 2 }
 0x171   : > { %v574_v9 = vmax.f32 %v564_v5, 0.0  ;;  %v6822_v5 = vld [vmem:[%s6657_s28 + $0x50] sm:$0xff] }
 0x172   : > { %v585_v10 = vrot.slane %v575_v8, 1  ;;  %v604_v13 = vrot.slane %v575_v8, 2 }
 0x173   : > { %v583_v11 = vrot.slane %v574_v9, 1  ;;  %v602_v15 = vrot.slane %v574_v9, 2 }
 0x174   : > { %606 = vrot.lane.b32.xlu0 %v601_v12, %s6554_s10  ;;  %593 = vrot.lane.b32.xlu1 %v585_v10, %s6553_s30 }
 0x175   : > { %v586_v16 = vsel %vm8983_vm3, %v583_v11, %v585_v10  ;;  %v605_v18 = vsel %vm434_vm4, %v602_v15, %v604_v13  ;;  %v584_v19 = vsel %vm8983_vm3, %v581_v59, %v583_v11  ;;  %v603_v23 = vsel %vm434_vm4, %v600_v1, %v602_v15  ;;  %v6810_v59 = vld [vmem:[%s6657_s28 + $0x40] sm:$0xff] }
 0x176   : > { %v1592_v62 = vrot.slane %v6810_v59, 1  ;;  %v1611_v1 = vrot.slane %v6810_v59, 2 }
 0x178   : > { %612 = vrot.lane.b32.xlu1 %v604_v13, %s6554_s10  ;;  %591 = vrot.lane.b32.xlu0 %v586_v16, %s6553_s30  ;;  %v1594_v0 = vsel %vm8983_vm3, %v1592_v62, %v1593_v63  ;;  %v1613_v6 = vsel %vm434_vm4, %v1611_v1, %v1612_v2  ;;  %v404_v62 = vld [vmem:[%s8939_s5 + $0x28] sm:$0xff] }
 0x17c   : > { %610 = vrot.lane.b32.xlu0 %v605_v18, %s6554_s10  ;;  %589 = vrot.lane.b32.xlu1 %v584_v19, %s6553_s30 }
 0x180   : > { %608 = vrot.lane.b32.xlu1 %v603_v23, %s6554_s10  ;;  %1034 = vrot.lane.b32.xlu0 %v1029_v20, %s6552_s29 }
 0x184   : > { %1051 = vrot.lane.b32.xlu1 %v1046_v24, %s6553_s30  ;;  %1053 = vrot.lane.b32.xlu0 %v1048_v25, %s6553_s30 }
 0x188   : > { %1036 = vrot.lane.b32.xlu1 %v1028_v17, %s6552_s29  ;;  %1599 = vrot.lane.b32.xlu0 %v1594_v0, %s6552_s29 }
 0x18c   : > { %1055 = vrot.lane.b32.xlu1 %v1047_v22, %s6553_s30  ;;  %1618 = vrot.lane.b32.xlu0 %v1613_v6, %s6553_s30 }
 0x1e2   : > { %v588_v29 = vpop.permute.xlu0 %587 }
 0x1e3   : > { %v618_v30 = vsel %vm459_vm6, %v572_v56, %v588_v29 }
 0x1e6   : > { %v594_v31 = vpop.permute.xlu1 %593  ;;  %v607_v32 = vpop.permute.xlu0 %606 }
 0x1e7   : > { %v623_v33 = vsel %vm622_vm8, %v618_v30, %v607_v32  ;;  %v621_v48 = vsel %vm459_vm6, %v575_v8, %v594_v31  ;;  %v1595_v8 = vrot.slane %v6822_v5, 1 }
 0x1e8   : > { %5823 = vmatprep.mubr.msk.f32.mxu1 %vm633_vm9, %v623_v33 }
 0x1ea   : > { %v613_v34 = vpop.permute.xlu1 %612  ;;  %v592_v35 = vpop.permute.xlu0 %591 }
 0x1eb   : > { %v620_v43 = vsel %vm459_vm6, %v574_v9, %v592_v35  ;;  %v626_v51 = vsel %vm622_vm8, %v621_v48, %v613_v34  ;;  %v1596_v9 = vsel %vm8983_vm3, %v1593_v63, %v1595_v8  ;;  %v6859_v35 = vld [vmem:[%s6657_s28 + $0x58] sm:$0xff] }
 0x1ec   : > { %1601 = vrot.lane.b32.xlu1 %v1596_v9, %s6552_s29 }
 0x1ee   : > { %v590_v36 = vpop.permute.xlu1 %589  ;;  %v611_v37 = vpop.permute.xlu0 %610 }
 0x1ef   : > { %v619_v38 = vsel %vm459_vm6, %v6716_v55, %v590_v36  ;;  %v625_v45 = vsel %vm622_vm8, %v620_v43, %v611_v37 }
 0x1f2   : > { %v609_v41 = vpop.permute.xlu1 %608  ;;  %v1035_v42 = vpop.permute.xlu0 %1034 }
 0x1f3   : > { %v624_v44 = vsel %vm622_vm8, %v619_v38, %v609_v41  ;;  %v1063_v52 = vsel %vm454_vm5, %v6704_v47, %v1035_v42  ;;  %v6866_v38 = vld [vmem:[%s8938_s4] ss:$0 sm:$0xff]  ;;  %v400_v42 = vld [vmem:[%s8939_s5 + $0x8] sm:$0xff] }
 0x1f4   : > { %5824 = vmatmul.mubr.msk.f32.vlgmr.msra.gmra.mrb[0].mxu1 %vm633_vm9, %v624_v44  ;;  %v399_v41 = vld [vmem:[%s8939_s5] sm:$0xff]  ;;  %v1597_v44 = vrot.slane %v6859_v35, 1 }
 0x1f5   : > { %6192 = vmatpush3.bf16.msk.msra.mxu1 %vm6644_vm2, %v6641_v3  ;;  %5826 = vmatprep.mubr.msk.f32.mxu1 %vm633_vm9, %v625_v45  ;;  %v6877_v45 = vpack.c.bf16 %v400_v42, %v399_v41 }
 0x1f6   : > { %v1052_v49 = vpop.permute.xlu1 %1051  ;;  %6194 = vmatprep.subr.bf16.mxu1 %v6725_v60  ;;  %v1054_v53 = vpop.permute.xlu0 %1053 }
 0x1f7   : > { %v1067_v56 = vsel %vm459_vm6, %v1063_v52, %v1054_v53  ;;  %v1066_v57 = vsel %vm459_vm6, %v1062_v39, %v1052_v49  ;;  %6176 = vmatprep.subr.bf16.mxu0 %v6877_v45  ;;  %v401_v52 = vld [vmem:[%s8939_s5 + $0x10] sm:$0xff]  ;;  %v402_v53 = vld [vmem:[%s8939_s5 + $0x18] sm:$0xff]  ;;  %v1598_v39 = vsel %vm8983_vm3, %v1595_v8, %v1597_v44 }
 0x1f8   : > { %5827 = vmatmul.mubr.msk.f32.gmra.mrb[2].mxu1 %vm633_vm9, %v626_v51  ;;  %v1614_v51 = vrot.slane %v6822_v5, 2  ;;  %6178 = vmatpush3.bf16.msra.mxu0 %v6877_v45 }
 0x1f9   : > { %5851 = vmatprep.mubr.msk.f32.mxu1 %vm470_vm7, %v1065_v54 }
 0x1fa   : > { %v1037_v55 = vpop.permute.xlu1 %1036 }
 0x1fb   : > { %v1064_v47 = vsel %vm454_vm5, %v6748_v14, %v1037_v55  ;;  %v1616_v55 = vrot.slane %v6859_v35, 2 }
 0x1fc   : > { %5852 = vmatmul.mubr.msk.f32.vlgmr.msra.gmra.mrb[4].mxu1 %vm470_vm7, %v1066_v57 }
 0x1fd   : > { %5854 = vmatprep.mubr.msk.f32.mxu1 %vm470_vm7, %v1067_v56  ;;  %6196 = vmatpush3.bf16.msra.mxu1 %v6725_v60  ;;  %v6896_v56 = vpack.c.bf16 %v402_v53, %v401_v52  ;;  %v1617_v0 = vsel %vm434_vm4, %v1614_v51, %v1616_v55 }
 0x1fe   : > { %v1056_v58 = vpop.permute.xlu1 %1055  ;;  %5861 = vmatprep.subr.mxu1 %v6736_v7 }
 0x1ff   : > { %v1068_v40 = vsel %vm459_vm6, %v1064_v47, %v1056_v58  ;;  %v1615_v58 = vsel %vm434_vm4, %v1612_v2, %v1614_v51  ;;  %6180 = vmatprep.subr.bf16.mxu0 %v6896_v56 }
 0x200   : > { %5855 = vmatmul.mubr.msk.f32.gmra.mrb[6].mxu1 %vm470_vm7, %v1068_v40  ;;  %6182 = vmatpush3.bf16.msra.mxu0 %v6896_v56  ;;  %v403_v40 = vld [vmem:[%s8939_s5 + $0x20] sm:$0xff] }
 0x201   : > { %5862 = vmatpush3.msra.mxu1 %v6736_v7  ;;  %v6917_v1 = vpack.c.bf16 %v404_v62, %v403_v40 }
 0x202   : > { %6211 = vmatprep.subr.msk.bf16.mxu1 %vm6644_vm2, %v6641_v3 }
 0x203   : > { %6184 = vmatprep.subr.bf16.mxu0 %v6917_v1 }
 0x204   : > { %6186 = vmatpush3.bf16.msra.mxu0 %v6917_v1 }
 0x205   : > { %6198 = vmatprep.subr.bf16.mxu0 %v6877_v45 }
 0x2c7   : > { %v5825_v10 = vpop.f32.mrb[0].mxu1 }
 0x2c8   : > { %v712_v11 = vpop.f32.mrb[1].mxu1  ;;  %v718_v46 = vadd.f32 %v5825_v10, %v6866_v38 }
 0x2c9   : > { %v713_v48 = vadd.f32 %v6866_v38, %v712_v11 }
 0x2ca   : > { %v6899_v57 = vmax.f32 %v718_v46, 0.0 }
 0x2cb   : > { %v6831_v12 = vpop.f32.mrb[2].mxu1  ;;  %v6901_v47 = vmax.f32 %v713_v48, 0.0 }
 0x2cc   : > { %v722_v13 = vpop.f32.mrb[3].mxu1  ;;  %v740_v2 = vrot.slane %v6899_v57, 1  ;;  %v728_v8 = vadd.f32 %v6831_v12, %v6866_v38  ;;  %v759_v10 = vrot.slane %v6899_v57, 2 }
 0x2cd   : > { %v723_v63 = vadd.f32 %v6866_v38, %v722_v13  ;;  %v739_v6 = vrot.slane %v6901_v47, 1  ;;  %v758_v11 = vrot.slane %v6901_v47, 2 }
 0x2ce   : > { %v6933_v13 = vmax.f32 %v728_v8, 0.0 }
 0x2cf   : > { %v5853_v14 = vpop.f32.mrb[4].mxu1  ;;  %v6927_v9 = vmax.f32 %v723_v63, 0.0  ;;  %v741_v12 = vsel %vm8983_vm3, %v739_v6, %v740_v2 }
 0x2d0   : > { %v1153_v15 = vadd.f32 %v5853_v14, %v6712_v50  ;;  %v1147_v16 = vpop.f32.mrb[5].mxu1 }
 0x2d1   : > { %v1148_v17 = vadd.f32 %v6712_v50, %v1147_v16  ;;  %v742_v14 = vrot.slane %v6927_v9, 1  ;;  %v760_v16 = vsel %vm434_vm4, %v758_v11, %v759_v10 }
 0x2d2   : > { %v6835_v18 = vmax.f32 %v1153_v15, 0.0  ;;  %v744_v15 = vrot.slane %v6933_v13, 1 }
 0x2d3   : > { %v6837_v19 = vmax.f32 %v1148_v17, 0.0  ;;  %v5856_v20 = vpop.f32.mrb[6].mxu1  ;;  %v761_v17 = vrot.slane %v6927_v9, 2 }
 0x2d4   : > { %v1175_v21 = vrot.slane %v6835_v18, 1  ;;  %v1163_v22 = vadd.f32 %v5856_v20, %v6712_v50  ;;  %v1157_v23 = vpop.f32.mrb[7].mxu1  ;;  %v1194_v27 = vrot.slane %v6835_v18, 2  ;;  %v743_v20 = vsel %vm8983_vm3, %v740_v2, %v742_v14 }
 0x2d5   : > { %v1174_v24 = vrot.slane %v6837_v19, 1  ;;  %v1158_v25 = vadd.f32 %v6712_v50, %v1157_v23  ;;  %v1193_v28 = vrot.slane %v6837_v19, 2  ;;  %v762_v23 = vsel %vm434_vm4, %v759_v10, %v761_v17 }
 0x2d6   : > { %v6843_v26 = vmax.f32 %v1163_v22, 0.0  ;;  %v745_v22 = vsel %vm8983_vm3, %v742_v14, %v744_v15 }
 0x2d7   : > { %v6847_v29 = vmax.f32 %v1158_v25, 0.0  ;;  %v1176_v30 = vsel %vm8983_vm3, %v1174_v24, %v1175_v21  ;;  %v1195_v33 = vsel %vm434_vm4, %v1193_v28, %v1194_v27  ;;  %v1600_v25 = vpop.permute.xlu0 %1599  ;;  %v1602_v28 = vpop.permute.xlu1 %1601 }
 0x2d8   : > { %1181 = vrot.lane.b32.xlu0 %v1176_v30, %s6553_s30  ;;  %v1179_v31 = vrot.slane %v6843_v26, 1  ;;  %v1198_v34 = vrot.slane %v6843_v26, 2  ;;  %v1630_v51 = vsel %vm454_vm5, %v6810_v59, %v1600_v25  ;;  %v7031_v25 = vld [vmem:[%s6657_s28 + $0x70] sm:$0xff] }
 0x2d9   : > { %v1177_v32 = vrot.slane %v6847_v29, 1  ;;  %v1196_v36 = vrot.slane %v6847_v29, 2 }
 0x2da   : > { %1187 = vrot.lane.b32.xlu1 %v1179_v31, %s6553_s30 }
 0x2db   : > { %v1180_v37 = vsel %vm8983_vm3, %v1177_v32, %v1179_v31  ;;  %v1178_v43 = vsel %vm8983_vm3, %v1175_v21, %v1177_v32  ;;  %v1199_v49 = vsel %vm434_vm4, %v1196_v36, %v1198_v34  ;;  %v1197_v54 = vsel %vm434_vm4, %v1194_v27, %v1196_v36  ;;  %v1619_v27 = vpop.permute.xlu0 %1618 }
 0x2dc   : > { %1200 = vrot.lane.b32.xlu0 %v1195_v33, %s6554_s10  ;;  %v763_v21 = vrot.slane %v6933_v13, 2 }
 0x2de   : > { %1206 = vrot.lane.b32.xlu1 %v1198_v34, %s6554_s10  ;;  %v764_v24 = vsel %vm434_vm4, %v761_v17, %v763_v21  ;;  %v7019_v17 = vld [vmem:[%s6657_s28 + $0x60] sm:$0xff] }
 0x2e0   : > { %1185 = vrot.lane.b32.xlu0 %v1180_v37, %s6553_s30 }
 0x2e2   : > { %1183 = vrot.lane.b32.xlu1 %v1178_v43, %s6553_s30 }
 0x2e4   : > { %1204 = vrot.lane.b32.xlu0 %v1199_v49, %s6554_s10 }
 0x2e6   : > { %1202 = vrot.lane.b32.xlu1 %v1197_v54, %s6554_s10  ;;  %v1634_v54 = vsel %vm459_vm6, %v1630_v51, %v1619_v27 }
 0x2e8   : > { %1603 = vrot.lane.b32.xlu0 %v1598_v39, %s6552_s29  ;;  %v1631_v39 = vsel %vm454_vm5, %v6813_v61, %v1602_v28  ;;  %v2164_v28 = vrot.slane %v7031_v25, 1 }
 0x2ea   : > { %1620 = vrot.lane.b32.xlu1 %v1615_v58, %s6553_s30 }
 0x2ec   : > { %1622 = vrot.lane.b32.xlu0 %v1617_v0, %s6553_s30 }
 0x2ee   : > { %1605 = vrot.lane.b32.xlu1 %v1597_v44, %s6552_s29 }
 0x2f0   : > { %746 = vrot.lane.b32.xlu0 %v741_v12, %s6554_s10 }
 0x2f2   : > { %1624 = vrot.lane.b32.xlu1 %v1616_v55, %s6553_s30 }
 0x2f4   : > { %765 = vrot.lane.b32.xlu0 %v760_v16, %s6555_s22 }
 0x2f6   : > { %748 = vrot.lane.b32.xlu1 %v743_v20, %s6554_s10  ;;  %v7022_v20 = vld [vmem:[%s6657_s28 + $0x68] sm:$0xff] }
 0x2f8   : > { %750 = vrot.lane.b32.xlu0 %v745_v22, %s6554_s10  ;;  %v2162_v22 = vrot.slane %v7022_v20, 1 }
 0x2fa   : > { %767 = vrot.lane.b32.xlu1 %v762_v23, %s6555_s22  ;;  %v2180_v23 = vrot.slane %v7019_v17, 2 }
 0x2fc   : > { %769 = vrot.lane.b32.xlu0 %v764_v24, %s6555_s22  ;;  %v2181_v24 = vrot.slane %v7022_v20, 2 }
 0x2fe   : > { %752 = vrot.lane.b32.xlu1 %v744_v15, %s6554_s10  ;;  %v2182_v27 = vsel %vm434_vm4, %v2180_v23, %v2181_v24 }
 0x302   : > { %771 = vrot.lane.b32.xlu1 %v763_v21, %s6555_s22  ;;  %v2161_v21 = vrot.slane %v7019_v17, 1 }
 0x34a   : > { %v1182_v30 = vpop.permute.xlu0 %1181 }
 0x34b   : > { %v1212_v32 = vsel %vm459_vm6, %v6837_v19, %v1182_v30  ;;  %v2165_v30 = vsel %vm8983_vm3, %v2162_v22, %v2164_v28 }
 0x34c   : > { %v1188_v31 = vpop.permute.xlu1 %1187  ;;  %2170 = vrot.lane.b32.xlu1 %v2165_v30, %s6552_s29 }
 0x34e   : > { %v1201_v33 = vpop.permute.xlu0 %1200 }
 0x34f   : > { %v1216_v34 = vsel %vm622_vm8, %v1212_v32, %v1201_v33 }
 0x350   : > { %v1207_v36 = vpop.permute.xlu1 %1206  ;;  %5863 = vmatprep.mubr.msk.f32.mxu1 %vm633_vm9, %v1216_v34 }
 0x352   : > { %v1186_v37 = vpop.permute.xlu0 %1185 }
 0x353   : > { %v1214_v46 = vsel %vm459_vm6, %v6847_v29, %v1186_v37 }
 0x354   : > { %v1184_v41 = vpop.permute.xlu1 %1183 }
 0x355   : > { %v1213_v43 = vsel %vm459_vm6, %v6835_v18, %v1184_v41  ;;  %v1215_v18 = vsel %vm459_vm6, %v6843_v26, %v1188_v31 }
 0x356   : > { %v1205_v42 = vpop.permute.xlu0 %1204  ;;  %v1219_v52 = vsel %vm622_vm8, %v1215_v18, %v1207_v36 }
 0x357   : > { %v1218_v19 = vsel %vm622_vm8, %v1214_v46, %v1205_v42 }
 0x358   : > { %v1203_v44 = vpop.permute.xlu1 %1202 }
 0x359   : > { %v1217_v48 = vsel %vm622_vm8, %v1213_v43, %v1203_v44 }
 0x35a   : > { %5864 = vmatmul.mubr.msk.f32.vlgmr.msra.gmra.mrb[8].mxu1 %vm633_vm9, %v1217_v48  ;;  %v1604_v49 = vpop.permute.xlu0 %1603 }
 0x35b   : > { %5866 = vmatprep.mubr.msk.f32.mxu1 %vm633_vm9, %v1218_v19  ;;  %6214 = vmatpush3.bf16.msk.msra.mxu1 %vm6644_vm2, %v6641_v3  ;;  %v1632_v53 = vsel %vm454_vm5, %v6822_v5, %v1604_v49 }
 0x35c   : > { %v1621_v29 = vpop.permute.xlu1 %1620  ;;  %6220 = vmatprep.subr.bf16.mxu1 %v6877_v45 }
 0x35d   : > { %v1635_v58 = vsel %vm459_vm6, %v1631_v39, %v1621_v29 }
 0x35e   : > { %5867 = vmatmul.mubr.msk.f32.gmra.mrb[10].mxu1 %vm633_vm9, %v1219_v52  ;;  %v1623_v59 = vpop.permute.xlu0 %1622 }
 0x35f   : > { %5891 = vmatprep.mubr.msk.f32.mxu1 %vm470_vm7, %v1634_v54  ;;  %v1636_v26 = vsel %vm459_vm6, %v1632_v53, %v1623_v59 }
 0x360   : > { %v1606_v55 = vpop.permute.xlu1 %1605 }
 0x361   : > { %v1633_v40 = vsel %vm454_vm5, %v6859_v35, %v1606_v55 }
 0x362   : > { %5892 = vmatmul.mubr.msk.f32.vlgmr.msra.gmra.mrb[12].mxu1 %vm470_vm7, %v1635_v58  ;;  %v747_v5 = vpop.permute.xlu0 %746 }
 0x363   : > { %5894 = vmatprep.mubr.msk.f32.mxu1 %vm470_vm7, %v1636_v26  ;;  %6222 = vmatpush3.bf16.msra.mxu1 %v6877_v45  ;;  %v777_v63 = vsel %vm622_vm8, %v6901_v47, %v747_v5 }
 0x364   : > { %v1625_v62 = vpop.permute.xlu1 %1624  ;;  %6224 = vmatprep.subr.bf16.mxu1 %v6896_v56 }
 0x365   : > { %v1637_v61 = vsel %vm459_vm6, %v1633_v40, %v1625_v62 }
 0x366   : > { %5895 = vmatmul.mubr.msk.f32.gmra.mrb[14].mxu1 %vm470_vm7, %v1637_v61  ;;  %v766_v35 = vpop.permute.xlu0 %765 }
 0x367   : > { %v782_v0 = vsel %vm781_vm10, %v777_v63, %v766_v35  ;;  %6226 = vmatpush3.bf16.msra.mxu1 %v6896_v56 }
 0x368   : > { %v749_v2 = vpop.permute.xlu1 %748  ;;  %5841 = vmatprep.mubr.msk.f32.mxu0 %vm792_vm11, %v782_v0  ;;  %6228 = vmatprep.subr.bf16.mxu1 %v6917_v1 }
 0x369   : > { %v778_v8 = vsel %vm622_vm8, %v6899_v57, %v749_v2 }
 0x36a   : > { %v751_v6 = vpop.permute.xlu0 %750 }
 0x36b   : > { %6230 = vmatpush3.bf16.msra.mxu1 %v6917_v1  ;;  %v779_v11 = vsel %vm622_vm8, %v6927_v9, %v751_v6  ;;  %v7081_v6 = vld [vmem:[%s8940_s6] ss:$0 sm:$0xff] }
 0x36c   : > { %v768_v10 = vpop.permute.xlu1 %767  ;;  %6238 = vmatprep.subr.bf16.mxu1 %v6725_v60 }
 0x36d   : > { %v783_v47 = vsel %vm781_vm10, %v778_v8, %v768_v10 }
 0x36e   : > { %5842 = vmatmul.mubr.msk.f32.vlgmr.msra.gmra.mrb[4].mxu0 %vm792_vm11, %v783_v47  ;;  %v770_v12 = vpop.permute.xlu0 %769 }
 0x36f   : > { %v784_v14 = vsel %vm781_vm10, %v779_v11, %v770_v12  ;;  %6200 = vmatpush3.bf16.msra.mxu0 %v6877_v45 }
 0x370   : > { %v753_v15 = vpop.permute.xlu1 %752  ;;  %5844 = vmatprep.mubr.msk.f32.mxu0 %vm792_vm11, %v784_v14  ;;  %6202 = vmatprep.subr.bf16.mxu0 %v6896_v56 }
 0x371   : > { %v780_v57 = vsel %vm622_vm8, %v6933_v13, %v753_v15  ;;  %v2163_v13 = vsel %vm8983_vm3, %v2161_v21, %v2162_v22 }
 0x372   : > { %2168 = vrot.lane.b32.xlu0 %v2163_v13, %s6552_s29 }
 0x373   : > { %6204 = vmatpush3.bf16.msra.mxu0 %v6896_v56 }
 0x374   : > { %v772_v9 = vpop.permute.xlu1 %771  ;;  %6206 = vmatprep.subr.bf16.mxu0 %v6917_v1 }
 0x375   : > { %v785_v16 = vsel %vm781_vm10, %v780_v57, %v772_v9 }
 0x376   : > { %5845 = vmatmul.mubr.msk.f32.gmra.mrb[6].mxu0 %vm792_vm11, %v785_v16  ;;  %2187 = vrot.lane.b32.xlu0 %v2182_v27, %s6553_s30 }
 0x377   : > { %6208 = vmatpush3.bf16.msra.mxu0 %v6917_v1 }
 0x378   : > { %6216 = vmatprep.subr.bf16.mxu0 %v6725_v60 }
 0x42d   : > { %v5865_v31 = vpop.f32.mrb[8].mxu1 }
 0x42e   : > { %v1304_v32 = vadd.f32 %v5865_v31, %v6866_v38  ;;  %v1298_v33 = vpop.f32.mrb[9].mxu1 }
 0x42f   : > { %v1299_v34 = vadd.f32 %v6866_v38, %v1298_v33 }
 0x430   : > { %v7044_v36 = vmax.f32 %v1304_v32, 0.0 }
 0x431   : > { %v7046_v37 = vmax.f32 %v1299_v34, 0.0  ;;  %v5868_v41 = vpop.f32.mrb[10].mxu1 }
 0x432   : > { %v1326_v42 = vrot.slane %v7044_v36, 1  ;;  %v1314_v43 = vadd.f32 %v5868_v41, %v6866_v38  ;;  %v1308_v44 = vpop.f32.mrb[11].mxu1  ;;  %v1345_v49 = vrot.slane %v7044_v36, 2 }
 0x433   : > { %v1325_v46 = vrot.slane %v7046_v37, 1  ;;  %v1309_v48 = vadd.f32 %v6866_v38, %v1308_v44  ;;  %v1344_v51 = vrot.slane %v7046_v37, 2 }
 0x434   : > { %v7052_v19 = vmax.f32 %v1314_v43, 0.0 }
 0x435   : > { %v7056_v18 = vmax.f32 %v1309_v48, 0.0  ;;  %v5893_v29 = vpop.f32.mrb[12].mxu1  ;;  %v1327_v52 = vsel %vm8983_vm3, %v1325_v46, %v1326_v42  ;;  %v1346_v58 = vsel %vm434_vm4, %v1344_v51, %v1345_v49  ;;  %v7121_v51 = vld [vmem:[%s6657_s28 + $0x78] sm:$0xff] }
 0x436   : > { %1332 = vrot.lane.b32.xlu0 %v1327_v52, %s6554_s10  ;;  %v1716_v53 = vpop.f32.mrb[13].mxu1  ;;  %v1330_v54 = vrot.slane %v7052_v19, 1  ;;  %v1722_v39 = vadd.f32 %v5893_v29, %v6712_v50  ;;  %v1349_v5 = vrot.slane %v7052_v19, 2 }
 0x437   : > { %v1328_v59 = vrot.slane %v7056_v18, 1  ;;  %v1717_v26 = vadd.f32 %v6712_v50, %v1716_v53  ;;  %v1347_v62 = vrot.slane %v7056_v18, 2 }
 0x438   : > { %1338 = vrot.lane.b32.xlu1 %v1330_v54, %s6554_s10  ;;  %v7070_v61 = vmax.f32 %v1722_v39, 0.0  ;;  %v2166_v39 = vrot.slane %v7121_v51, 1 }
 0x439   : > { %v5896_v55 = vpop.f32.mrb[14].mxu1  ;;  %v7072_v63 = vmax.f32 %v1717_v26, 0.0  ;;  %v1331_v35 = vsel %vm8983_vm3, %v1328_v59, %v1330_v54  ;;  %v1329_v2 = vsel %vm8983_vm3, %v1326_v42, %v1328_v59  ;;  %v1350_v11 = vsel %vm434_vm4, %v1347_v62, %v1349_v5 }
 0x43a   : > { %1351 = vrot.lane.b32.xlu0 %v1346_v58, %s6555_s22  ;;  %v1726_v40 = vpop.f32.mrb[15].mxu1  ;;  %v1732_v0 = vadd.f32 %v5896_v55, %v6712_v50  ;;  %v1744_v8 = vrot.slane %v7070_v61, 1  ;;  %v1348_v16 = vsel %vm434_vm4, %v1345_v49, %v1347_v62  ;;  %v1763_v22 = vrot.slane %v7070_v61, 2 }
 0x43b   : > { %v1743_v10 = vrot.slane %v7072_v63, 1  ;;  %v1727_v57 = vadd.f32 %v6712_v50, %v1726_v40  ;;  %v1762_v13 = vrot.slane %v7072_v63, 2 }
 0x43c   : > { %1357 = vrot.lane.b32.xlu1 %v1349_v5, %s6555_s22  ;;  %v7087_v12 = vmax.f32 %v1732_v0, 0.0 }
 0x43d   : > { %v1745_v27 = vsel %vm8983_vm3, %v1743_v10, %v1744_v8  ;;  %v7106_v31 = vmax.f32 %v1727_v57, 0.0  ;;  %v1764_v41 = vsel %vm434_vm4, %v1762_v13, %v1763_v22 }
 0x43e   : > { %1336 = vrot.lane.b32.xlu0 %v1331_v35, %s6554_s10  ;;  %v1748_v30 = vrot.slane %v7087_v12, 1  ;;  %v1767_v44 = vrot.slane %v7087_v12, 2  ;;  %v2183_v35 = vrot.slane %v7031_v25, 2 }
 0x43f   : > { %v1746_v46 = vrot.slane %v7106_v31, 1  ;;  %v1765_v54 = vrot.slane %v7106_v31, 2 }
 0x440   : > { %1334 = vrot.lane.b32.xlu1 %v1329_v2, %s6554_s10  ;;  %v2167_v2 = vsel %vm8983_vm3, %v2164_v28, %v2166_v39  ;;  %v2184_v10 = vsel %vm434_vm4, %v2181_v24, %v2183_v35  ;;  %v2169_v28 = vpop.permute.xlu0 %2168 }
 0x441   : > { %v5843_v47 = vpop.f32.mrb[4].mxu0  ;;  %v1749_v29 = vsel %vm8983_vm3, %v1746_v46, %v1748_v30  ;;  %v1747_v59 = vsel %vm8983_vm3, %v1744_v8, %v1746_v46  ;;  %v1768_v62 = vsel %vm434_vm4, %v1765_v54, %v1767_v44  ;;  %v1766_v0 = vsel %vm434_vm4, %v1763_v22, %v1765_v54 }
 0x442   : > { %v877_v14 = vadd.f32 %v5843_v47, %v7081_v6  ;;  %1355 = vrot.lane.b32.xlu0 %v1350_v11, %s6555_s22  ;;  %v871_v15 = vpop.f32.mrb[5].mxu0  ;;  %v2185_v8 = vrot.slane %v7121_v51, 2 }
 0x443   : > { %v872_v9 = vadd.f32 %v7081_v6, %v871_v15 }
 0x444   : > { %v7094_v21 = vmax.f32 %v877_v14, 0.0  ;;  %1353 = vrot.lane.b32.xlu1 %v1348_v16, %s6555_s22  ;;  %v2186_v47 = vsel %vm434_vm4, %v2183_v35, %v2185_v8  ;;  %v2188_v11 = vpop.permute.xlu0 %2187  ;;  %v2171_v14 = vpop.permute.xlu1 %2170 }
 0x445   : > { %v7099_v23 = vmax.f32 %v872_v9, 0.0 }
 0x446   : > { %8986 = vst [vmem:[#allocation3_spill] sm:$0xff] %v7094_v21  ;;  %v920_v50 = vsel %vm894_vm12, %v7094_v21, -inf  ;;  %1750 = vrot.lane.b32.xlu0 %v1745_v27, %s6553_s30  ;;  %v943_v26 = vsel %vm918_vm13, %v7094_v21, -inf }
 0x447   : > { %8987 = vst [vmem:[#allocation4_spill] sm:$0xff] %v7099_v23  ;;  %v919_v32 = vsel %vm918_vm13, %v7099_v23, -inf }
 0x448   : > { %1756 = vrot.lane.b32.xlu1 %v1748_v30, %s6553_s30  ;;  %v7111_v33 = vmax.f32 %v919_v32, %v920_v50 }
 0x449   : > { %v5846_v34 = vpop.f32.mrb[6].mxu0 }
 0x44a   : > { %v887_v42 = vadd.f32 %v5846_v34, %v7081_v6  ;;  %1769 = vrot.lane.b32.xlu0 %v1764_v41, %s6554_s10  ;;  %v881_v43 = vpop.f32.mrb[7].mxu0 }
 0x44b   : > { %v882_v49 = vadd.f32 %v7081_v6, %v881_v43 }
 0x44c   : > { %v893_v48 = vmax.f32 %v887_v42, 0.0  ;;  %1775 = vrot.lane.b32.xlu1 %v1767_v44, %s6554_s10 }
 0x44d   : > { %v7125_v53 = vmax.f32 %v882_v49, 0.0 }
 0x44e   : > { %v969_v52 = vsel %vm968_vm14, %v893_v48, -inf  ;;  %1754 = vrot.lane.b32.xlu0 %v1749_v29, %s6553_s30 }
 0x44f   : > { %8988 = vst [vmem:[#allocation5_spill] sm:$0xff] %v7125_v53  ;;  %v944_v55 = vsel %vm894_vm12, %v7125_v53, -inf  ;;  %v967_v58 = vsel %vm918_vm13, %v7125_v53, -inf }
 0x450   : > { %1752 = vrot.lane.b32.xlu1 %v1747_v59, %s6553_s30  ;;  %v7138_v40 = vmax.f32 %v943_v26, %v944_v55  ;;  %v7140_v5 = vmax.f32 %v967_v58, %v969_v52  ;;  %v2199_v55 = vsel %vm454_vm5, %v7019_v17, %v2169_v28 }
 0x451   : > { %v2203_v35 = vsel %vm459_vm6, %v2199_v55, %v2188_v11 }
 0x452   : > { %1773 = vrot.lane.b32.xlu0 %v1768_v62, %s6554_s10 }
 0x454   : > { %1771 = vrot.lane.b32.xlu1 %v1766_v0, %s6554_s10  ;;  %v2200_v0 = vsel %vm454_vm5, %v7022_v20, %v2171_v14 }
 0x456   : > { %2172 = vrot.lane.b32.xlu0 %v2167_v2, %s6552_s29 }
 0x458   : > { %2189 = vrot.lane.b32.xlu1 %v2184_v10, %s6553_s30 }
 0x45a   : > { %2191 = vrot.lane.b32.xlu0 %v2186_v47, %s6553_s30  ;;  %v7228_v47 = vld [vmem:[%s6657_s28 + $0x88] sm:$0xff] }
 0x45b   : > { %v2731_v11 = vrot.slane %v7228_v47, 1 }
 0x45c   : > { %2174 = vrot.lane.b32.xlu1 %v2166_v39, %s6552_s29 }
 0x460   : > { %2193 = vrot.lane.b32.xlu1 %v2185_v8, %s6553_s30 }
 0x4a8   : > { %v1333_v15 = vpop.permute.xlu0 %1332 }
 0x4a9   : > { %v1363_v24 = vsel %vm622_vm8, %v7046_v37, %v1333_v15 }
 0x4aa   : > { %v1339_v57 = vpop.permute.xlu1 %1338 }
 0x4ab   : > { %v1366_v43 = vsel %vm622_vm8, %v7052_v19, %v1339_v57  ;;  %v2750_v57 = vrot.slane %v7228_v47, 2 }
 0x4ac   : > { %v1352_v9 = vpop.permute.xlu0 %1351 }
 0x4ad   : > { %v1367_v16 = vsel %vm781_vm10, %v1363_v24, %v1352_v9  ;;  %v7237_v24 = vld [vmem:[%s6657_s28 + $0x90] sm:$0xff] }
 0x4ae   : > { %v1358_v22 = vpop.permute.xlu1 %1357  ;;  %5881 = vmatprep.mubr.msk.f32.mxu0 %vm792_vm11, %v1367_v16  ;;  %v2733_v16 = vrot.slane %v7237_v24, 1 }
 0x4b0   : > { %v1337_v13 = vpop.permute.xlu0 %1336 }
 0x4b1   : > { %v1365_v34 = vsel %vm622_vm8, %v7056_v18, %v1337_v13 }
 0x4b2   : > { %v1335_v27 = vpop.permute.xlu1 %1334 }
 0x4b3   : > { %v1364_v30 = vsel %vm622_vm8, %v7044_v36, %v1335_v27  ;;  %v1370_v36 = vsel %vm781_vm10, %v1366_v43, %v1358_v22  ;;  %v2734_v22 = vsel %vm8983_vm3, %v2731_v11, %v2733_v16 }
 0x4b4   : > { %v1356_v50 = vpop.permute.xlu0 %1355  ;;  %2739 = vrot.lane.b32.xlu1 %v2734_v22, %s6552_s29 }
 0x4b5   : > { %v1369_v37 = vsel %vm781_vm10, %v1365_v34, %v1356_v50 }
 0x4b6   : > { %v1354_v32 = vpop.permute.xlu1 %1353 }
 0x4b7   : > { %v1368_v41 = vsel %vm781_vm10, %v1364_v30, %v1354_v32 }
 0x4b8   : > { %5882 = vmatmul.mubr.msk.f32.vlgmr.msra.gmra.mrb[8].mxu0 %vm792_vm11, %v1368_v41  ;;  %v1751_v42 = vpop.permute.xlu0 %1750 }
 0x4b9   : > { %5884 = vmatprep.mubr.msk.f32.mxu0 %vm792_vm11, %v1369_v37  ;;  %6218 = vmatpush3.bf16.msra.mxu0 %v6725_v60  ;;  %v1781_v18 = vsel %vm459_vm6, %v7072_v63, %v1751_v42 }
 0x4ba   : > { %v1757_v44 = vpop.permute.xlu1 %1756  ;;  %5901 = vmatprep.subr.mxu0 %v6736_v7 }
 0x4bc   : > { %5885 = vmatmul.mubr.msk.f32.gmra.mrb[10].mxu0 %vm792_vm11, %v1370_v36  ;;  %v1770_v46 = vpop.permute.xlu0 %1769 }
 0x4bd   : > { %v1785_v48 = vsel %vm622_vm8, %v1781_v18, %v1770_v46  ;;  %5902 = vmatpush3.msra.mxu0 %v6736_v7 }
 0x4be   : > { %v1776_v49 = vpop.permute.xlu1 %1775  ;;  %5903 = vmatprep.mubr.msk.f32.mxu0 %vm633_vm9, %v1785_v48  ;;  %6233 = vmatprep.subr.msk.bf16.mxu0 %vm6644_vm2, %v6641_v3 }
 0x4c0   : > { %v1755_v19 = vpop.permute.xlu0 %1754 }
 0x4c1   : > { %v1783_v59 = vsel %vm459_vm6, %v7106_v31, %v1755_v19 }
 0x4c2   : > { %v1753_v29 = vpop.permute.xlu1 %1752 }
 0x4c3   : > { %v1782_v63 = vsel %vm459_vm6, %v7070_v61, %v1753_v29  ;;  %v1784_v61 = vsel %vm459_vm6, %v7087_v12, %v1757_v44 }
 0x4c4   : > { %v1774_v52 = vpop.permute.xlu0 %1773  ;;  %v1788_v58 = vsel %vm622_vm8, %v1784_v61, %v1776_v49 }
 0x4c5   : > { %v1787_v7 = vsel %vm622_vm8, %v1783_v59, %v1774_v52 }
 0x4c6   : > { %v1772_v54 = vpop.permute.xlu1 %1771 }
 0x4c7   : > { %v1786_v39 = vsel %vm622_vm8, %v1782_v63, %v1772_v54 }
 0x4c8   : > { %5904 = vmatmul.mubr.msk.f32.vlgmr.msra.gmra.mrb[12].mxu0 %vm633_vm9, %v1786_v39  ;;  %v2173_v26 = vpop.permute.xlu0 %2172 }
 0x4c9   : > { %5906 = vmatprep.mubr.msk.f32.mxu0 %vm633_vm9, %v1787_v7  ;;  %6236 = vmatpush3.bf16.msk.msra.mxu0 %vm6644_vm2, %v6641_v3  ;;  %v2201_v62 = vsel %vm454_vm5, %v7031_v25, %v2173_v26 }
 0x4ca   : > { %v2190_v31 = vpop.permute.xlu1 %2189  ;;  %6242 = vmatprep.subr.bf16.mxu0 %v6877_v45 }
 0x4cb   : > { %v2204_v8 = vsel %vm459_vm6, %v2200_v0, %v2190_v31 }
 0x4cc   : > { %5907 = vmatmul.mubr.msk.f32.gmra.mrb[14].mxu0 %vm633_vm9, %v1788_v58  ;;  %v2192_v17 = vpop.permute.xlu0 %2191 }
 0x4cd   : > { %5931 = vmatprep.mubr.msk.f32.mxu0 %vm470_vm7, %v2203_v35  ;;  %v2205_v2 = vsel %vm459_vm6, %v2201_v62, %v2192_v17 }
 0x4ce   : > { %v2175_v12 = vpop.permute.xlu1 %2174 }
 0x4cf   : > { %v2202_v25 = vsel %vm454_vm5, %v7121_v51, %v2175_v12  ;;  %v7225_v51 = vld [vmem:[%s6657_s28 + $0x80] sm:$0xff] }
 0x4d0   : > { %5932 = vmatmul.mubr.msk.f32.vlgmr.msra.gmra.mrb[16].mxu0 %vm470_vm7, %v2204_v8  ;;  %v2730_v28 = vrot.slane %v7225_v51, 1  ;;  %v2749_v15 = vrot.slane %v7225_v51, 2 }
 0x4d1   : > { %5934 = vmatprep.mubr.msk.f32.mxu0 %vm470_vm7, %v2205_v2  ;;  %6244 = vmatpush3.bf16.msra.mxu0 %v6877_v45 }
 0x4d2   : > { %v2194_v10 = vpop.permute.xlu1 %2193  ;;  %6246 = vmatprep.subr.bf16.mxu0 %v6896_v56  ;;  %v2732_v14 = vsel %vm8983_vm3, %v2730_v28, %v2731_v11  ;;  %v2751_v9 = vsel %vm434_vm4, %v2749_v15, %v2750_v57 }
 0x4d3   : > { %v2206_v20 = vsel %vm459_vm6, %v2202_v25, %v2194_v10  ;;  %2737 = vrot.lane.b32.xlu0 %v2732_v14, %s6552_s29 }
 0x4d4   : > { %5935 = vmatmul.mubr.msk.f32.gmra.mrb[18].mxu0 %vm470_vm7, %v2206_v20 }
 0x4d5   : > { %6248 = vmatpush3.bf16.msra.mxu0 %v6896_v56 }
 0x4d6   : > { %6250 = vmatprep.subr.bf16.mxu0 %v6917_v1 }
 0x4d7   : > { %2756 = vrot.lane.b32.xlu0 %v2751_v9, %s6553_s30 }
 0x4d9   : > { %6252 = vmatpush3.bf16.msra.mxu0 %v6917_v1 }
 0x4da   : > { %6260 = vmatprep.subr.bf16.mxu0 %v6725_v60 }
 0x58b   : > { %v5883_v13 = vpop.f32.mrb[8].mxu0 }
 0x58c   : > { %v1455_v27 = vadd.f32 %v5883_v13, %v7081_v6  ;;  %v1449_v50 = vpop.f32.mrb[9].mxu0 }
 0x58d   : > { %v1450_v30 = vadd.f32 %v7081_v6, %v1449_v50 }
 0x58e   : > { %v7250_v32 = vmax.f32 %v1455_v27, 0.0 }
 0x58f   : > { %v7252_v34 = vmax.f32 %v1450_v30, 0.0  ;;  %v5886_v41 = vpop.f32.mrb[10].mxu0 }
 0x590   : > { %8989 = vst [vmem:[#allocation6_spill] sm:$0xff] %v7250_v32  ;;  %v1494_v37 = vsel %vm894_vm12, %v7250_v32, -inf  ;;  %v1509_v42 = vsel %vm910_vm15, %v7250_v32, -inf  ;;  %v1459_v43 = vpop.f32.mrb[11].mxu0  ;;  %v1465_v63 = vadd.f32 %v5886_v41, %v7081_v6  ;;  %v1516_v61 = vsel %vm918_vm13, %v7250_v32, -inf }
 0x591   : > { %8990 = vst [vmem:[#allocation7_spill] sm:$0xff] %v7252_v34  ;;  %v1510_v44 = vrot.slane %v1509_v42, 4  ;;  %v1479_v36 = vsel %vm902_vm1, %v7252_v34, -inf  ;;  %v1486_v46 = vsel %vm910_vm15, %v7252_v34, -inf  ;;  %v1493_v48 = vsel %vm918_vm13, %v7252_v34, -inf }
 0x592   : > { %v1480_v18 = vrot.slane %v1479_v36, 4  ;;  %v1487_v19 = vrot.slane %v1486_v46, 4  ;;  %v1495_v29 = vmax.f32 %v1493_v48, %v1494_v37  ;;  %v1460_v54 = vadd.f32 %v7081_v6, %v1459_v43 }
 0x593   : > { %v1511_v49 = vmax.f32 %v1509_v42, %v1510_v44  ;;  %v1471_v7 = vmax.f32 %v1465_v63, 0.0 }
 0x594   : > { %v1481_v52 = vmax.f32 %v1479_v36, %v1480_v18  ;;  %v1488_v59 = vmax.f32 %v1486_v46, %v1487_v19  ;;  %v1496_v39 = vrot.slane %v1495_v29, 4  ;;  %v7266_v26 = vmax.f32 %v1460_v54, 0.0 }
 0x595   : > { %v1512_v55 = vrot.slane %v1511_v49, 2  ;;  %v1540_v62 = vsel %vm968_vm14, %v1471_v7, -inf }
 0x596   : > { %8991 = vst [vmem:[#allocation8_spill] sm:$0xff] %v7266_v26  ;;  %v1482_v31 = vrot.slane %v1481_v52, 2  ;;  %v1489_v58 = vrot.slane %v1488_v59, 2  ;;  %v1517_v35 = vsel %vm894_vm12, %v7266_v26, -inf  ;;  %v1525_v17 = vsel %vm928_vm0, %v7266_v26, -inf }
 0x597   : > { %v1518_v0 = vmax.f32 %v1516_v61, %v1517_v35  ;;  %v1526_v12 = vrot.slane %v1525_v17, 4  ;;  %v1539_v2 = vsel %vm918_vm13, %v7266_v26, -inf  ;;  %v1497_v8 = vmax.f32 %v1495_v29, %v1496_v39 }
 0x598   : > { %v7277_v25 = vmax.f32 %v1539_v2, %v1540_v62  ;;  %v1483_v11 = vmax.f32 %v1481_v52, %v1482_v31  ;;  %v1513_v14 = vmax.f32 %v1511_v49, %v1512_v55  ;;  %v1490_v22 = vmax.f32 %v1488_v59, %v1489_v58 }
 0x599   : > { %v1519_v10 = vrot.slane %v1518_v0, 4  ;;  %v1527_v20 = vmax.f32 %v1525_v17, %v1526_v12  ;;  %v1498_v42 = vrot.slane %v1497_v8, 2 }
 0x59a   : > { %v1484_v30 = vrot.slane %v1483_v11, 1  ;;  %v1514_v37 = vrot.slane %v1513_v14, 1  ;;  %v1491_v54 = vrot.slane %v1490_v22, 1 }
 0x59b   : > { %v5905_v28 = vpop.f32.mrb[12].mxu0  ;;  %v1520_v13 = vmax.f32 %v1518_v0, %v1519_v10  ;;  %v1528_v27 = vrot.slane %v1527_v20, 2  ;;  %v1499_v55 = vmax.f32 %v1497_v8, %v1498_v42 }
 0x59c   : > { %v1873_v15 = vadd.f32 %v5905_v28, %v6866_v38  ;;  %v1867_v9 = vpop.f32.mrb[13].mxu0  ;;  %v7285_v36 = vmax.f32 %v1483_v11, %v1484_v30  ;;  %v7289_v19 = vmax.f32 %v1513_v14, %v1514_v37  ;;  %v7305_v2 = vmax.f32 %v1490_v22, %v1491_v54  ;;  %v7313_v28 = vld [vmem:[%s8936_s2] ss:$0 sm:$0xff] }
 0x59d   : > { %v1868_v50 = vadd.f32 %v6866_v38, %v1867_v9  ;;  %v1521_v18 = vrot.slane %v1520_v13, 2  ;;  %v1529_v29 = vmax.f32 %v1527_v20, %v1528_v27  ;;  %v1500_v10 = vrot.slane %v1499_v55, 1 }
 0x59e   : > { %v7281_v41 = vmax.f32 %v1873_v15, 0.0 }
 0x59f   : > { %v7283_v43 = vmax.f32 %v1868_v50, 0.0  ;;  %v5908_v44 = vpop.f32.mrb[14].mxu0  ;;  %v1522_v7 = vmax.f32 %v1520_v13, %v1521_v18  ;;  %v1530_v12 = vrot.slane %v1529_v29, 1  ;;  %v7325_v30 = vmax.f32 %v1499_v55, %v1500_v10  ;;  %v7362_v10 = vld [vmem:[%s6657_s28 + $0x98] sm:$0xff] }
 0x5a0   : > { %v1895_v46 = vrot.slane %v7281_v41, 1  ;;  %v1883_v48 = vadd.f32 %v5908_v44, %v6866_v38  ;;  %v1877_v49 = vpop.f32.mrb[15].mxu0  ;;  %v1914_v61 = vrot.slane %v7281_v41, 2 }
 0x5a1   : > { %v1894_v52 = vrot.slane %v7283_v43, 1  ;;  %v1878_v63 = vadd.f32 %v6866_v38, %v1877_v49  ;;  %v1913_v31 = vrot.slane %v7283_v43, 2  ;;  %v1523_v0 = vrot.slane %v1522_v7, 1 }
 0x5a2   : > { %v7293_v59 = vmax.f32 %v1883_v48, 0.0  ;;  %v7320_v27 = vmax.f32 %v1529_v29, %v1530_v12 }
 0x5a3   : > { %v7299_v58 = vmax.f32 %v1878_v63, 0.0  ;;  %v5933_v62 = vpop.f32.mrb[16].mxu0  ;;  %v1896_v35 = vsel %vm8983_vm3, %v1894_v52, %v1895_v46  ;;  %v7307_v8 = vmax.f32 %v1522_v7, %v1523_v0  ;;  %v1915_v9 = vsel %vm434_vm4, %v1913_v31, %v1914_v61 }
 0x5a4   : > { %1901 = vrot.lane.b32.xlu0 %v1896_v35, %s6554_s10  ;;  %v2285_v38 = vpop.f32.mrb[17].mxu0  ;;  %v1899_v17 = vrot.slane %v7293_v59, 1  ;;  %v2291_v11 = vadd.f32 %v7313_v28, %v5933_v62  ;;  %v1918_v13 = vrot.slane %v7293_v59, 2 }
 0x5a5   : > { %v1897_v20 = vrot.slane %v7299_v58, 1  ;;  %v2286_v14 = vadd.f32 %v7313_v28, %v2285_v38  ;;  %v1916_v37 = vrot.slane %v7299_v58, 2 }
 0x5a6   : > { %1907 = vrot.lane.b32.xlu1 %v1899_v17, %s6554_s10  ;;  %v7328_v42 = vmax.f32 %v2291_v11, 0.0 }
 0x5a7   : > { %v5936_v15 = vpop.f32.mrb[18].mxu0  ;;  %v7330_v44 = vmax.f32 %v2286_v14, 0.0  ;;  %v1900_v18 = vsel %vm8983_vm3, %v1897_v20, %v1899_v17  ;;  %v1898_v29 = vsel %vm8983_vm3, %v1895_v46, %v1897_v20  ;;  %v1919_v54 = vsel %vm434_vm4, %v1916_v37, %v1918_v13 }
 0x5a8   : > { %1920 = vrot.lane.b32.xlu0 %v1915_v9, %s6555_s22  ;;  %v2295_v22 = vpop.f32.mrb[19].mxu0  ;;  %v2301_v48 = vadd.f32 %v7313_v28, %v5936_v15  ;;  %v2313_v52 = vrot.slane %v7328_v42, 1  ;;  %v1917_v31 = vsel %vm434_vm4, %v1914_v61, %v1916_v37  ;;  %v2332_v46 = vrot.slane %v7328_v42, 2 }
 0x5a9   : > { %v2312_v63 = vrot.slane %v7330_v44, 1  ;;  %v2296_v55 = vadd.f32 %v7313_v28, %v2295_v22  ;;  %v2331_v62 = vrot.slane %v7330_v44, 2  ;;  %v2735_v15 = vrot.slane %v7362_v10, 1 }
 0x5aa   : > { %1926 = vrot.lane.b32.xlu1 %v1918_v13, %s6555_s22  ;;  %v7342_v7 = vmax.f32 %v2301_v48, 0.0  ;;  %v2752_v22 = vrot.slane %v7237_v24, 2 }
 0x5ab   : > { %v2314_v35 = vsel %vm8983_vm3, %v2312_v63, %v2313_v52  ;;  %v7353_v17 = vmax.f32 %v2296_v55, 0.0  ;;  %v2333_v0 = vsel %vm434_vm4, %v2331_v62, %v2332_v46  ;;  %v2736_v37 = vsel %vm8983_vm3, %v2733_v16, %v2735_v15  ;;  %v2738_v16 = vpop.permute.xlu0 %2737  ;;  %v2740_v63 = vpop.permute.xlu1 %2739 }
 0x5ac   : > { %1905 = vrot.lane.b32.xlu0 %v1900_v18, %s6554_s10  ;;  %v2317_v38 = vrot.slane %v7342_v7, 1  ;;  %v2336_v61 = vrot.slane %v7342_v7, 2  ;;  %v2754_v18 = vrot.slane %v7362_v10, 2  ;;  %v2753_v48 = vsel %vm434_vm4, %v2750_v57, %v2752_v22 }
 0x5ad   : > { %v2315_v12 = vrot.slane %v7353_v17, 1  ;;  %v2334_v11 = vrot.slane %v7353_v17, 2 }
 0x5ae   : > { %1903 = vrot.lane.b32.xlu1 %v1898_v29, %s6554_s10  ;;  %v2755_v29 = vsel %vm434_vm4, %v2752_v22, %v2754_v18 }
 0x5af   : > { %v2318_v20 = vsel %vm8983_vm3, %v2315_v12, %v2317_v38  ;;  %v2316_v14 = vsel %vm8983_vm3, %v2313_v52, %v2315_v12  ;;  %v2337_v9 = vsel %vm434_vm4, %v2334_v11, %v2336_v61  ;;  %v2335_v13 = vsel %vm434_vm4, %v2332_v46, %v2334_v11  ;;  %v2757_v52 = vpop.permute.xlu0 %2756 }
 0x5b0   : > { %1924 = vrot.lane.b32.xlu0 %v1919_v54, %s6555_s22 }
 0x5b2   : > { %1922 = vrot.lane.b32.xlu1 %v1917_v31, %s6555_s22 }
 0x5b4   : > { %2319 = vrot.lane.b32.xlu0 %v2314_v35, %s6553_s30 }
 0x5b6   : > { %2325 = vrot.lane.b32.xlu1 %v2317_v38, %s6553_s30 }
 0x5b8   : > { %2338 = vrot.lane.b32.xlu0 %v2333_v0, %s6554_s10 }
 0x5ba   : > { %2344 = vrot.lane.b32.xlu1 %v2336_v61, %s6554_s10 }
 0x5bc   : > { %2323 = vrot.lane.b32.xlu0 %v2318_v20, %s6553_s30 }
 0x5be   : > { %2321 = vrot.lane.b32.xlu1 %v2316_v14, %s6553_s30 }
 0x5c0   : > { %2342 = vrot.lane.b32.xlu0 %v2337_v9, %s6554_s10 }
 0x5c2   : > { %2340 = vrot.lane.b32.xlu1 %v2335_v13, %s6554_s10 }
 0x5c4   : > { %2741 = vrot.lane.b32.xlu0 %v2736_v37, %s6552_s29 }
 0x5c6   : > { %2758 = vrot.lane.b32.xlu1 %v2753_v48, %s6553_s30 }
 0x5c8   : > { %2760 = vrot.lane.b32.xlu0 %v2755_v29, %s6553_s30 }
 0x5ca   : > { %2743 = vrot.lane.b32.xlu1 %v2735_v15, %s6552_s29 }
 0x5ce   : > { %2762 = vrot.lane.b32.xlu1 %v2754_v18, %s6553_s30 }
 0x616   : > { %v1902_v54 = vpop.permute.xlu0 %1901 }
 0x617   : > { %v1932_v57 = vsel %vm622_vm8, %v7283_v43, %v1902_v54 }
 0x618   : > { %v1908_v55 = vpop.permute.xlu1 %1907 }
 0x619   : > { %v1935_v15 = vsel %vm622_vm8, %v7293_v59, %v1908_v55 }
 0x61a   : > { %v1921_v31 = vpop.permute.xlu0 %1920 }
 0x61b   : > { %v1936_v46 = vsel %vm781_vm10, %v1932_v57, %v1921_v31 }
 0x61c   : > { %v1927_v62 = vpop.permute.xlu1 %1926  ;;  %5921 = vmatprep.mubr.msk.f32.mxu1 %vm792_vm11, %v1936_v46 }
 0x61e   : > { %v1906_v35 = vpop.permute.xlu0 %1905 }
 0x61f   : > { %v1934_v20 = vsel %vm622_vm8, %v7299_v58, %v1906_v35  ;;  %v1939_v58 = vsel %vm781_vm10, %v1935_v15, %v1927_v62  ;;  %v2768_v62 = vsel %vm454_vm5, %v7225_v51, %v2738_v16  ;;  %v2769_v16 = vsel %vm454_vm5, %v7228_v47, %v2740_v63  ;;  %v7461_v63 = vld [vmem:[%s6657_s28 + $0xa8] sm:$0xff] }
 0x620   : > { %v1904_v38 = vpop.permute.xlu1 %1903  ;;  %v3319_v15 = vrot.slane %v7461_v63, 2 }
 0x621   : > { %v1933_v61 = vsel %vm622_vm8, %v7281_v41, %v1904_v38  ;;  %v7406_v41 = vld [vmem:[%s8937_s3 + $0x10] sm:$0xff] }
 0x622   : > { %v1925_v0 = vpop.permute.xlu0 %1924 }
 0x623   : > { %v1938_v43 = vsel %vm781_vm10, %v1934_v20, %v1925_v0  ;;  %v2772_v0 = vsel %vm459_vm6, %v2768_v62, %v2757_v52 }
 0x624   : > { %v1923_v12 = vpop.permute.xlu1 %1922 }
 0x625   : > { %v1937_v11 = vsel %vm781_vm10, %v1933_v61, %v1923_v12 }
 0x626   : > { %5922 = vmatmul.mubr.msk.f32.vlgmr.msra.gmra.mrb[16].mxu1 %vm792_vm11, %v1937_v11  ;;  %v2320_v14 = vpop.permute.xlu0 %2319  ;;  %v3300_v11 = vrot.slane %v7461_v63, 1 }
 0x627   : > { %5924 = vmatprep.mubr.msk.f32.mxu1 %vm792_vm11, %v1938_v43  ;;  %6240 = vmatpush3.bf16.msra.mxu1 %v6725_v60  ;;  %v2350_v22 = vsel %vm459_vm6, %v7330_v44, %v2320_v14 }
 0x628   : > { %v2326_v9 = vpop.permute.xlu1 %2325  ;;  %5941 = vmatprep.subr.mxu1 %v7406_v41 }
 0x62a   : > { %5925 = vmatmul.mubr.msk.f32.gmra.mrb[18].mxu1 %vm792_vm11, %v1939_v58  ;;  %v2339_v13 = vpop.permute.xlu0 %2338 }
 0x62b   : > { %v2354_v37 = vsel %vm622_vm8, %v2350_v22, %v2339_v13  ;;  %5942 = vmatpush3.msra.mxu1 %v7406_v41 }
 0x62c   : > { %v2345_v59 = vpop.permute.xlu1 %2344  ;;  %5943 = vmatprep.mubr.msk.f32.mxu1 %vm633_vm9, %v2354_v37  ;;  %6255 = vmatprep.subr.msk.bf16.mxu1 %vm6644_vm2, %v6641_v3  ;;  %v936_v37 = vsel %vm910_vm15, %v7094_v21, -inf }
 0x62e   : > { %v2324_v18 = vpop.permute.xlu0 %2323 }
 0x62f   : > { %v2352_v55 = vsel %vm459_vm6, %v7353_v17, %v2324_v18 }
 0x630   : > { %v2322_v48 = vpop.permute.xlu1 %2321 }
 0x631   : > { %v2351_v44 = vsel %vm459_vm6, %v7328_v42, %v2322_v48  ;;  %v2353_v42 = vsel %vm459_vm6, %v7342_v7, %v2326_v9  ;;  %v7470_v9 = vld [vmem:[%s6657_s28 + $0xb0] sm:$0xff] }
 0x632   : > { %v2343_v29 = vpop.permute.xlu0 %2342  ;;  %v2357_v35 = vsel %vm622_vm8, %v2353_v42, %v2345_v59  ;;  %v3302_v22 = vrot.slane %v7470_v9, 1  ;;  %v937_v59 = vrot.slane %v936_v37, 4 }
 0x633   : > { %v2356_v31 = vsel %vm622_vm8, %v2352_v55, %v2343_v29 }
 0x634   : > { %v2341_v54 = vpop.permute.xlu1 %2340  ;;  %v3303_v13 = vsel %vm8983_vm3, %v3300_v11, %v3302_v22 }
 0x635   : > { %v2355_v57 = vsel %vm622_vm8, %v2351_v44, %v2341_v54  ;;  %3308 = vrot.lane.b32.xlu1 %v3303_v13, %s6552_s29  ;;  %v938_v54 = vmax.f32 %v936_v37, %v937_v59 }
 0x636   : > { %5944 = vmatmul.mubr.msk.f32.vlgmr.msra.gmra.mrb[20].mxu1 %vm633_vm9, %v2355_v57  ;;  %v2742_v46 = vpop.permute.xlu0 %2741 }
 0x637   : > { %5946 = vmatprep.mubr.msk.f32.mxu1 %vm633_vm9, %v2356_v31  ;;  %6258 = vmatpush3.bf16.msk.msra.mxu1 %vm6644_vm2, %v6641_v3  ;;  %v2770_v38 = vsel %vm454_vm5, %v7237_v24, %v2742_v46  ;;  %v952_v46 = vsel %vm928_vm0, %v7125_v53, -inf }
 0x638   : > { %v2759_v17 = vpop.permute.xlu1 %2758  ;;  %6264 = vmatprep.subr.bf16.mxu1 %v6877_v45 }
 0x639   : > { %v2773_v12 = vsel %vm459_vm6, %v2769_v16, %v2759_v17  ;;  %v953_v16 = vrot.slane %v952_v46, 4 }
 0x63a   : > { %5947 = vmatmul.mubr.msk.f32.gmra.mrb[22].mxu1 %vm633_vm9, %v2357_v35  ;;  %v2761_v51 = vpop.permute.xlu0 %2760 }
 0x63b   : > { %5971 = vmatprep.mubr.msk.f32.mxu1 %vm470_vm7, %v2772_v0  ;;  %v2774_v61 = vsel %vm459_vm6, %v2770_v38, %v2761_v51  ;;  %v939_v38 = vrot.slane %v938_v54, 2  ;;  %v946_v0 = vrot.slane %v7138_v40, 4 }
 0x63c   : > { %v2744_v7 = vpop.permute.xlu1 %2743 }
 0x63d   : > { %v2771_v24 = vsel %vm454_vm5, %v7362_v10, %v2744_v7  ;;  %v7458_v10 = vld [vmem:[%s6657_s28 + $0xa0] sm:$0xff] }
 0x63e   : > { %5972 = vmatmul.mubr.msk.f32.vlgmr.msra.gmra.mrb[24].mxu1 %vm470_vm7, %v2773_v12  ;;  %v3299_v20 = vrot.slane %v7458_v10, 1  ;;  %v3318_v14 = vrot.slane %v7458_v10, 2 }
 0x63f   : > { %5974 = vmatprep.mubr.msk.f32.mxu1 %vm470_vm7, %v2774_v61  ;;  %6266 = vmatpush3.bf16.msra.mxu1 %v6877_v45 }
 0x640   : > { %v2763_v52 = vpop.permute.xlu1 %2762  ;;  %6268 = vmatprep.subr.bf16.mxu1 %v6896_v56  ;;  %v3301_v43 = vsel %vm8983_vm3, %v3299_v20, %v3300_v11  ;;  %v3320_v58 = vsel %vm434_vm4, %v3318_v14, %v3319_v15  ;;  %v940_v11 = vmax.f32 %v938_v54, %v939_v38 }
 0x641   : > { %v2775_v47 = vsel %vm459_vm6, %v2771_v24, %v2763_v52  ;;  %3306 = vrot.lane.b32.xlu0 %v3301_v43, %s6552_s29  ;;  %v947_v52 = vmax.f32 %v7138_v40, %v946_v0  ;;  %v954_v43 = vmax.f32 %v952_v46, %v953_v16 }
 0x642   : > { %5975 = vmatmul.mubr.msk.f32.gmra.mrb[26].mxu1 %vm470_vm7, %v2775_v47 }
 0x643   : > { %6270 = vmatpush3.bf16.msra.mxu1 %v6896_v56 }
 0x644   : > { %6272 = vmatprep.subr.bf16.mxu1 %v6917_v1 }
 0x645   : > { %3325 = vrot.lane.b32.xlu0 %v3320_v58, %s6553_s30 }
 0x647   : > { %6274 = vmatpush3.bf16.msra.mxu1 %v6917_v1 }
 0x648   : > { %6282 = vmatprep.subr.bf16.mxu1 %v6725_v60 }
 0x6f9   : > { %v5923_v18 = vpop.f32.mrb[16].mxu1 }
 0x6fa   : > { %v2024_v48 = vadd.f32 %v5923_v18, %v7081_v6  ;;  %v2018_v29 = vpop.f32.mrb[17].mxu1 }
 0x6fb   : > { %v2019_v44 = vadd.f32 %v7081_v6, %v2018_v29  ;;  %v941_v29 = vrot.slane %v940_v11, 1 }
 0x6fc   : > { %v7485_v55 = vmax.f32 %v2024_v48, 0.0 }
 0x6fd   : > { %v7487_v57 = vmax.f32 %v2019_v44, 0.0  ;;  %v5926_v31 = vpop.f32.mrb[18].mxu1  ;;  %v948_v44 = vrot.slane %v947_v52, 2 }
 0x6fe   : > { %8992 = vst [vmem:[#allocation9_spill] sm:$0xff] %v7485_v55  ;;  %v2063_v62 = vsel %vm894_vm12, %v7485_v55, -inf  ;;  %v2078_v42 = vsel %vm910_vm15, %v7485_v55, -inf  ;;  %v2028_v17 = vpop.f32.mrb[19].mxu1  ;;  %v2034_v12 = vadd.f32 %v5926_v31, %v7081_v6  ;;  %v2085_v58 = vsel %vm918_vm13, %v7485_v55, -inf }
 0x6ff   : > { %8993 = vst [vmem:[#allocation10_spill] sm:$0xff] %v7487_v57  ;;  %v2079_v35 = vrot.slane %v2078_v42, 4  ;;  %v2062_v51 = vsel %vm918_vm13, %v7487_v57, -inf  ;;  %v2029_v24 = vadd.f32 %v7081_v6, %v2028_v17  ;;  %v7519_v17 = vld [vmem:[%s8938_s4] ss:$0 sm:$0xff] }
 0x700   : > { %v7498_v61 = vmax.f32 %v2062_v51, %v2063_v62  ;;  %v2040_v47 = vmax.f32 %v2034_v12, 0.0 }
 0x701   : > { %v2080_v7 = vmax.f32 %v2078_v42, %v2079_v35  ;;  %v7503_v20 = vmax.f32 %v2029_v24, 0.0  ;;  %v955_v42 = vrot.slane %v954_v43, 2 }
 0x702   : > { %v2109_v13 = vsel %vm968_vm14, %v2040_v47, -inf  ;;  %v7525_v47 = vmax.f32 %v940_v11, %v941_v29 }
 0x703   : > { %8994 = vst [vmem:[#allocation11_spill] sm:$0xff] %v7503_v20  ;;  %v2081_v14 = vrot.slane %v2080_v7, 2  ;;  %v2086_v37 = vsel %vm894_vm12, %v7503_v20, -inf  ;;  %v2094_v59 = vsel %vm928_vm0, %v7503_v20, -inf  ;;  %v2108_v40 = vsel %vm918_vm13, %v7503_v20, -inf }
 0x704   : > { %v2087_v6 = vmax.f32 %v2085_v58, %v2086_v37  ;;  %v2095_v18 = vrot.slane %v2094_v59, 4  ;;  %v7514_v48 = vmax.f32 %v2108_v40, %v2109_v13  ;;  %v949_v58 = vmax.f32 %v947_v52, %v948_v44 }
 0x705   : > { %v2082_v62 = vmax.f32 %v2080_v7, %v2081_v14 }
 0x706   : > { %8995 = vst [vmem:[#allocation12_spill] sm:$0xff] %v7514_v48  ;;  %v2088_v54 = vrot.slane %v2087_v6, 4  ;;  %v2096_v31 = vmax.f32 %v2094_v59, %v2095_v18  ;;  %v950_v29 = vrot.slane %v949_v58, 1 }
 0x707   : > { %v2083_v12 = vrot.slane %v2082_v62, 1 }
 0x708   : > { %v2089_v0 = vmax.f32 %v2087_v6, %v2088_v54  ;;  %v2097_v51 = vrot.slane %v2096_v31, 2  ;;  %v956_v54 = vmax.f32 %v954_v43, %v955_v42 }
 0x709   : > { %v5945_v46 = vpop.f32.mrb[20].mxu1  ;;  %v7529_v13 = vmax.f32 %v2082_v62, %v2083_v12 }
 0x70a   : > { %v2442_v35 = vadd.f32 %v7519_v17, %v5945_v46  ;;  %v2436_v38 = vpop.f32.mrb[21].mxu1  ;;  %v2090_v37 = vrot.slane %v2089_v0, 2  ;;  %v2098_v59 = vmax.f32 %v2096_v31, %v2097_v51 }
 0x70b   : > { %v2437_v16 = vadd.f32 %v7519_v17, %v2436_v38 }
 0x70c   : > { %v7523_v24 = vmax.f32 %v2442_v35, 0.0  ;;  %v2091_v44 = vmax.f32 %v2089_v0, %v2090_v37  ;;  %v2099_v62 = vrot.slane %v2098_v59, 1  ;;  %v7547_v0 = vmax.f32 %v949_v58, %v950_v29 }
 0x70d   : > { %v7527_v7 = vmax.f32 %v2437_v16, 0.0  ;;  %v5948_v14 = vpop.f32.mrb[22].mxu1 }
 0x70e   : > { %v2464_v18 = vrot.slane %v7523_v24, 1  ;;  %v2452_v6 = vadd.f32 %v7519_v17, %v5948_v14  ;;  %v2446_v40 = vpop.f32.mrb[23].mxu1  ;;  %v2483_v31 = vrot.slane %v7523_v24, 2  ;;  %v2092_v14 = vrot.slane %v2091_v44, 1 }
 0x70f   : > { %v2463_v46 = vrot.slane %v7527_v7, 1  ;;  %v2447_v35 = vadd.f32 %v7519_v17, %v2446_v40  ;;  %v2482_v38 = vrot.slane %v7527_v7, 2  ;;  %v7551_v40 = vmax.f32 %v2098_v59, %v2099_v62 }
 0x710   : > { %v7537_v11 = vmax.f32 %v2452_v6, 0.0  ;;  %v957_v6 = vrot.slane %v956_v54, 1  ;;  %v7549_v37 = vmax.f32 %v2091_v44, %v2092_v14 }
 0x711   : > { %v7541_v51 = vmax.f32 %v2447_v35, 0.0  ;;  %v5973_v16 = vpop.f32.mrb[24].mxu1  ;;  %v2465_v43 = vsel %vm8983_vm3, %v2463_v46, %v2464_v18 }
 0x712   : > { %v2468_v42 = vrot.slane %v7537_v11, 1  ;;  %2470 = vrot.lane.b32.xlu0 %v2465_v43, %s6554_s10  ;;  %v2854_v12 = vpop.f32.mrb[25].mxu1  ;;  %v2860_v49 = vadd.f32 %v7313_v28, %v5973_v16  ;;  %v2484_v43 = vsel %vm434_vm4, %v2482_v38, %v2483_v31  ;;  %v2487_v50 = vrot.slane %v7537_v11, 2 }
 0x713   : > { %v2466_v35 = vrot.slane %v7541_v51, 1  ;;  %v2855_v46 = vadd.f32 %v7313_v28, %v2854_v12  ;;  %v7559_v58 = vmax.f32 %v956_v54, %v957_v6  ;;  %v2485_v44 = vrot.slane %v7541_v51, 2 }
 0x714   : > { %2476 = vrot.lane.b32.xlu1 %v2468_v42, %s6554_s10  ;;  %v7567_v62 = vmax.f32 %v2860_v49, 0.0 }
 0x715   : > { %v5976_v52 = vpop.f32.mrb[26].mxu1  ;;  %v7569_v38 = vmax.f32 %v2855_v46, 0.0  ;;  %v2469_v16 = vsel %vm8983_vm3, %v2466_v35, %v2468_v42  ;;  %v2467_v54 = vsel %vm8983_vm3, %v2464_v18, %v2466_v35 }
 0x716   : > { %2489 = vrot.lane.b32.xlu0 %v2484_v43, %s6555_s22  ;;  %v2864_v39 = vpop.f32.mrb[27].mxu1  ;;  %v2870_v12 = vadd.f32 %v7313_v28, %v5976_v52  ;;  %v2882_v14 = vrot.slane %v7567_v62, 1  ;;  %v2488_v43 = vsel %vm434_vm4, %v2485_v44, %v2487_v50  ;;  %v2486_v52 = vsel %vm434_vm4, %v2483_v31, %v2485_v44 }
 0x717   : > { %v2881_v6 = vrot.slane %v7569_v38, 1  ;;  %v2865_v42 = vadd.f32 %v7313_v28, %v2864_v39  ;;  %v2901_v18 = vrot.slane %v7567_v62, 2  ;;  %v2900_v35 = vrot.slane %v7569_v38, 2 }
 0x718   : > { %2495 = vrot.lane.b32.xlu1 %v2487_v50, %s6555_s22  ;;  %v7579_v49 = vmax.f32 %v2870_v12, 0.0  ;;  %v7599_v12 = vld [vmem:[%s6657_s28 + $0xb8] sm:$0xff] }
 0x719   : > { %v2883_v46 = vsel %vm8983_vm3, %v2881_v6, %v2882_v14  ;;  %v7590_v50 = vmax.f32 %v2865_v42, 0.0  ;;  %v2902_v39 = vsel %vm434_vm4, %v2900_v35, %v2901_v18  ;;  %v3304_v42 = vrot.slane %v7599_v12, 1 }
 0x71a   : > { %2474 = vrot.lane.b32.xlu0 %v2469_v16, %s6554_s10  ;;  %v2886_v16 = vrot.slane %v7579_v49, 1  ;;  %v2905_v31 = vrot.slane %v7579_v49, 2  ;;  %v3321_v35 = vrot.slane %v7470_v9, 2 }
 0x71b   : > { %v2884_v44 = vrot.slane %v7590_v50, 1  ;;  %v2903_v6 = vrot.slane %v7590_v50, 2 }
 0x71c   : > { %2472 = vrot.lane.b32.xlu1 %v2467_v54, %s6554_s10 }
 0x71d   : > { %v2887_v54 = vsel %vm8983_vm3, %v2884_v44, %v2886_v16 }
 0x71e   : > { %2493 = vrot.lane.b32.xlu0 %v2488_v43, %s6555_s22  ;;  %v2885_v43 = vsel %vm8983_vm3, %v2882_v14, %v2884_v44  ;;  %v3322_v14 = vsel %vm434_vm4, %v3319_v15, %v3321_v35  ;;  %v3309_v44 = vpop.permute.xlu1 %3308 }
 0x720   : > { %2491 = vrot.lane.b32.xlu1 %v2486_v52, %s6555_s22  ;;  %v2906_v52 = vsel %vm434_vm4, %v2903_v6, %v2905_v31 }
 0x722   : > { %2888 = vrot.lane.b32.xlu0 %v2883_v46, %s6553_s30  ;;  %v2904_v46 = vsel %vm434_vm4, %v2901_v18, %v2903_v6 }
 0x724   : > { %2894 = vrot.lane.b32.xlu1 %v2886_v16, %s6553_s30  ;;  %v3305_v16 = vsel %vm8983_vm3, %v3302_v22, %v3304_v42  ;;  %v3307_v22 = vpop.permute.xlu0 %3306 }
 0x726   : > { %2907 = vrot.lane.b32.xlu0 %v2902_v39, %s6554_s10  ;;  %v3323_v39 = vrot.slane %v7599_v12, 2 }
 0x728   : > { %2913 = vrot.lane.b32.xlu1 %v2905_v31, %s6554_s10  ;;  %v3324_v31 = vsel %vm434_vm4, %v3321_v35, %v3323_v39  ;;  %v3326_v18 = vpop.permute.xlu0 %3325 }
 0x72a   : > { %2892 = vrot.lane.b32.xlu0 %v2887_v54, %s6553_s30 }
 0x72c   : > { %2890 = vrot.lane.b32.xlu1 %v2885_v43, %s6553_s30 }
 0x72e   : > { %2911 = vrot.lane.b32.xlu0 %v2906_v52, %s6554_s10 }
 0x730   : > { %2909 = vrot.lane.b32.xlu1 %v2904_v46, %s6554_s10 }
 0x732   : > { %3310 = vrot.lane.b32.xlu0 %v3305_v16, %s6552_s29 }
 0x734   : > { %3327 = vrot.lane.b32.xlu1 %v3322_v14, %s6553_s30 }
 0x736   : > { %3329 = vrot.lane.b32.xlu0 %v3324_v31, %s6553_s30 }
 0x738   : > { %3312 = vrot.lane.b32.xlu1 %v3304_v42, %s6552_s29 }
 0x73c   : > { %3331 = vrot.lane.b32.xlu1 %v3323_v39, %s6553_s30 }
 0x784   : > { %v2471_v54 = vpop.permute.xlu0 %2470 }
 0x785   : > { %v2501_v15 = vsel %vm622_vm8, %v7527_v7, %v2471_v54 }
 0x786   : > { %v2477_v6 = vpop.permute.xlu1 %2476 }
 0x788   : > { %v2490_v43 = vpop.permute.xlu0 %2489 }
 0x789   : > { %v2505_v52 = vsel %vm781_vm10, %v2501_v15, %v2490_v43  ;;  %v2504_v15 = vsel %vm622_vm8, %v7537_v11, %v2477_v6 }
 0x78a   : > { %v2496_v35 = vpop.permute.xlu1 %2495  ;;  %5961 = vmatprep.mubr.msk.f32.mxu0 %vm792_vm11, %v2505_v52 }
 0x78c   : > { %v2475_v46 = vpop.permute.xlu0 %2474 }
 0x78d   : > { %v2503_v31 = vsel %vm622_vm8, %v7541_v51, %v2475_v46 }
 0x78e   : > { %v2473_v16 = vpop.permute.xlu1 %2472 }
 0x78f   : > { %v2502_v42 = vsel %vm622_vm8, %v7523_v24, %v2473_v16  ;;  %v2508_v24 = vsel %vm781_vm10, %v2504_v15, %v2496_v35 }
 0x790   : > { %v2494_v14 = vpop.permute.xlu0 %2493 }
 0x791   : > { %v2507_v7 = vsel %vm781_vm10, %v2503_v31, %v2494_v14 }
 0x792   : > { %v2492_v39 = vpop.permute.xlu1 %2491 }
 0x793   : > { %v2506_v29 = vsel %vm781_vm10, %v2502_v42, %v2492_v39 }
 0x794   : > { %5962 = vmatmul.mubr.msk.f32.vlgmr.msra.gmra.mrb[20].mxu0 %vm792_vm11, %v2506_v29  ;;  %v2889_v54 = vpop.permute.xlu0 %2888 }
 0x795   : > { %5964 = vmatprep.mubr.msk.f32.mxu0 %vm792_vm11, %v2507_v7  ;;  %6262 = vmatpush3.bf16.msra.mxu0 %v6725_v60  ;;  %v2919_v51 = vsel %vm459_vm6, %v7569_v38, %v2889_v54  ;;  %v3337_v7 = vsel %vm454_vm5, %v7458_v10, %v3307_v22  ;;  %v3338_v22 = vsel %vm454_vm5, %v7461_v63, %v3309_v44  ;;  %v7693_v44 = vld [vmem:[%s6657_s28 + $0xc8] sm:$0xff] }
 0x796   : > { %v2895_v43 = vpop.permute.xlu1 %2894  ;;  %5981 = vmatprep.subr.mxu0 %v7406_v41 }
 0x798   : > { %5965 = vmatmul.mubr.msk.f32.gmra.mrb[22].mxu0 %vm792_vm11, %v2508_v24  ;;  %v2908_v52 = vpop.permute.xlu0 %2907  ;;  %v3341_v24 = vsel %vm459_vm6, %v3337_v7, %v3326_v18 }
 0x799   : > { %v2923_v29 = vsel %vm622_vm8, %v2919_v51, %v2908_v52  ;;  %5982 = vmatpush3.msra.mxu0 %v7406_v41 }
 0x79a   : > { %v2914_v46 = vpop.permute.xlu1 %2913  ;;  %5983 = vmatprep.mubr.msk.f32.mxu0 %vm633_vm9, %v2923_v29  ;;  %6277 = vmatprep.subr.msk.bf16.mxu0 %vm6644_vm2, %v6641_v3  ;;  %v3869_v29 = vrot.slane %v7693_v44, 1 }
 0x79c   : > { %v2893_v11 = vpop.permute.xlu0 %2892 }
 0x79d   : > { %v2921_v14 = vsel %vm459_vm6, %v7590_v50, %v2893_v11 }
 0x79e   : > { %v2891_v6 = vpop.permute.xlu1 %2890 }
 0x79f   : > { %v2920_v38 = vsel %vm459_vm6, %v7567_v62, %v2891_v6  ;;  %v2922_v62 = vsel %vm459_vm6, %v7579_v49, %v2895_v43  ;;  %v8947_v6 = vrot.slane %v7693_v44, 2 }
 0x7a0   : > { %v2912_v35 = vpop.permute.xlu0 %2911  ;;  %v2926_v54 = vsel %vm622_vm8, %v2922_v62, %v2914_v46 }
 0x7a1   : > { %v2925_v39 = vsel %vm622_vm8, %v2921_v14, %v2912_v35  ;;  %v7702_v35 = vld [vmem:[%s6657_s28 + $0xd0] sm:$0xff] }
 0x7a2   : > { %v2910_v16 = vpop.permute.xlu1 %2909 }
 0x7a3   : > { %v2924_v42 = vsel %vm622_vm8, %v2920_v38, %v2910_v16  ;;  %v8948_v16 = vrot.slane %v7702_v35, 1 }
 0x7a4   : > { %5984 = vmatmul.mubr.msk.f32.vlgmr.msra.gmra.mrb[24].mxu0 %vm633_vm9, %v2924_v42  ;;  %v3311_v31 = vpop.permute.xlu0 %3310  ;;  %v903_v42 = vsel %vm902_vm1, %v7099_v23, -inf }
 0x7a5   : > { %5986 = vmatprep.mubr.msk.f32.mxu0 %vm633_vm9, %v2925_v39  ;;  %6280 = vmatpush3.bf16.msk.msra.mxu0 %vm6644_vm2, %v6641_v3  ;;  %v3339_v15 = vsel %vm454_vm5, %v7470_v9, %v3311_v31  ;;  %v3872_v14 = vsel %vm8983_vm3, %v3869_v29, %v8948_v16  ;;  %v911_v39 = vsel %vm910_vm15, %v7099_v23, -inf  ;;  %v2048_v31 = vsel %vm902_vm1, %v7487_v57, -inf }
 0x7a6   : > { %v3328_v50 = vpop.permute.xlu1 %3327  ;;  %6286 = vmatprep.subr.bf16.mxu0 %v6877_v45  ;;  %3877 = vrot.lane.b32.xlu1 %v3872_v14, %s6552_s29  ;;  %v904_v7 = vrot.slane %v903_v42, 4  ;;  %v912_v62 = vrot.slane %v911_v39, 4 }
 0x7a7   : > { %v3342_v51 = vsel %vm459_vm6, %v3338_v22, %v3328_v50  ;;  %v2049_v50 = vrot.slane %v2048_v31, 4 }
 0x7a8   : > { %5987 = vmatmul.mubr.msk.f32.gmra.mrb[26].mxu0 %vm633_vm9, %v2926_v54  ;;  %v3330_v10 = vpop.permute.xlu0 %3329  ;;  %v2055_v54 = vsel %vm910_vm15, %v7487_v57, -inf }
 0x7a9   : > { %6011 = vmatprep.mubr.msk.f32.mxu0 %vm470_vm7, %v3341_v24  ;;  %v3343_v43 = vsel %vm459_vm6, %v3339_v15, %v3330_v10  ;;  %v905_v15 = vmax.f32 %v903_v42, %v904_v7  ;;  %v913_v24 = vmax.f32 %v911_v39, %v912_v62  ;;  %v2056_v10 = vrot.slane %v2055_v54, 4 }
 0x7aa   : > { %v3313_v49 = vpop.permute.xlu1 %3312  ;;  %v2050_v22 = vmax.f32 %v2048_v31, %v2049_v50 }
 0x7ab   : > { %v3340_v9 = vsel %vm454_vm5, %v7599_v12, %v3313_v49  ;;  %v7690_v12 = vld [vmem:[%s6657_s28 + $0xc0] sm:$0xff]  ;;  %v922_v49 = vrot.slane %v7111_v33, 4 }
 0x7ac   : > { %6012 = vmatmul.mubr.msk.f32.vlgmr.msra.gmra.mrb[28].mxu0 %vm470_vm7, %v3342_v51  ;;  %v3868_v52 = vrot.slane %v7690_v12, 1  ;;  %v3887_v11 = vrot.slane %v7690_v12, 2  ;;  %v906_v51 = vrot.slane %v905_v15, 2 }
 0x7ad   : > { %6014 = vmatprep.mubr.msk.f32.mxu0 %vm470_vm7, %v3343_v43  ;;  %6288 = vmatpush3.bf16.msra.mxu0 %v6877_v45  ;;  %v7732_v14 = vmax.f32 %v7111_v33, %v922_v49 }
 0x7ae   : > { %v3332_v18 = vpop.permute.xlu1 %3331  ;;  %6290 = vmatprep.subr.bf16.mxu0 %v6896_v56  ;;  %v3870_v46 = vsel %vm8983_vm3, %v3868_v52, %v3869_v29  ;;  %v3889_v38 = vsel %vm434_vm4, %v3887_v11, %v8947_v6  ;;  %v2057_v29 = vmax.f32 %v2055_v54, %v2056_v10  ;;  %v2051_v11 = vrot.slane %v2050_v22, 2 }
 0x7af   : > { %v3344_v63 = vsel %vm459_vm6, %v3340_v9, %v3332_v18  ;;  %3875 = vrot.lane.b32.xlu0 %v3870_v46, %s6552_s29  ;;  %v914_v9 = vrot.slane %v913_v24, 2  ;;  %v7725_v18 = vld [vmem:[%s8940_s6] ss:$0 sm:$0xff]  ;;  %v907_v50 = vmax.f32 %v905_v15, %v906_v51 }
 0x7b0   : > { %6015 = vmatmul.mubr.msk.f32.gmra.mrb[30].mxu0 %vm470_vm7, %v3344_v63  ;;  %v2058_v10 = vrot.slane %v2057_v29, 2  ;;  %v2052_v59 = vmax.f32 %v2050_v22, %v2051_v11 }
 0x7b1   : > { %6292 = vmatpush3.bf16.msra.mxu0 %v6896_v56  ;;  %v915_v54 = vmax.f32 %v913_v24, %v914_v9  ;;  %v908_v55 = vrot.slane %v907_v50, 1 }
 0x7b2   : > { %6294 = vmatprep.subr.bf16.mxu0 %v6917_v1  ;;  %v7753_v22 = vmax.f32 %v2057_v29, %v2058_v10 }
 0x7b3   : > { %3894 = vrot.lane.b32.xlu0 %v3889_v38, %s6553_s30  ;;  %v916_v32 = vrot.slane %v915_v54, 1  ;;  %v7764_v10 = vmax.f32 %v907_v50, %v908_v55 }
 0x7b5   : > { %6296 = vmatpush3.bf16.msra.mxu0 %v6917_v1 }
 0x7b6   : > { %6304 = vmatprep.subr.bf16.mxu0 %v6725_v60 }
 0x867   : > { %v5963_v43 = vpop.f32.mrb[20].mxu0 }
 0x868   : > { %v2593_v63 = vadd.f32 %v7725_v18, %v5963_v43  ;;  %v2587_v52 = vpop.f32.mrb[21].mxu0  ;;  %v2065_v43 = vrot.slane %v7498_v61, 4 }
 0x869   : > { %v2588_v46 = vadd.f32 %v7725_v18, %v2587_v52 }
 0x86a   : > { %v7729_v38 = vmax.f32 %v2593_v63, 0.0  ;;  %v2066_v26 = vmax.f32 %v7498_v61, %v2065_v43 }
 0x86b   : > { %v7734_v42 = vmax.f32 %v2588_v46, 0.0  ;;  %v5966_v39 = vpop.f32.mrb[22].mxu0 }
 0x86c   : > { %8996 = vst [vmem:[#allocation13_spill] sm:$0xff] %v7729_v38  ;;  %v2632_v31 = vsel %vm894_vm12, %v7729_v38, -inf  ;;  %v2647_v7 = vsel %vm910_vm15, %v7729_v38, -inf  ;;  %v2597_v62 = vpop.f32.mrb[23].mxu0  ;;  %v2603_v24 = vadd.f32 %v7725_v18, %v5966_v39 }
 0x86d   : > { %8997 = vst [vmem:[#allocation14_spill] sm:$0xff] %v7734_v42  ;;  %v2648_v63 = vrot.slane %v2647_v7, 4  ;;  %v2617_v33 = vsel %vm902_vm1, %v7734_v42, -inf  ;;  %v2624_v52 = vsel %vm910_vm15, %v7734_v42, -inf  ;;  %v2631_v46 = vsel %vm918_vm13, %v7734_v42, -inf }
 0x86e   : > { %v2618_v49 = vrot.slane %v2617_v33, 4  ;;  %v2625_v16 = vrot.slane %v2624_v52, 4  ;;  %v2633_v20 = vmax.f32 %v2631_v46, %v2632_v31  ;;  %v2598_v51 = vadd.f32 %v7725_v18, %v2597_v62 }
 0x86f   : > { %v2649_v6 = vmax.f32 %v2647_v7, %v2648_v63  ;;  %v2609_v34 = vmax.f32 %v2603_v24, 0.0  ;;  %v2053_v42 = vrot.slane %v2052_v59, 1  ;;  %v2654_v31 = vsel %vm918_vm13, %v7729_v38, -inf }
 0x870   : > { %v2619_v15 = vmax.f32 %v2617_v33, %v2618_v49  ;;  %v2626_v57 = vmax.f32 %v2624_v52, %v2625_v16  ;;  %v7751_v53 = vmax.f32 %v2598_v51, 0.0  ;;  %v2634_v7 = vrot.slane %v2633_v20, 4 }
 0x871   : > { %v2650_v11 = vrot.slane %v2649_v6, 2  ;;  %v2678_v63 = vsel %vm968_vm14, %v2609_v34, -inf  ;;  %v2060_v52 = vrot.slane %v7753_v22, 1  ;;  %v7769_v46 = vmax.f32 %v915_v54, %v916_v32 }
 0x872   : > { %8998 = vst [vmem:[#allocation15_spill] sm:$0xff] %v7751_v53  ;;  %v2620_v39 = vrot.slane %v2619_v15, 2  ;;  %v2627_v62 = vrot.slane %v2626_v57, 2  ;;  %v2655_v61 = vsel %vm894_vm12, %v7751_v53, -inf  ;;  %v2663_v16 = vsel %vm928_vm0, %v7751_v53, -inf }
 0x873   : > { %v2656_v43 = vmax.f32 %v2654_v31, %v2655_v61  ;;  %v2664_v33 = vrot.slane %v2663_v16, 4  ;;  %v2677_v29 = vsel %vm918_vm13, %v7751_v53, -inf  ;;  %v2067_v34 = vrot.slane %v2066_v26, 2 }
 0x874   : > { %v7766_v49 = vmax.f32 %v2677_v29, %v2678_v63  ;;  %v2651_v38 = vmax.f32 %v2649_v6, %v2650_v11  ;;  %v2621_v23 = vmax.f32 %v2619_v15, %v2620_v39  ;;  %v2635_v21 = vmax.f32 %v2633_v20, %v2634_v7 }
 0x875   : > { %v2657_v24 = vrot.slane %v2656_v43, 4  ;;  %v2665_v51 = vmax.f32 %v2663_v16, %v2664_v33  ;;  %v7772_v48 = vmax.f32 %v2052_v59, %v2053_v42  ;;  %v2628_v55 = vmax.f32 %v2626_v57, %v2627_v62 }
 0x876   : > { %8999 = vst [vmem:[#allocation16_spill] sm:$0xff] %v7766_v49  ;;  %v2652_v53 = vrot.slane %v2651_v38, 1  ;;  %v2622_v54 = vrot.slane %v2621_v23, 1  ;;  %v2068_v16 = vmax.f32 %v2066_v26, %v2067_v34  ;;  %v2636_v39 = vrot.slane %v2635_v21, 2 }
 0x877   : > { %v5985_v9 = vpop.f32.mrb[24].mxu0  ;;  %v2658_v50 = vmax.f32 %v2656_v43, %v2657_v24  ;;  %v2666_v63 = vrot.slane %v2665_v51, 2  ;;  %v2629_v49 = vrot.slane %v2628_v55, 1 }
 0x878   : > { %v3011_v31 = vadd.f32 %v7519_v17, %v5985_v9  ;;  %v3005_v61 = vpop.f32.mrb[25].mxu0  ;;  %v7779_v20 = vmax.f32 %v2651_v38, %v2652_v53  ;;  %v7783_v11 = vmax.f32 %v2621_v23, %v2622_v54 }
 0x879   : > { %v3006_v29 = vadd.f32 %v7519_v17, %v3005_v61  ;;  %v2659_v15 = vrot.slane %v2658_v50, 2  ;;  %v2667_v9 = vmax.f32 %v2665_v51, %v2666_v63  ;;  %v7794_v24 = vmax.f32 %v2628_v55, %v2629_v49 }
 0x87a   : > { %v7775_v32 = vmax.f32 %v3011_v31, 0.0 }
 0x87b   : > { %v7777_v33 = vmax.f32 %v3006_v29, 0.0  ;;  %v5988_v6 = vpop.f32.mrb[26].mxu0  ;;  %v2660_v34 = vmax.f32 %v2658_v50, %v2659_v15  ;;  %v2668_v63 = vrot.slane %v2667_v9, 1  ;;  %v7809_v50 = vmax.f32 %v7753_v22, %v2060_v52 }
 0x87c   : > { %v3033_v59 = vrot.slane %v7775_v32, 1  ;;  %v3021_v57 = vadd.f32 %v7519_v17, %v5988_v6  ;;  %v3015_v42 = vpop.f32.mrb[27].mxu0  ;;  %v3052_v7 = vrot.slane %v7775_v32, 2 }
 0x87d   : > { %v3032_v62 = vrot.slane %v7777_v33, 1  ;;  %v3016_v26 = vadd.f32 %v7519_v17, %v3015_v42  ;;  %v3051_v23 = vrot.slane %v7777_v33, 2  ;;  %v2661_v6 = vrot.slane %v2660_v34, 1 }
 0x87e   : > { %v7790_v38 = vmax.f32 %v3021_v57, 0.0  ;;  %v2069_v57 = vrot.slane %v2068_v16, 1  ;;  %v9000_v42 = vrot.slane %v7732_v14, 2 }
 0x87f   : > { %v7797_v51 = vmax.f32 %v3016_v26, 0.0  ;;  %v6013_v31 = vpop.f32.mrb[28].mxu0  ;;  %v3034_v61 = vsel %vm8983_vm3, %v3032_v62, %v3033_v59  ;;  %v7811_v15 = vmax.f32 %v2660_v34, %v2661_v6  ;;  %v7813_v62 = vmax.f32 %v2667_v9, %v2668_v63 }
 0x880   : > { %v3037_v29 = vrot.slane %v7790_v38, 1  ;;  %3039 = vrot.lane.b32.xlu0 %v3034_v61, %s6554_s10  ;;  %v3423_v54 = vpop.f32.mrb[29].mxu0  ;;  %v925_v49 = vmax.f32 %v7732_v14, %v9000_v42  ;;  %v2637_v26 = vmax.f32 %v2635_v21, %v2636_v39  ;;  %v3429_v43 = vadd.f32 %v7313_v28, %v6013_v31 }
 0x881   : > { %9001 = vst [vmem:[#allocation17_spill] sm:$0xff] %v7813_v62  ;;  %v3035_v61 = vrot.slane %v7797_v51, 1  ;;  %v3424_v53 = vadd.f32 %v7313_v28, %v3423_v54  ;;  %v3053_v42 = vsel %vm434_vm4, %v3051_v23, %v3052_v7  ;;  %v3056_v55 = vrot.slane %v7790_v38, 2 }
 0x882   : > { %3045 = vrot.lane.b32.xlu1 %v3037_v29, %s6554_s10  ;;  %v7821_v52 = vmax.f32 %v2068_v16, %v2069_v57  ;;  %v926_v34 = vrot.slane %v925_v49, 1  ;;  %v2638_v28 = vrot.slane %v2637_v26, 1  ;;  %v3054_v39 = vrot.slane %v7797_v51, 2  ;;  %v7837_v16 = vld [vmem:[%s8936_s2] ss:$0 sm:$0xff] }
 0x883   : > { %v6016_v14 = vpop.f32.mrb[30].mxu0  ;;  %v7829_v23 = vmax.f32 %v3429_v43, 0.0  ;;  %v7831_v31 = vmax.f32 %v3424_v53, 0.0  ;;  %v3038_v63 = vsel %vm8983_vm3, %v3035_v61, %v3037_v29  ;;  %v3036_v43 = vsel %vm8983_vm3, %v3033_v59, %v3035_v61 }
 0x884   : > { %3058 = vrot.lane.b32.xlu0 %v3053_v42, %s6555_s22  ;;  %v3433_v22 = vpop.f32.mrb[31].mxu0  ;;  %9002 = vst [vmem:[#allocation18_spill] sm:$0xff] %v7821_v52  ;;  %v3439_v54 = vadd.f32 %v7837_v16, %v6016_v14  ;;  %v7841_v6 = vmax.f32 %v925_v49, %v926_v34  ;;  %v7843_v57 = vmax.f32 %v2637_v26, %v2638_v28 }
 0x885   : > { %v3451_v29 = vrot.slane %v7829_v23, 1  ;;  %v3450_v42 = vrot.slane %v7831_v31, 1  ;;  %v3057_v9 = vsel %vm434_vm4, %v3054_v39, %v3056_v55  ;;  %v3434_v49 = vadd.f32 %v7837_v16, %v3433_v22 }
 0x886   : > { %3064 = vrot.lane.b32.xlu1 %v3056_v55, %s6555_s22  ;;  %9003 = vst [vmem:[#allocation19_spill] sm:$0xff] %v7841_v6  ;;  %9004 = vst [vmem:[#allocation20_spill] sm:$0xff] %v7843_v57  ;;  %v7852_v14 = vmax.f32 %v3439_v54, 0.0  ;;  %v3055_v59 = vsel %vm434_vm4, %v3052_v7, %v3054_v39  ;;  %v3470_v26 = vrot.slane %v7829_v23, 2  ;;  %v3469_v61 = vrot.slane %v7831_v31, 2  ;;  %v7872_v39 = vld [vmem:[%s6657_s28 + $0xd8] sm:$0xff] }
 0x887   : > { %v3452_v34 = vsel %vm8983_vm3, %v3450_v42, %v3451_v29  ;;  %v7863_v55 = vmax.f32 %v3434_v49, 0.0  ;;  %v3873_v42 = vrot.slane %v7872_v39, 1 }
 0x888   : > { %3043 = vrot.lane.b32.xlu0 %v3038_v63, %s6554_s10  ;;  %v3455_v28 = vrot.slane %v7852_v14, 1  ;;  %v3471_v22 = vsel %vm434_vm4, %v3469_v61, %v3470_v26  ;;  %v3474_v7 = vrot.slane %v7852_v14, 2 }
 0x889   : > { %v3472_v54 = vrot.slane %v7863_v55, 2 }
 0x88a   : > { %3041 = vrot.lane.b32.xlu1 %v3036_v43, %s6554_s10 }
 0x88b   : > { %v3475_v49 = vsel %vm434_vm4, %v3472_v54, %v3474_v7  ;;  %v3473_v61 = vsel %vm434_vm4, %v3470_v26, %v3472_v54  ;;  %v3876_v26 = vpop.permute.xlu0 %3875  ;;  %v3878_v54 = vpop.permute.xlu1 %3877 }
 0x88c   : > { %3062 = vrot.lane.b32.xlu0 %v3057_v9, %s6555_s22  ;;  %v3453_v9 = vrot.slane %v7863_v55, 1 }
 0x88e   : > { %3060 = vrot.lane.b32.xlu1 %v3055_v59, %s6555_s22  ;;  %v3456_v63 = vsel %vm8983_vm3, %v3453_v9, %v3455_v28  ;;  %v3454_v43 = vsel %vm8983_vm3, %v3451_v29, %v3453_v9  ;;  %v3890_v59 = vrot.slane %v7702_v35, 2  ;;  %v9006_v29 = vrot.slane %v7693_v44, 2 }
 0x890   : > { %3457 = vrot.lane.b32.xlu0 %v3452_v34, %s6553_s30  ;;  %v9005_v34 = vrot.slane %v7702_v35, 1  ;;  %v3891_v9 = vsel %vm434_vm4, %v9006_v29, %v3890_v59 }
 0x892   : > { %3463 = vrot.lane.b32.xlu1 %v3455_v28, %s6553_s30  ;;  %v3874_v28 = vsel %vm8983_vm3, %v9005_v34, %v3873_v42 }
 0x894   : > { %3476 = vrot.lane.b32.xlu0 %v3471_v22, %s6554_s10  ;;  %v3892_v22 = vrot.slane %v7872_v39, 2 }
 0x896   : > { %3482 = vrot.lane.b32.xlu1 %v3474_v7, %s6554_s10  ;;  %v3893_v7 = vsel %vm434_vm4, %v3890_v59, %v3892_v22 }
 0x898   : > { %3461 = vrot.lane.b32.xlu0 %v3456_v63, %s6553_s30  ;;  %v3895_v63 = vpop.permute.xlu0 %3894 }
 0x89a   : > { %3459 = vrot.lane.b32.xlu1 %v3454_v43, %s6553_s30 }
 0x89c   : > { %3480 = vrot.lane.b32.xlu0 %v3475_v49, %s6554_s10 }
 0x89e   : > { %3478 = vrot.lane.b32.xlu1 %v3473_v61, %s6554_s10 }
 0x8a0   : > { %3879 = vrot.lane.b32.xlu0 %v3874_v28, %s6552_s29 }
 0x8a2   : > { %3896 = vrot.lane.b32.xlu1 %v3891_v9, %s6553_s30 }
 0x8a4   : > { %3898 = vrot.lane.b32.xlu0 %v3893_v7, %s6553_s30 }
 0x8a6   : > { %3881 = vrot.lane.b32.xlu1 %v3873_v42, %s6552_s29 }
 0x8aa   : > { %3900 = vrot.lane.b32.xlu1 %v3892_v22, %s6553_s30 }
 0x8f2   : > { %v3040_v43 = vpop.permute.xlu0 %3039 }
 0x8f3   : > { %v3070_v61 = vsel %vm622_vm8, %v7777_v33, %v3040_v43 }
 0x8f4   : > { %v3046_v49 = vpop.permute.xlu1 %3045 }
 0x8f6   : > { %v3059_v34 = vpop.permute.xlu0 %3058 }
 0x8f7   : > { %v3074_v28 = vsel %vm781_vm10, %v3070_v61, %v3059_v34  ;;  %v3073_v61 = vsel %vm622_vm8, %v7790_v38, %v3046_v49 }
 0x8f8   : > { %v3065_v59 = vpop.permute.xlu1 %3064  ;;  %6001 = vmatprep.mubr.msk.f32.mxu1 %vm792_vm11, %v3074_v28 }
 0x8fa   : > { %v3044_v29 = vpop.permute.xlu0 %3043 }
 0x8fb   : > { %v3072_v53 = vsel %vm622_vm8, %v7797_v51, %v3044_v29 }
 0x8fc   : > { %v3042_v9 = vpop.permute.xlu1 %3041 }
 0x8fd   : > { %v3071_v42 = vsel %vm622_vm8, %v7775_v32, %v3042_v9  ;;  %v3077_v32 = vsel %vm781_vm10, %v3073_v61, %v3065_v59 }
 0x8fe   : > { %v3063_v7 = vpop.permute.xlu0 %3062 }
 0x8ff   : > { %v3076_v33 = vsel %vm781_vm10, %v3072_v53, %v3063_v7 }
 0x900   : > { %v3061_v22 = vpop.permute.xlu1 %3060 }
 0x901   : > { %v3075_v21 = vsel %vm781_vm10, %v3071_v42, %v3061_v22  ;;  %v3906_v22 = vsel %vm454_vm5, %v7690_v12, %v3876_v26  ;;  %v3907_v26 = vsel %vm454_vm5, %v7693_v44, %v3878_v54  ;;  %v7966_v54 = vld [vmem:[%s6657_s28 + $0xe8] sm:$0xff] }
 0x902   : > { %6002 = vmatmul.mubr.msk.f32.vlgmr.msra.gmra.mrb[28].mxu1 %vm792_vm11, %v3075_v21  ;;  %v3458_v43 = vpop.permute.xlu0 %3457  ;;  %v3910_v61 = vsel %vm459_vm6, %v3906_v22, %v3895_v63 }
 0x903   : > { %6004 = vmatprep.mubr.msk.f32.mxu1 %vm792_vm11, %v3076_v33  ;;  %6284 = vmatpush3.bf16.msra.mxu1 %v6725_v60  ;;  %v3488_v51 = vsel %vm459_vm6, %v7831_v31, %v3458_v43 }
 0x904   : > { %v3464_v34 = vpop.permute.xlu1 %3463  ;;  %6021 = vmatprep.subr.mxu1 %v7406_v41 }
 0x906   : > { %6005 = vmatmul.mubr.msk.f32.gmra.mrb[30].mxu1 %vm792_vm11, %v3077_v32  ;;  %v3477_v53 = vpop.permute.xlu0 %3476 }
 0x907   : > { %v3492_v21 = vsel %vm622_vm8, %v3488_v51, %v3477_v53  ;;  %6022 = vmatpush3.msra.mxu1 %v7406_v41  ;;  %v4438_v53 = vrot.slane %v7966_v54, 1 }
 0x908   : > { %v3483_v28 = vpop.permute.xlu1 %3482  ;;  %6023 = vmatprep.mubr.msk.f32.mxu1 %vm633_vm9, %v3492_v21  ;;  %6299 = vmatprep.subr.msk.bf16.mxu1 %vm6644_vm2, %v6641_v3 }
 0x90a   : > { %v3462_v38 = vpop.permute.xlu0 %3461 }
 0x90b   : > { %v3490_v9 = vsel %vm459_vm6, %v7863_v55, %v3462_v38  ;;  %v8963_v38 = vrot.slane %v7966_v54, 2 }
 0x90c   : > { %v3460_v49 = vpop.permute.xlu1 %3459 }
 0x90d   : > { %v3489_v31 = vsel %vm459_vm6, %v7829_v23, %v3460_v49  ;;  %v3491_v23 = vsel %vm459_vm6, %v7852_v14, %v3464_v34  ;;  %v7975_v49 = vld [vmem:[%s6657_s28 + $0xf0] sm:$0xff] }
 0x90e   : > { %v3481_v59 = vpop.permute.xlu0 %3480  ;;  %v3495_v33 = vsel %vm622_vm8, %v3491_v23, %v3483_v28 }
 0x90f   : > { %v3494_v41 = vsel %vm622_vm8, %v3490_v9, %v3481_v59 }
 0x910   : > { %v3479_v29 = vpop.permute.xlu1 %3478 }
 0x911   : > { %v3493_v7 = vsel %vm622_vm8, %v3489_v31, %v3479_v29  ;;  %v8964_v31 = vrot.slane %v7975_v49, 1 }
 0x912   : > { %6024 = vmatmul.mubr.msk.f32.vlgmr.msra.gmra.mrb[32].mxu1 %vm633_vm9, %v3493_v7  ;;  %v3880_v42 = vpop.permute.xlu0 %3879 }
 0x913   : > { %6026 = vmatprep.mubr.msk.f32.mxu1 %vm633_vm9, %v3494_v41  ;;  %6302 = vmatpush3.bf16.msk.msra.mxu1 %vm6644_vm2, %v6641_v3  ;;  %v3908_v43 = vsel %vm454_vm5, %v7702_v35, %v3880_v42  ;;  %v4441_v29 = vsel %vm8983_vm3, %v4438_v53, %v8964_v31 }
 0x914   : > { %v3897_v55 = vpop.permute.xlu1 %3896  ;;  %6308 = vmatprep.subr.bf16.mxu1 %v6877_v45  ;;  %4446 = vrot.lane.b32.xlu1 %v4441_v29, %s6552_s29 }
 0x915   : > { %v3911_v32 = vsel %vm459_vm6, %v3907_v26, %v3897_v55 }
 0x916   : > { %6027 = vmatmul.mubr.msk.f32.gmra.mrb[34].mxu1 %vm633_vm9, %v3495_v33  ;;  %v3899_v12 = vpop.permute.xlu0 %3898 }
 0x917   : > { %6051 = vmatprep.mubr.msk.f32.mxu1 %vm470_vm7, %v3910_v61  ;;  %v3912_v34 = vsel %vm459_vm6, %v3908_v43, %v3899_v12 }
 0x918   : > { %v3882_v14 = vpop.permute.xlu1 %3881 }
 0x919   : > { %v3909_v35 = vsel %vm454_vm5, %v7872_v39, %v3882_v14  ;;  %v7963_v39 = vld [vmem:[%s6657_s28 + $0xe0] sm:$0xff] }
 0x91a   : > { %6052 = vmatmul.mubr.msk.f32.vlgmr.msra.gmra.mrb[36].mxu1 %vm470_vm7, %v3911_v32  ;;  %v4437_v51 = vrot.slane %v7963_v39, 1  ;;  %v4456_v28 = vrot.slane %v7963_v39, 2 }
 0x91b   : > { %6054 = vmatprep.mubr.msk.f32.mxu1 %vm470_vm7, %v3912_v34  ;;  %6310 = vmatpush3.bf16.msra.mxu1 %v6877_v45 }
 0x91c   : > { %v3901_v63 = vpop.permute.xlu1 %3900  ;;  %6312 = vmatprep.subr.bf16.mxu1 %v6896_v56  ;;  %v4439_v21 = vsel %vm8983_vm3, %v4437_v51, %v4438_v53  ;;  %v4458_v59 = vsel %vm434_vm4, %v4456_v28, %v8963_v38 }
 0x91d   : > { %v3913_v44 = vsel %vm459_vm6, %v3909_v35, %v3901_v63  ;;  %4444 = vrot.lane.b32.xlu0 %v4439_v21, %s6552_s29 }
 0x91e   : > { %6055 = vmatmul.mubr.msk.f32.gmra.mrb[38].mxu1 %vm470_vm7, %v3913_v44 }
 0x91f   : > { %6314 = vmatpush3.bf16.msra.mxu1 %v6896_v56 }
 0x920   : > { %6316 = vmatprep.subr.bf16.mxu1 %v6917_v1 }
 0x921   : > { %4463 = vrot.lane.b32.xlu0 %v4458_v59, %s6553_s30 }
 0x923   : > { %6318 = vmatpush3.bf16.msra.mxu1 %v6917_v1 }
 0x924   : > { %6326 = vmatprep.subr.bf16.mxu1 %v6725_v60 }
 0x9d5   : > { %v6003_v9 = vpop.f32.mrb[28].mxu1 }
 0x9d6   : > { %v3162_v7 = vadd.f32 %v7725_v18, %v6003_v9  ;;  %v3156_v41 = vpop.f32.mrb[29].mxu1 }
 0x9d7   : > { %v3157_v42 = vadd.f32 %v7725_v18, %v3156_v41 }
 0x9d8   : > { %v7988_v22 = vmax.f32 %v3162_v7, 0.0 }
 0x9d9   : > { %v7990_v23 = vmax.f32 %v3157_v42, 0.0  ;;  %v6006_v55 = vpop.f32.mrb[30].mxu1 }
 0x9da   : > { %9007 = vst [vmem:[#allocation21_spill] sm:$0xff] %v7988_v22  ;;  %v3201_v33 = vsel %vm894_vm12, %v7988_v22, -inf  ;;  %v3216_v43 = vsel %vm910_vm15, %v7988_v22, -inf  ;;  %v3166_v61 = vpop.f32.mrb[31].mxu1  ;;  %v3172_v53 = vadd.f32 %v7725_v18, %v6006_v55  ;;  %v3223_v41 = vsel %vm918_vm13, %v7988_v22, -inf }
 0x9db   : > { %9008 = vst [vmem:[#allocation22_spill] sm:$0xff] %v7990_v23  ;;  %v3217_v12 = vrot.slane %v3216_v43, 4  ;;  %v3186_v26 = vsel %vm902_vm1, %v7990_v23, -inf  ;;  %v3193_v34 = vsel %vm910_vm15, %v7990_v23, -inf  ;;  %v3200_v32 = vsel %vm918_vm13, %v7990_v23, -inf }
 0x9dc   : > { %v3187_v14 = vrot.slane %v3186_v26, 4  ;;  %v3194_v63 = vrot.slane %v3193_v34, 4  ;;  %v3202_v44 = vmax.f32 %v3200_v32, %v3201_v33  ;;  %v3167_v21 = vadd.f32 %v7725_v18, %v3166_v61 }
 0x9dd   : > { %v3218_v35 = vmax.f32 %v3216_v43, %v3217_v12  ;;  %v3178_v29 = vmax.f32 %v3172_v53, 0.0 }
 0x9de   : > { %v3188_v51 = vmax.f32 %v3186_v26, %v3187_v14  ;;  %v3195_v28 = vmax.f32 %v3193_v34, %v3194_v63  ;;  %v3203_v59 = vrot.slane %v3202_v44, 4  ;;  %v8004_v9 = vmax.f32 %v3167_v21, 0.0 }
 0x9df   : > { %v3219_v7 = vrot.slane %v3218_v35, 2  ;;  %v3247_v43 = vsel %vm968_vm14, %v3178_v29, -inf }
 0x9e0   : > { %9009 = vst [vmem:[#allocation23_spill] sm:$0xff] %v8004_v9  ;;  %v3189_v42 = vrot.slane %v3188_v51, 2  ;;  %v3196_v38 = vrot.slane %v3195_v28, 2  ;;  %v3224_v33 = vsel %vm894_vm12, %v8004_v9, -inf  ;;  %v3232_v55 = vsel %vm928_vm0, %v8004_v9, -inf }
 0x9e1   : > { %v3225_v61 = vmax.f32 %v3223_v41, %v3224_v33  ;;  %v3233_v12 = vrot.slane %v3232_v55, 4  ;;  %v3246_v26 = vsel %vm918_vm13, %v8004_v9, -inf  ;;  %v3204_v14 = vmax.f32 %v3202_v44, %v3203_v59 }
 0x9e2   : > { %v8015_v34 = vmax.f32 %v3246_v26, %v3247_v43  ;;  %v3190_v21 = vmax.f32 %v3188_v51, %v3189_v42  ;;  %v3220_v31 = vmax.f32 %v3218_v35, %v3219_v7  ;;  %v3197_v22 = vmax.f32 %v3195_v28, %v3196_v38  ;;  %v8029_v38 = vld [vmem:[%s8938_s4] ss:$0 sm:$0xff] }
 0x9e3   : > { %v3226_v32 = vrot.slane %v3225_v61, 4  ;;  %v3234_v63 = vmax.f32 %v3232_v55, %v3233_v12  ;;  %v3205_v44 = vrot.slane %v3204_v14, 2 }
 0x9e4   : > { %9010 = vst [vmem:[#allocation24_spill] sm:$0xff] %v8015_v34  ;;  %v3191_v33 = vrot.slane %v3190_v21, 1  ;;  %v3221_v9 = vrot.slane %v3220_v31, 1  ;;  %v3198_v12 = vrot.slane %v3197_v22, 1 }
 0x9e5   : > { %v6025_v53 = vpop.f32.mrb[32].mxu1  ;;  %v3227_v6 = vmax.f32 %v3225_v61, %v3226_v32  ;;  %v3235_v57 = vrot.slane %v3234_v63, 2 }
 0x9e6   : > { %v3580_v29 = vadd.f32 %v7519_v17, %v6025_v53  ;;  %v3574_v23 = vpop.f32.mrb[33].mxu1  ;;  %v8023_v55 = vmax.f32 %v3190_v21, %v3191_v33  ;;  %v8032_v28 = vmax.f32 %v3220_v31, %v3221_v9  ;;  %v3206_v21 = vmax.f32 %v3204_v14, %v3205_v44 }
 0x9e7   : > { %v3575_v41 = vadd.f32 %v7519_v17, %v3574_v23  ;;  %v3228_v51 = vrot.slane %v3227_v6, 2  ;;  %v3236_v7 = vmax.f32 %v3234_v63, %v3235_v57 }
 0x9e8   : > { %v8019_v52 = vmax.f32 %v3580_v29, 0.0  ;;  %v3207_v44 = vrot.slane %v3206_v21, 1 }
 0x9e9   : > { %v8021_v59 = vmax.f32 %v3575_v41, 0.0  ;;  %v6028_v43 = vpop.f32.mrb[34].mxu1  ;;  %v3229_v53 = vmax.f32 %v3227_v6, %v3228_v51  ;;  %v8048_v6 = vmax.f32 %v3197_v22, %v3198_v12 }
 0x9ea   : > { %v3602_v35 = vrot.slane %v8019_v52, 1  ;;  %v3590_v17 = vadd.f32 %v8029_v38, %v6028_v43  ;;  %v3584_v23 = vpop.f32.mrb[35].mxu1  ;;  %v3621_v29 = vrot.slane %v8019_v52, 2  ;;  %v8063_v12 = vmax.f32 %v3206_v21, %v3207_v44 }
 0x9eb   : > { %v3601_v42 = vrot.slane %v8021_v59, 1  ;;  %v3585_v61 = vadd.f32 %v8029_v38, %v3584_v23  ;;  %v3620_v41 = vrot.slane %v8021_v59, 2  ;;  %v3230_v43 = vrot.slane %v3229_v53, 1 }
 0x9ec   : > { %v8036_v26 = vmax.f32 %v3590_v17, 0.0  ;;  %v3237_v17 = vrot.slane %v3236_v7, 1 }
 0x9ed   : > { %v8042_v33 = vmax.f32 %v3585_v61, 0.0  ;;  %v6053_v31 = vpop.f32.mrb[36].mxu1  ;;  %v3603_v57 = vsel %vm8983_vm3, %v3601_v42, %v3602_v35  ;;  %v8050_v14 = vmax.f32 %v3229_v53, %v3230_v43  ;;  %v3622_v32 = vsel %vm434_vm4, %v3620_v41, %v3621_v29 }
 0x9ee   : > { %v3606_v9 = vrot.slane %v8036_v26, 1  ;;  %3608 = vrot.lane.b32.xlu0 %v3603_v57, %s6554_s10  ;;  %v3992_v63 = vpop.f32.mrb[37].mxu1  ;;  %v3998_v23 = vadd.f32 %v7837_v16, %v6053_v31  ;;  %v3625_v57 = vrot.slane %v8036_v26, 2  ;;  %v8058_v62 = vmax.f32 %v3236_v7, %v3237_v17 }
 0x9ef   : > { %v3604_v51 = vrot.slane %v8042_v33, 1  ;;  %v3993_v42 = vadd.f32 %v7837_v16, %v3992_v63  ;;  %v3623_v53 = vrot.slane %v8042_v33, 2 }
 0x9f0   : > { %3614 = vrot.lane.b32.xlu1 %v3606_v9, %s6554_s10  ;;  %9011 = vst [vmem:[#allocation25_spill] sm:$0xff] %v8058_v62  ;;  %v8066_v31 = vmax.f32 %v3998_v23, 0.0 }
 0x9f1   : > { %v6056_v61 = vpop.f32.mrb[38].mxu1  ;;  %v8068_v63 = vmax.f32 %v3993_v42, 0.0  ;;  %v3607_v41 = vsel %vm8983_vm3, %v3604_v51, %v3606_v9  ;;  %v3605_v43 = vsel %vm8983_vm3, %v3602_v35, %v3604_v51  ;;  %v3626_v44 = vsel %vm434_vm4, %v3623_v53, %v3625_v57 }
 0x9f2   : > { %3627 = vrot.lane.b32.xlu0 %v3622_v32, %s6555_s22  ;;  %v4002_v34 = vpop.f32.mrb[39].mxu1  ;;  %v4008_v32 = vadd.f32 %v7837_v16, %v6056_v61  ;;  %v4020_v21 = vrot.slane %v8066_v31, 1  ;;  %v3624_v42 = vsel %vm434_vm4, %v3621_v29, %v3623_v53  ;;  %v4039_v35 = vrot.slane %v8066_v31, 2 }
 0x9f3   : > { %v4019_v17 = vrot.slane %v8068_v63, 1  ;;  %v4003_v9 = vadd.f32 %v7837_v16, %v4002_v34  ;;  %v4038_v51 = vrot.slane %v8068_v63, 2 }
 0x9f4   : > { %3633 = vrot.lane.b32.xlu1 %v3625_v57, %s6555_s22  ;;  %v8080_v23 = vmax.f32 %v4008_v32, 0.0  ;;  %v8100_v32 = vld [vmem:[%s6657_s28 + $0xf8] sm:$0xff] }
 0x9f5   : > { %v4021_v61 = vsel %vm8983_vm3, %v4019_v17, %v4020_v21  ;;  %v8091_v57 = vmax.f32 %v4003_v9, 0.0  ;;  %v4040_v34 = vsel %vm434_vm4, %v4038_v51, %v4039_v35  ;;  %v4442_v9 = vrot.slane %v8100_v32, 1 }
 0x9f6   : > { %3612 = vrot.lane.b32.xlu0 %v3607_v41, %s6554_s10  ;;  %v4024_v41 = vrot.slane %v8080_v23, 1  ;;  %v4043_v29 = vrot.slane %v8080_v23, 2  ;;  %v4459_v51 = vrot.slane %v7975_v49, 2 }
 0x9f7   : > { %v4022_v53 = vrot.slane %v8091_v57, 1  ;;  %v4041_v17 = vrot.slane %v8091_v57, 2 }
 0x9f8   : > { %3610 = vrot.lane.b32.xlu1 %v3605_v43, %s6554_s10 }
 0x9f9   : > { %v4025_v43 = vsel %vm8983_vm3, %v4022_v53, %v4024_v41 }
 0x9fa   : > { %3631 = vrot.lane.b32.xlu0 %v3626_v44, %s6555_s22  ;;  %v4023_v44 = vsel %vm8983_vm3, %v4020_v21, %v4022_v53  ;;  %v9013_v21 = vrot.slane %v7966_v54, 2 }
 0x9fc   : > { %3629 = vrot.lane.b32.xlu1 %v3624_v42, %s6555_s22  ;;  %v4044_v42 = vsel %vm434_vm4, %v4041_v17, %v4043_v29  ;;  %v4460_v53 = vsel %vm434_vm4, %v9013_v21, %v4459_v51 }
 0x9fe   : > { %4026 = vrot.lane.b32.xlu0 %v4021_v61, %s6553_s30  ;;  %v4042_v61 = vsel %vm434_vm4, %v4039_v35, %v4041_v17  ;;  %v4445_v35 = vpop.permute.xlu0 %4444 }
 0xa00   : > { %4032 = vrot.lane.b32.xlu1 %v4024_v41, %s6553_s30  ;;  %v9012_v41 = vrot.slane %v7975_v49, 1 }
 0xa02   : > { %4045 = vrot.lane.b32.xlu0 %v4040_v34, %s6554_s10  ;;  %v4443_v34 = vsel %vm8983_vm3, %v9012_v41, %v4442_v9  ;;  %v4464_v17 = vpop.permute.xlu0 %4463 }
 0xa04   : > { %4051 = vrot.lane.b32.xlu1 %v4043_v29, %s6554_s10 }
 0xa06   : > { %4030 = vrot.lane.b32.xlu0 %v4025_v43, %s6553_s30  ;;  %v4461_v43 = vrot.slane %v8100_v32, 2 }
 0xa08   : > { %4028 = vrot.lane.b32.xlu1 %v4023_v44, %s6553_s30  ;;  %v4462_v29 = vsel %vm434_vm4, %v4459_v51, %v4461_v43  ;;  %v4447_v44 = vpop.permute.xlu1 %4446 }
 0xa0a   : > { %4049 = vrot.lane.b32.xlu0 %v4044_v42, %s6554_s10 }
 0xa0c   : > { %4047 = vrot.lane.b32.xlu1 %v4042_v61, %s6554_s10 }
 0xa0e   : > { %4448 = vrot.lane.b32.xlu0 %v4443_v34, %s6552_s29 }
 0xa10   : > { %4465 = vrot.lane.b32.xlu1 %v4460_v53, %s6553_s30 }
 0xa12   : > { %4467 = vrot.lane.b32.xlu0 %v4462_v29, %s6553_s30 }
 0xa14   : > { %4450 = vrot.lane.b32.xlu1 %v4442_v9, %s6552_s29 }
 0xa18   : > { %4469 = vrot.lane.b32.xlu1 %v4461_v43, %s6553_s30 }
 0xa60   : > { %v3609_v42 = vpop.permute.xlu0 %3608 }
 0xa61   : > { %v3639_v41 = vsel %vm622_vm8, %v8021_v59, %v3609_v42 }
 0xa62   : > { %v3615_v61 = vpop.permute.xlu1 %3614 }
 0xa64   : > { %v3628_v21 = vpop.permute.xlu0 %3627 }
 0xa65   : > { %v3643_v34 = vsel %vm781_vm10, %v3639_v41, %v3628_v21  ;;  %v3642_v41 = vsel %vm622_vm8, %v8036_v26, %v3615_v61 }
 0xa66   : > { %v3634_v51 = vpop.permute.xlu1 %3633  ;;  %6041 = vmatprep.mubr.msk.f32.mxu0 %vm792_vm11, %v3643_v34 }
 0xa68   : > { %v3613_v53 = vpop.permute.xlu0 %3612 }
 0xa69   : > { %v3641_v22 = vsel %vm622_vm8, %v8042_v33, %v3613_v53  ;;  %v3646_v33 = vsel %vm781_vm10, %v3642_v41, %v3634_v51 }
 0xa6a   : > { %v3611_v29 = vpop.permute.xlu1 %3610 }
 0xa6b   : > { %v3640_v9 = vsel %vm622_vm8, %v8019_v52, %v3611_v29  ;;  %v8144_v52 = vld [vmem:[%s8937_s3 + $0x10] sm:$0xff] }
 0xa6c   : > { %v3632_v7 = vpop.permute.xlu0 %3631 }
 0xa6d   : > { %v3645_v59 = vsel %vm781_vm10, %v3641_v22, %v3632_v7 }
 0xa6e   : > { %v3630_v43 = vpop.permute.xlu1 %3629 }
 0xa6f   : > { %v3644_v62 = vsel %vm781_vm10, %v3640_v9, %v3630_v43 }
 0xa70   : > { %6042 = vmatmul.mubr.msk.f32.vlgmr.msra.gmra.mrb[32].mxu0 %vm792_vm11, %v3644_v62  ;;  %v4027_v42 = vpop.permute.xlu0 %4026 }
 0xa71   : > { %6044 = vmatprep.mubr.msk.f32.mxu0 %vm792_vm11, %v3645_v59  ;;  %6306 = vmatpush3.bf16.msra.mxu0 %v6725_v60  ;;  %v4057_v62 = vsel %vm459_vm6, %v8068_v63, %v4027_v42  ;;  %v4475_v42 = vsel %vm454_vm5, %v7963_v39, %v4445_v35 }
 0xa72   : > { %v4033_v21 = vpop.permute.xlu1 %4032  ;;  %6061 = vmatprep.subr.mxu0 %v8144_v52 }
 0xa74   : > { %6045 = vmatmul.mubr.msk.f32.gmra.mrb[34].mxu0 %vm792_vm11, %v3646_v33  ;;  %v4046_v22 = vpop.permute.xlu0 %4045 }
 0xa75   : > { %v4061_v7 = vsel %vm622_vm8, %v4057_v62, %v4046_v22  ;;  %6062 = vmatpush3.msra.mxu0 %v8144_v52  ;;  %v4479_v62 = vsel %vm459_vm6, %v4475_v42, %v4464_v17 }
 0xa76   : > { %v4052_v26 = vpop.permute.xlu1 %4051  ;;  %6063 = vmatprep.mubr.msk.f32.mxu0 %vm633_vm9, %v4061_v7  ;;  %6321 = vmatprep.subr.msk.bf16.mxu0 %vm6644_vm2, %v6641_v3 }
 0xa78   : > { %v4031_v61 = vpop.permute.xlu0 %4030 }
 0xa79   : > { %v4059_v29 = vsel %vm459_vm6, %v8091_v57, %v4031_v61 }
 0xa7a   : > { %v4029_v34 = vpop.permute.xlu1 %4028 }
 0xa7b   : > { %v4058_v63 = vsel %vm459_vm6, %v8066_v31, %v4029_v34  ;;  %v4060_v31 = vsel %vm459_vm6, %v8080_v23, %v4033_v21 }
 0xa7c   : > { %v4050_v51 = vpop.permute.xlu0 %4049  ;;  %v4064_v41 = vsel %vm622_vm8, %v4060_v31, %v4052_v26 }
 0xa7d   : > { %v4063_v43 = vsel %vm622_vm8, %v4059_v29, %v4050_v51 }
 0xa7e   : > { %v4048_v53 = vpop.permute.xlu1 %4047 }
 0xa7f   : > { %v4062_v9 = vsel %vm622_vm8, %v4058_v63, %v4048_v53 }
 0xa80   : > { %6064 = vmatmul.mubr.msk.f32.vlgmr.msra.gmra.mrb[36].mxu0 %vm633_vm9, %v4062_v9  ;;  %v4449_v59 = vpop.permute.xlu0 %4448 }
 0xa81   : > { %6066 = vmatprep.mubr.msk.f32.mxu0 %vm633_vm9, %v4063_v43  ;;  %6324 = vmatpush3.bf16.msk.msra.mxu0 %vm6644_vm2, %v6641_v3  ;;  %v4477_v33 = vsel %vm454_vm5, %v7975_v49, %v4449_v59  ;;  %v4476_v3 = vsel %vm454_vm5, %v7966_v54, %v4447_v44  ;;  %vm959_vm2 = vcmask 261124  }
 0xa82   : > { %v4466_v57 = vpop.permute.xlu1 %4465  ;;  %6330 = vmatprep.subr.bf16.mxu0 %v6877_v45 }
 0xa83   : > { %v4480_v35 = vsel %vm459_vm6, %v4476_v3, %v4466_v57 }
 0xa84   : > { %6067 = vmatmul.mubr.msk.f32.gmra.mrb[38].mxu0 %vm633_vm9, %v4064_v41  ;;  %v4468_v39 = vpop.permute.xlu0 %4467 }
 0xa85   : > { %6091 = vmatprep.mubr.msk.f32.mxu0 %vm470_vm7, %v4479_v62  ;;  %v4481_v23 = vsel %vm459_vm6, %v4477_v33, %v4468_v39 }
 0xa86   : > { %v4451_v4 = vpop.permute.xlu1 %4450 }
 0xa87   : > { %v4478_v21 = vsel %vm454_vm5, %v8100_v32, %v4451_v4  ;;  %vm1006_vm5 = vcmask 523264  }
 0xa88   : > { %6092 = vmatmul.mubr.msk.f32.vlgmr.msra.gmra.mrb[40].mxu0 %vm470_vm7, %v4480_v35 }
 0xa89   : > { %6094 = vmatprep.mubr.msk.f32.mxu0 %vm470_vm7, %v4481_v23  ;;  %6332 = vmatpush3.bf16.msra.mxu0 %v6877_v45 }
 0xa8a   : > { %v4470_v49 = vpop.permute.xlu1 %4469  ;;  %6334 = vmatprep.subr.bf16.mxu0 %v6896_v56 }
 0xa8b   : > { %v4482_v17 = vsel %vm459_vm6, %v4478_v21, %v4470_v49 }
 0xa8c   : > { %6095 = vmatmul.mubr.msk.f32.gmra.mrb[42].mxu0 %vm470_vm7, %v4482_v17  ;;  %vm5060_vm7 = vcmask 1040384  }
 0xa8d   : > { %6336 = vmatpush3.bf16.msra.mxu0 %v6896_v56 }
 0xa8e   : > { %6338 = vmatprep.subr.bf16.mxu0 %v6917_v1 }
 0xa91   : > { %6340 = vmatpush3.bf16.msra.mxu0 %v6917_v1 }
 0xb43   : > { %v6043_v54 = vpop.f32.mrb[32].mxu0 }
 0xb44   : > { %v3731_v32 = vadd.f32 %v7725_v18, %v6043_v54  ;;  %v3725_v44 = vpop.f32.mrb[33].mxu0 }
 0xb45   : > { %v3726_v22 = vadd.f32 %v7725_v18, %v3725_v44 }
 0xb46   : > { %v8196_v45 = vmax.f32 %v3731_v32, 0.0 }
 0xb47   : > { %v8198_v7 = vmax.f32 %v3726_v22, 0.0  ;;  %v6046_v26 = vpop.f32.mrb[34].mxu0 }
 0xb48   : > { %9014 = vst [vmem:[#allocation26_spill] sm:$0xff] %v8196_v45  ;;  %v3770_v61 = vsel %vm894_vm12, %v8196_v45, -inf  ;;  %v3785_v56 = vsel %vm910_vm15, %v8196_v45, -inf  ;;  %v3735_v34 = vpop.f32.mrb[35].mxu0  ;;  %v3741_v31 = vadd.f32 %v7725_v18, %v6046_v26  ;;  %v3792_v23 = vsel %vm918_vm13, %v8196_v45, -inf }
 0xb49   : > { %9015 = vst [vmem:[#allocation27_spill] sm:$0xff] %v8198_v7  ;;  %v3786_v51 = vrot.slane %v3785_v56, 4  ;;  %v3755_v1 = vsel %vm902_vm1, %v8198_v7, -inf  ;;  %v3762_v53 = vsel %vm910_vm15, %v8198_v7, -inf  ;;  %v3769_v29 = vsel %vm918_vm13, %v8198_v7, -inf }
 0xb4a   : > { %v3756_v63 = vrot.slane %v3755_v1, 4  ;;  %v3763_v43 = vrot.slane %v3762_v53, 4  ;;  %v3771_v59 = vmax.f32 %v3769_v29, %v3770_v61  ;;  %v3736_v57 = vadd.f32 %v7725_v18, %v3735_v34 }
 0xb4b   : > { %v3787_v9 = vmax.f32 %v3785_v56, %v3786_v51  ;;  %v3747_v3 = vmax.f32 %v3741_v31, 0.0 }
 0xb4c   : > { %v3757_v42 = vmax.f32 %v3755_v1, %v3756_v63  ;;  %v3772_v33 = vrot.slane %v3771_v59, 4  ;;  %v3764_v39 = vmax.f32 %v3762_v53, %v3763_v43  ;;  %v8212_v4 = vmax.f32 %v3736_v57, 0.0 }
 0xb4d   : > { %v3788_v41 = vrot.slane %v3787_v9, 2  ;;  %v3816_v49 = vsel %vm968_vm14, %v3747_v3, -inf }
 0xb4e   : > { %v3758_v62 = vrot.slane %v3757_v42, 2  ;;  %9016 = vst [vmem:[#allocation28_spill] sm:$0xff] %v8212_v4  ;;  %v3773_v21 = vmax.f32 %v3771_v59, %v3772_v33  ;;  %v3793_v17 = vsel %vm894_vm12, %v8212_v4, -inf  ;;  %v3801_v18 = vsel %vm928_vm0, %v8212_v4, -inf }
 0xb4f   : > { %v3789_v35 = vmax.f32 %v3787_v9, %v3788_v41  ;;  %v3794_v54 = vmax.f32 %v3792_v23, %v3793_v17  ;;  %v3802_v32 = vrot.slane %v3801_v18, 4  ;;  %v3815_v44 = vsel %vm918_vm13, %v8212_v4, -inf }
 0xb50   : > { %v3765_v22 = vrot.slane %v3764_v39, 2  ;;  %v8223_v26 = vmax.f32 %v3815_v44, %v3816_v49  ;;  %v3759_v61 = vmax.f32 %v3757_v42, %v3758_v62  ;;  %v3774_v9 = vrot.slane %v3773_v21, 2 }
 0xb51   : > { %v3790_v56 = vrot.slane %v3789_v35, 1  ;;  %v3795_v34 = vrot.slane %v3794_v54, 4  ;;  %v3803_v51 = vmax.f32 %v3801_v18, %v3802_v32 }
 0xb52   : > { %v3760_v29 = vrot.slane %v3759_v61, 1  ;;  %v3766_v42 = vmax.f32 %v3764_v39, %v3765_v22 }
 0xb53   : > { %v6065_v1 = vpop.f32.mrb[36].mxu0  ;;  %v3796_v43 = vmax.f32 %v3794_v54, %v3795_v34  ;;  %v3804_v59 = vrot.slane %v3803_v51, 2  ;;  %v8227_v57 = vmax.f32 %v3789_v35, %v3790_v56  ;;  %v3775_v35 = vmax.f32 %v3773_v21, %v3774_v9 }
 0xb54   : > { %v4149_v63 = vadd.f32 %v8029_v38, %v6065_v1  ;;  %v4143_v53 = vpop.f32.mrb[37].mxu0  ;;  %v8231_v33 = vmax.f32 %v3759_v61, %v3760_v29  ;;  %v3767_v39 = vrot.slane %v3766_v42, 1 }
 0xb55   : > { %v4144_v31 = vadd.f32 %v8029_v38, %v4143_v53  ;;  %v3797_v23 = vrot.slane %v3796_v43, 2  ;;  %v3805_v49 = vmax.f32 %v3803_v51, %v3804_v59 }
 0xb56   : > { %v8229_v41 = vmax.f32 %v4149_v63, 0.0 }
 0xb57   : > { %v8233_v62 = vmax.f32 %v4144_v31, 0.0  ;;  %v6068_v3 = vpop.f32.mrb[38].mxu0  ;;  %v3798_v22 = vmax.f32 %v3796_v43, %v3797_v23  ;;  %v3806_v34 = vrot.slane %v3805_v49, 1  ;;  %v3776_v31 = vrot.slane %v3775_v35, 1 }
 0xb58   : > { %v4171_v17 = vrot.slane %v8229_v41, 1  ;;  %v4159_v18 = vadd.f32 %v8029_v38, %v6068_v3  ;;  %v4153_v54 = vpop.f32.mrb[39].mxu0  ;;  %v4190_v51 = vrot.slane %v8229_v41, 2  ;;  %v8251_v43 = vmax.f32 %v3766_v42, %v3767_v39 }
 0xb59   : > { %v4170_v44 = vrot.slane %v8233_v62, 1  ;;  %v4154_v61 = vadd.f32 %v8029_v38, %v4153_v54  ;;  %v4189_v1 = vrot.slane %v8233_v62, 2  ;;  %v3799_v59 = vrot.slane %v3798_v22, 1 }
 0xb5a   : > { %v8241_v56 = vmax.f32 %v4159_v18, 0.0  ;;  %v8255_v23 = vmax.f32 %v3805_v49, %v3806_v34  ;;  %v8263_v42 = vmax.f32 %v3775_v35, %v3776_v31 }
 0xb5b   : > { %v8245_v63 = vmax.f32 %v4154_v61, 0.0  ;;  %v6093_v53 = vpop.f32.mrb[40].mxu0  ;;  %v4172_v29 = vsel %vm8983_vm3, %v4170_v44, %v4171_v17  ;;  %v8253_v3 = vmax.f32 %v3798_v22, %v3799_v59 }
 0xb5c   : > { %v4175_v21 = vrot.slane %v8241_v56, 1  ;;  %4177 = vrot.lane.b32.xlu0 %v4172_v29, %s6554_s10  ;;  %v4561_v9 = vpop.f32.mrb[41].mxu0  ;;  %v4567_v54 = vadd.f32 %v7837_v16, %v6093_v53  ;;  %v4191_v29 = vsel %vm434_vm4, %v4189_v1, %v4190_v51  ;;  %v4194_v32 = vrot.slane %v8241_v56, 2 }
 0xb5d   : > { %v4173_v18 = vrot.slane %v8245_v63, 1  ;;  %v4562_v44 = vadd.f32 %v7837_v16, %v4561_v9  ;;  %v4192_v22 = vrot.slane %v8245_v63, 2 }
 0xb5e   : > { %4183 = vrot.lane.b32.xlu1 %v4175_v21, %s6554_s10  ;;  %v8271_v34 = vmax.f32 %v4567_v54, 0.0 }
 0xb5f   : > { %v6096_v61 = vpop.f32.mrb[42].mxu0  ;;  %v4580_v1 = vmax.f32 %v4562_v44, 0.0  ;;  %v4176_v53 = vsel %vm8983_vm3, %v4173_v18, %v4175_v21  ;;  %v4174_v59 = vsel %vm8983_vm3, %v4171_v17, %v4173_v18  ;;  %v4195_v39 = vsel %vm434_vm4, %v4192_v22, %v4194_v32 }
 0xb60   : > { %4196 = vrot.lane.b32.xlu0 %v4191_v29, %s6555_s22  ;;  %v4571_v4 = vpop.f32.mrb[43].mxu0  ;;  %v4577_v9 = vadd.f32 %v7837_v16, %v6096_v61  ;;  %v4589_v31 = vrot.slane %v8271_v34, 1  ;;  %v4193_v44 = vsel %vm434_vm4, %v4190_v51, %v4192_v22 }
 0xb61   : > { %v4572_v35 = vadd.f32 %v7837_v16, %v4571_v4  ;;  %v4588_v29 = vrot.slane %v4580_v1, 1  ;;  %v4608_v16 = vrot.slane %v8271_v34, 2  ;;  %v4607_v4 = vrot.slane %v4580_v1, 2 }
 0xb62   : > { %4202 = vrot.lane.b32.xlu1 %v4194_v32, %s6555_s22  ;;  %v8281_v54 = vmax.f32 %v4577_v9, 0.0 }
 0xb63   : > { %v4582_v21 = vmax.f32 %v4572_v35, 0.0  ;;  %v4590_v17 = vsel %vm8983_vm3, %v4588_v29, %v4589_v31  ;;  %v4609_v32 = vsel %vm434_vm4, %v4607_v4, %v4608_v16 }
 0xb64   : > { %4181 = vrot.lane.b32.xlu0 %v4176_v53, %s6554_s10  ;;  %v4593_v18 = vrot.slane %v8281_v54, 1  ;;  %v4612_v22 = vrot.slane %v8281_v54, 2 }
 0xb65   : > { %v4591_v61 = vrot.slane %v4582_v21, 1 }
 0xb66   : > { %4179 = vrot.lane.b32.xlu1 %v4174_v59, %s6554_s10 }
 0xb67   : > { %v4592_v51 = vsel %vm8983_vm3, %v4589_v31, %v4591_v61  ;;  %v4594_v53 = vsel %vm8983_vm3, %v4591_v61, %v4593_v18 }
 0xb68   : > { %4200 = vrot.lane.b32.xlu0 %v4195_v39, %s6555_s22  ;;  %v4610_v39 = vrot.slane %v4582_v21, 2 }
 0xb6a   : > { %4198 = vrot.lane.b32.xlu1 %v4193_v44, %s6555_s22  ;;  %v4611_v9 = vsel %vm434_vm4, %v4608_v16, %v4610_v39  ;;  %v4613_v35 = vsel %vm434_vm4, %v4610_v39, %v4612_v22 }
 0xb6c   : > { %4595 = vrot.lane.b32.xlu0 %v4590_v17, %s6553_s30 }
 0xb6e   : > { %4601 = vrot.lane.b32.xlu1 %v4593_v18, %s6553_s30 }
 0xb70   : > { %4614 = vrot.lane.b32.xlu0 %v4609_v32, %s6554_s10 }
 0xb72   : > { %4597 = vrot.lane.b32.xlu1 %v4592_v51, %s6553_s30 }
 0xb74   : > { %4599 = vrot.lane.b32.xlu0 %v4594_v53, %s6553_s30 }
 0xb76   : > { %4616 = vrot.lane.b32.xlu1 %v4611_v9, %s6554_s10 }
 0xb78   : > { %4618 = vrot.lane.b32.xlu0 %v4613_v35, %s6554_s10 }
 0xb7a   : > { %4620 = vrot.lane.b32.xlu1 %v4612_v22, %s6554_s10 }
 0xbce   : > { %v4178_v59 = vpop.permute.xlu0 %4177 }
 0xbcf   : > { %v4208_v29 = vsel %vm622_vm8, %v8233_v62, %v4178_v59 }
 0xbd0   : > { %v4184_v31 = vpop.permute.xlu1 %4183 }
 0xbd1   : > { %v4211_v9 = vsel %vm622_vm8, %v8241_v56, %v4184_v31 }
 0xbd2   : > { %v4197_v44 = vpop.permute.xlu0 %4196 }
 0xbd3   : > { %v4212_v4 = vsel %vm781_vm10, %v4208_v29, %v4197_v44 }
 0xbd4   : > { %v4203_v17 = vpop.permute.xlu1 %4202  ;;  %6081 = vmatprep.mubr.msk.f32.mxu1 %vm792_vm11, %v4212_v4 }
 0xbd6   : > { %v4182_v16 = vpop.permute.xlu0 %4181 }
 0xbd7   : > { %v4210_v51 = vsel %vm622_vm8, %v8245_v63, %v4182_v16 }
 0xbd8   : > { %v4180_v18 = vpop.permute.xlu1 %4179 }
 0xbd9   : > { %v4209_v32 = vsel %vm622_vm8, %v8229_v41, %v4180_v18  ;;  %v4215_v41 = vsel %vm781_vm10, %v4211_v9, %v4203_v17 }
 0xbda   : > { %v4201_v61 = vpop.permute.xlu0 %4200 }
 0xbdb   : > { %v4214_v62 = vsel %vm781_vm10, %v4210_v51, %v4201_v61 }
 0xbdc   : > { %v4199_v39 = vpop.permute.xlu1 %4198 }
 0xbdd   : > { %v4213_v22 = vsel %vm781_vm10, %v4209_v32, %v4199_v39 }
 0xbde   : > { %6082 = vmatmul.mubr.msk.f32.vlgmr.msra.gmra.mrb[40].mxu1 %vm792_vm11, %v4213_v22  ;;  %v4596_v53 = vpop.permute.xlu0 %4595 }
 0xbdf   : > { %6084 = vmatprep.mubr.msk.f32.mxu1 %vm792_vm11, %v4214_v62  ;;  %6328 = vmatpush3.bf16.msra.mxu1 %v6725_v60  ;;  %v4626_v63 = vsel %vm459_vm6, %v4580_v1, %v4596_v53 }
 0xbe0   : > { %v4602_v35 = vpop.permute.xlu1 %4601  ;;  %6101 = vmatprep.subr.mxu1 %v8144_v52 }
 0xbe2   : > { %6085 = vmatmul.mubr.msk.f32.gmra.mrb[42].mxu1 %vm792_vm11, %v4215_v41  ;;  %v4615_v59 = vpop.permute.xlu0 %4614 }
 0xbe3   : > { %v4630_v29 = vsel %vm622_vm8, %v4626_v63, %v4615_v59  ;;  %6102 = vmatpush3.msra.mxu1 %v8144_v52  ;;  %v4629_v52 = vsel %vm459_vm6, %v8281_v54, %v4602_v35 }
 0xbe4   : > { %v4598_v44 = vpop.permute.xlu1 %4597  ;;  %6103 = vmatprep.mubr.msk.f32.mxu1 %vm633_vm9, %v4630_v29 }
 0xbe5   : > { %v4627_v56 = vsel %vm459_vm6, %v8271_v34, %v4598_v44 }
 0xbe6   : > { %v4600_v60 = vpop.permute.xlu0 %4599 }
 0xbe7   : > { %v4628_v17 = vsel %vm459_vm6, %v4582_v21, %v4600_v60  ;;  %v8339_v21 = vld [vmem:[%s8940_s6] ss:$0 sm:$0xff]  ;;  %vm1008_vm6 = vcmask 785408  }
 0xbe8   : > { %v4617_v31 = vpop.permute.xlu1 %4616  ;;  %9017 = vst [vmem:[#allocation29_spill] sm:$0xff] %v8339_v21 }
 0xbe9   : > { %v4631_v4 = vsel %vm622_vm8, %v4627_v56, %v4617_v31 }
 0xbea   : > { %6104 = vmatmul.mubr.msk.f32.vlgmr.msra.gmra.mrb[44].mxu1 %vm633_vm9, %v4631_v4  ;;  %v4619_v1 = vpop.permute.xlu0 %4618 }
 0xbeb   : > { %v4632_v16 = vsel %vm622_vm8, %v4628_v17, %v4619_v1 }
 0xbec   : > { %v4621_v18 = vpop.permute.xlu1 %4620  ;;  %6106 = vmatprep.mubr.msk.f32.mxu1 %vm633_vm9, %v4632_v16 }
 0xbed   : > { %v4633_v61 = vsel %vm622_vm8, %v4629_v52, %v4621_v18 }
 0xbee   : > { %6107 = vmatmul.mubr.msk.f32.gmra.mrb[46].mxu1 %vm633_vm9, %v4633_v61  ;;  %vm5068_vm9 = vcmask 1042432  }
 0xcb1   : > { %v6083_v34 = vpop.f32.mrb[40].mxu1 }
 0xcb2   : > { %v4300_v32 = vadd.f32 %v8339_v21, %v6083_v34  ;;  %v4294_v39 = vpop.f32.mrb[41].mxu1 }
 0xcb3   : > { %v4295_v51 = vadd.f32 %v8339_v21, %v4294_v39 }
 0xcb4   : > { %v8343_v22 = vmax.f32 %v4300_v32, 0.0 }
 0xcb5   : > { %v8345_v54 = vmax.f32 %v4295_v51, 0.0  ;;  %v6086_v62 = vpop.f32.mrb[42].mxu1 }
 0xcb6   : > { %9018 = vst [vmem:[#allocation30_spill] sm:$0xff] %v8343_v22  ;;  %v4339_v53 = vsel %vm894_vm12, %v8343_v22, -inf  ;;  %v4354_v9 = vsel %vm910_vm15, %v8343_v22, -inf  ;;  %v4304_v35 = vpop.f32.mrb[43].mxu1  ;;  %v4310_v4 = vadd.f32 %v8339_v21, %v6086_v62  ;;  %v4361_v61 = vsel %vm918_vm13, %v8343_v22, -inf }
 0xcb7   : > { %9019 = vst [vmem:[#allocation31_spill] sm:$0xff] %v8345_v54  ;;  %v4355_v41 = vrot.slane %v4354_v9, 4  ;;  %v4324_v63 = vsel %vm902_vm1, %v8345_v54, -inf  ;;  %v4338_v29 = vsel %vm918_vm13, %v8345_v54, -inf  ;;  %v4331_v60 = vsel %vm910_vm15, %v8345_v54, -inf }
 0xcb8   : > { %v4325_v59 = vrot.slane %v4324_v63, 4  ;;  %v4340_v56 = vmax.f32 %v4338_v29, %v4339_v53  ;;  %v4305_v17 = vadd.f32 %v8339_v21, %v4304_v35  ;;  %v4332_v16 = vrot.slane %v4331_v60, 4 }
 0xcb9   : > { %v4356_v44 = vmax.f32 %v4354_v9, %v4355_v41  ;;  %v4316_v52 = vmax.f32 %v4310_v4, 0.0 }
 0xcba   : > { %v4326_v31 = vmax.f32 %v4324_v63, %v4325_v59  ;;  %v8359_v18 = vmax.f32 %v4305_v17, 0.0  ;;  %v4341_v32 = vrot.slane %v4340_v56, 4  ;;  %v4333_v29 = vmax.f32 %v4331_v60, %v4332_v16 }
 0xcbb   : > { %v4357_v1 = vrot.slane %v4356_v44, 2  ;;  %v4385_v51 = vsel %vm968_vm14, %v4316_v52, -inf }
 0xcbc   : > { %9020 = vst [vmem:[#allocation32_spill] sm:$0xff] %v8359_v18  ;;  %v4327_v34 = vrot.slane %v4326_v31, 2  ;;  %v4362_v53 = vsel %vm894_vm12, %v8359_v18, -inf  ;;  %v4370_v62 = vsel %vm928_vm0, %v8359_v18, -inf  ;;  %v4384_v59 = vsel %vm918_vm13, %v8359_v18, -inf }
 0xcbd   : > { %v6105_v39 = vpop.f32.mrb[44].mxu1  ;;  %v4358_v35 = vmax.f32 %v4356_v44, %v4357_v1  ;;  %v4363_v41 = vmax.f32 %v4361_v61, %v4362_v53  ;;  %v4371_v63 = vrot.slane %v4370_v62, 4  ;;  %v8370_v4 = vmax.f32 %v4384_v59, %v4385_v51 }
 0xcbe   : > { %v4712_v9 = vpop.f32.mrb[45].mxu1  ;;  %v4718_v17 = vadd.f32 %v8029_v38, %v6105_v39  ;;  %v4328_v54 = vmax.f32 %v4326_v31, %v4327_v34  ;;  %v4342_v22 = vmax.f32 %v4340_v56, %v4341_v32  ;;  %v4334_v51 = vrot.slane %v4333_v29, 2 }
 0xcbf   : > { %9021 = vst [vmem:[#allocation33_spill] sm:$0xff] %v8370_v4  ;;  %v4713_v52 = vadd.f32 %v8029_v38, %v4712_v9  ;;  %v4372_v49 = vmax.f32 %v4370_v62, %v4371_v63  ;;  %v4359_v1 = vrot.slane %v4358_v35, 1  ;;  %v4364_v61 = vrot.slane %v4363_v41, 4 }
 0xcc0   : > { %v8374_v7 = vmax.f32 %v4718_v17, 0.0  ;;  %v4329_v9 = vrot.slane %v4328_v54, 1 }
 0xcc1   : > { %v6108_v21 = vpop.f32.mrb[46].mxu1  ;;  %v8376_v45 = vmax.f32 %v4713_v52, 0.0  ;;  %v4373_v53 = vrot.slane %v4372_v49, 2  ;;  %v8389_v59 = vmax.f32 %v4358_v35, %v4359_v1  ;;  %v4365_v17 = vmax.f32 %v4363_v41, %v4364_v61 }
 0xcc2   : > { %v4722_v44 = vpop.f32.mrb[47].mxu1  ;;  %v4728_v60 = vadd.f32 %v8029_v38, %v6108_v21  ;;  %v4740_v39 = vrot.slane %v8374_v7, 1  ;;  %v4759_v62 = vrot.slane %v8374_v7, 2  ;;  %v4343_v21 = vrot.slane %v4342_v22, 2 }
 0xcc3   : > { %v4723_v16 = vadd.f32 %v8029_v38, %v4722_v44  ;;  %v4739_v31 = vrot.slane %v8376_v45, 1  ;;  %v4758_v56 = vrot.slane %v8376_v45, 2  ;;  %v4374_v38 = vmax.f32 %v4372_v49, %v4373_v53 }
 0xcc4   : > { %v8384_v34 = vmax.f32 %v4728_v60, 0.0  ;;  %v8394_v18 = vmax.f32 %v4328_v54, %v4329_v9  ;;  %v4344_v60 = vmax.f32 %v4342_v22, %v4343_v21  ;;  %v4366_v1 = vrot.slane %v4365_v17, 2 }
 0xcc5   : > { %v8386_v32 = vmax.f32 %v4723_v16, 0.0  ;;  %v4741_v63 = vsel %vm8983_vm3, %v4739_v31, %v4740_v39  ;;  %v4375_v4 = vrot.slane %v4374_v38, 1  ;;  %v4335_v16 = vmax.f32 %v4333_v29, %v4334_v51 }
 0xcc6   : > { %v4744_v52 = vrot.slane %v8384_v34, 1  ;;  %4746 = vrot.lane.b32.xlu0 %v4741_v63, %s6554_s10  ;;  %v4760_v31 = vsel %vm434_vm4, %v4758_v56, %v4759_v62  ;;  %v6500_v35 = vpack.i.bf16 %v8394_v18, %v8389_v59  ;;  %v4345_v49 = vrot.slane %v4344_v60, 1 }
 0xcc7   : > { %v4742_v44 = vrot.slane %v8386_v32, 1  ;;  %v8400_v41 = vmax.f32 %v4374_v38, %v4375_v4  ;;  %v4761_v61 = vrot.slane %v8386_v32, 2  ;;  %v4336_v29 = vrot.slane %v4335_v16, 1 }
 0xcc8   : > { %4752 = vrot.lane.b32.xlu1 %v4744_v52, %s6554_s10  ;;  %v8405_v22 = vmax.f32 %v4344_v60, %v4345_v49  ;;  %v4367_v53 = vmax.f32 %v4365_v17, %v4366_v1  ;;  %v4763_v51 = vrot.slane %v8384_v34, 2  ;;  %v9022_v38 = vpack.i.bf16 %v7285_v36, %v7289_v19  ;;  %v9041_v60 = vld [vmem:[#allocation19_spill] sm:$0xff] }
 0xcc9   : > { %v4743_v54 = vsel %vm8983_vm3, %v4740_v39, %v4742_v44  ;;  %v4745_v18 = vsel %vm8983_vm3, %v4742_v44, %v4744_v52  ;;  %v4762_v9 = vsel %vm434_vm4, %v4759_v62, %v4761_v61  ;;  %v4337_v39 = vmax.f32 %v4335_v16, %v4336_v29  ;;  %v9040_v44 = vld [vmem:[#allocation20_spill] sm:$0xff] }
 0xcca   : > { %4765 = vrot.lane.b32.xlu0 %v4760_v31, %s6555_s22  ;;  %v6510_v4 = vpack.i.bf16 %v8405_v22, %v8400_v41  ;;  %v4368_v56 = vrot.slane %v4367_v53, 1  ;;  %v4764_v59 = vsel %vm434_vm4, %v4761_v61, %v4763_v51  ;;  %v9023_v62 = vpack.i.bf16 %v7305_v2, %v7307_v8  ;;  %v9050_v22 = vld [vmem:[#allocation7_spill] sm:$0xff] }
 0xccb   : > { %v9024_v17 = vpack.i.bf16 %v7525_v47, %v7529_v13  ;;  %v9025_v52 = vpack.i.bf16 %v7325_v30, %v7320_v27  ;;  %v9026_v36 = vpack.i.bf16 %v7779_v20, %v7772_v48  ;;  %v9027_v19 = vpack.i.bf16 %v7547_v0, %v7549_v37  ;;  %v9032_v13 = vld [vmem:[#allocation12_spill] sm:$0xff]  ;;  %v9034_v20 = vld [vmem:[#allocation17_spill] sm:$0xff] }
 0xccc   : > { %4748 = vrot.lane.b32.xlu1 %v4743_v54, %s6554_s10  ;;  %v4369_v63 = vmax.f32 %v4367_v53, %v4368_v56  ;;  %v9028_v2 = vpack.i.bf16 %v7783_v11, %v7764_v10  ;;  %v9029_v8 = vpack.i.bf16 %v7811_v15, %v7809_v50  ;;  %v1542_v27 = vrot.slane %v7277_v25, 4  ;;  %v9037_v50 = vld [vmem:[#allocation16_spill] sm:$0xff] }
 0xccd   : > { %v9030_v30 = vpack.i.bf16 %v7559_v58, %v7551_v40  ;;  %v971_v48 = vrot.slane %v7140_v5, 4  ;;  %v9031_v47 = vpack.i.bf16 %v8023_v55, %v8032_v28  ;;  %v2111_v0 = vrot.slane %v9032_v13, 4  ;;  %v9035_v40 = vld [vmem:[#allocation18_spill] sm:$0xff] }
 0xcce   : > { %4750 = vrot.lane.b32.xlu0 %v4745_v18, %s6554_s10  ;;  %v6515_v21 = vpack.i.bf16 %v4337_v39, %v4369_v63  ;;  %s6556_s10 = smov 64   ;;  %v9033_v37 = vpack.i.bf16 %v7794_v24, %v7769_v46  ;;  %v1543_v10 = vmax.f32 %v7277_v25, %v1542_v27  ;;  %v9036_v58 = vpack.i.bf16 %v9034_v20, %v9035_v40  ;;  %v9051_v27 = vld [vmem:[#allocation6_spill] sm:$0xff] }
 0xccf   : > { %v972_v11 = vmax.f32 %v7140_v5, %v971_v48  ;;  %v2680_v15 = vrot.slane %v9037_v50, 4  ;;  %v9038_v55 = vpack.i.bf16 %v8048_v6, %v8050_v14  ;;  %v2112_v46 = vmax.f32 %v9032_v13, %v2111_v0  ;;  %v9043_v6 = vld [vmem:[#allocation25_spill] sm:$0xff] }
 0xcd0   : > { %4767 = vrot.lane.b32.xlu1 %v4762_v9, %s6555_s22  ;;  %v1544_v28 = vrot.slane %v1543_v10, 2  ;;  %v9039_v25 = vpack.i.bf16 %v8231_v33, %v8227_v57  ;;  %v9042_v5 = vpack.i.bf16 %v9040_v44, %v9041_v60  ;;  %v9044_v14 = vpack.i.bf16 %v8063_v12, %v9043_v6  ;;  %v9052_v48 = vld [vmem:[#allocation9_spill] sm:$0xff]  ;;  %v9056_v6 = vld [vmem:[#allocation14_spill] sm:$0xff] }
 0xcd1   : > { %v973_v24 = vrot.slane %v972_v11, 2  ;;  %v2113_v31 = vrot.slane %v2112_v46, 2  ;;  %v2681_v49 = vmax.f32 %v9037_v50, %v2680_v15  ;;  %v9045_v57 = vpack.i.bf16 %v8251_v43, %v8253_v3 }
 0xcd2   : > { %4769 = vrot.lane.b32.xlu0 %v4764_v59, %s6555_s22  ;;  %v1545_v16 = vmax.f32 %v1543_v10, %v1544_v28  ;;  %v3818_v53 = vrot.slane %v8223_v26, 4  ;;  %v9054_v28 = vld [vmem:[#allocation8_spill] sm:$0xff] }
 0xcd3   : > { %v974_v1 = vmax.f32 %v972_v11, %v973_v24  ;;  %v2114_v61 = vmax.f32 %v2112_v46, %v2113_v31  ;;  %v2682_v54 = vrot.slane %v2681_v49, 2  ;;  %v1532_v46 = vsel %vm959_vm2, %v9054_v28, -inf }
 0xcd4   : > { %4771 = vrot.lane.b32.xlu1 %v4763_v51, %s6555_s22  ;;  %v1546_v33 = vrot.slane %v1545_v16, 1  ;;  %v9046_v51 = vpack.i.bf16 %v8263_v42, %v8255_v23 }
 0xcd5   : > { %v975_v29 = vrot.slane %v974_v1, 1  ;;  %v2115_v18 = vrot.slane %v2114_v61, 1  ;;  %v2683_v56 = vmax.f32 %v2681_v49, %v2682_v54  ;;  %v1533_v54 = vrot.slane %v1532_v46, 4 }
 0xcd6   : > { %6416 = vrot.lane.b32.xlu0 %v9022_v38, %s6555_s22  ;;  %v1547_v12 = vmax.f32 %v1545_v16, %v1546_v33  ;;  %v9047_v38 = vld [vmem:[#allocation3_spill] sm:$0xff] }
 0xcd7   : > { %v976_v43 = vmax.f32 %v974_v1, %v975_v29  ;;  %v2116_v3 = vmax.f32 %v2114_v61, %v2115_v18  ;;  %v2684_v9 = vrot.slane %v2683_v56, 1 }
 0xcd8   : > { %6421 = vrot.lane.b32.xlu1 %v9023_v62, %s6556_s10 }
 0xcd9   : > { %v2685_v39 = vmax.f32 %v2683_v56, %v2684_v9 }
 0xcda   : > { %6426 = vrot.lane.b32.xlu0 %v9024_v17, %s6555_s22  ;;  %v9048_v17 = vld [vmem:[#allocation4_spill] sm:$0xff] }
 0xcdc   : > { %6431 = vrot.lane.b32.xlu1 %v9025_v52, %s6557_s25  ;;  %v895_v52 = vsel %vm894_vm12, %v9048_v17, -inf }
 0xcde   : > { %6436 = vrot.lane.b32.xlu0 %v9026_v36, %s6555_s22  ;;  %v896_v36 = vrot.slane %v895_v52, 4 }
 0xce0   : > { %6441 = vrot.lane.b32.xlu1 %v9027_v19, %s6556_s10 }
 0xce2   : > { %6446 = vrot.lane.b32.xlu0 %v9028_v2, %s6555_s22  ;;  %v9049_v2 = vld [vmem:[#allocation5_spill] sm:$0xff] }
 0xce3   : > { %v960_v41 = vsel %vm959_vm2, %v9049_v2, -inf }
 0xce4   : > { %6451 = vrot.lane.b32.xlu1 %v9029_v8, %s6556_s10  ;;  %v897_v8 = vmax.f32 %v895_v52, %v896_v36  ;;  %v961_v0 = vrot.slane %v960_v41, 4  ;;  %v9059_v36 = vld [vmem:[#allocation11_spill] sm:$0xff] }
 0xce6   : > { %6456 = vrot.lane.b32.xlu0 %v9030_v30, %s6557_s25  ;;  %v1502_v30 = vsel %vm928_vm0, %v9051_v27, -inf  ;;  %v962_v60 = vmax.f32 %v960_v41, %v961_v0  ;;  %v9060_v0 = vld [vmem:[#allocation26_spill] sm:$0xff] }
 0xce8   : > { %6461 = vrot.lane.b32.xlu1 %v9031_v47, %s6555_s22  ;;  %v2071_v47 = vsel %vm928_vm0, %v9052_v48, -inf }
 0xce9   : > { %v2072_v11 = vrot.slane %v2071_v47, 4 }
 0xcea   : > { %6466 = vrot.lane.b32.xlu0 %v9033_v37, %s6556_s10  ;;  %v9053_v37 = vld [vmem:[#allocation10_spill] sm:$0xff] }
 0xceb   : > { %v2041_v10 = vsel %vm894_vm12, %v9053_v37, -inf  ;;  %v2073_v29 = vmax.f32 %v2071_v47, %v2072_v11  ;;  %v3778_v37 = vsel %vm928_vm0, %v9060_v0, -inf  ;;  %v9061_v11 = vld [vmem:[#allocation27_spill] sm:$0xff] }
 0xcec   : > { %6471 = vrot.lane.b32.xlu1 %v9036_v58, %s6557_s25  ;;  %v1503_v58 = vrot.slane %v1502_v30, 4 }
 0xcee   : > { %6476 = vrot.lane.b32.xlu0 %v9038_v55, %s6556_s10  ;;  %v898_v55 = vrot.slane %v897_v8, 2  ;;  %v1504_v61 = vmax.f32 %v1502_v30, %v1503_v58 }
 0xcf0   : > { %6481 = vrot.lane.b32.xlu1 %v9039_v25, %s6555_s22  ;;  %v2042_v25 = vrot.slane %v2041_v10, 4 }
 0xcf2   : > { %6486 = vrot.lane.b32.xlu0 %v9042_v5, %s6557_s25  ;;  %v9055_v5 = vld [vmem:[#allocation13_spill] sm:$0xff] }
 0xcf3   : > { %v2640_v16 = vsel %vm928_vm0, %v9055_v5, -inf }
 0xcf4   : > { %6491 = vrot.lane.b32.xlu1 %v9044_v14, %s6557_s25  ;;  %v9057_v14 = vld [vmem:[#allocation21_spill] sm:$0xff]  ;;  %v2641_v18 = vrot.slane %v2640_v16, 4 }
 0xcf5   : > { %v3209_v1 = vsel %vm928_vm0, %v9057_v14, -inf }
 0xcf6   : > { %6496 = vrot.lane.b32.xlu0 %v9045_v57, %s6556_s10  ;;  %v9058_v57 = vld [vmem:[#allocation22_spill] sm:$0xff] }
 0xcf7   : > { %v3179_v33 = vsel %vm894_vm12, %v9058_v57, -inf }
 0xcf8   : > { %6501 = vrot.lane.b32.xlu1 %v6500_v35, %s6555_s22  ;;  %v3819_v35 = vmax.f32 %v8223_v26, %v3818_v53  ;;  %v929_v26 = vsel %vm928_vm0, %v9047_v38, -inf  ;;  %v1534_v38 = vmax.f32 %v1532_v46, %v1533_v54 }
 0xcf9   : > { %v930_v62 = vrot.slane %v929_v26, 4 }
 0xcfa   : > { %6506 = vrot.lane.b32.xlu0 %v9046_v51, %s6557_s25  ;;  %v3820_v63 = vrot.slane %v3819_v35, 2  ;;  %v8539_v51 = vmax.f32 %v897_v8, %v898_v55  ;;  %v9062_v55 = vld [vmem:[#allocation15_spill] sm:$0xff] }
 0xcfb   : > { %v931_v19 = vmax.f32 %v929_v26, %v930_v62  ;;  %v2074_v26 = vrot.slane %v2073_v29, 2  ;;  %v2670_v28 = vsel %vm959_vm2, %v9062_v55, -inf }
 0xcfc   : > { %1573 = vrot.lane.b32.xlu1 %v1547_v12, %s6555_s22  ;;  %v3821_v23 = vmax.f32 %v3819_v35, %v3820_v63  ;;  %v2043_v12 = vmax.f32 %v2041_v10, %v2042_v25  ;;  %v900_v30 = vrot.slane %v8539_v51, 1 }
 0xcfd   : > { %v932_v13 = vrot.slane %v931_v19, 2 }
 0xcfe   : > { %1002 = vrot.lane.b32.xlu0 %v976_v43, %s6555_s22  ;;  %v3822_v42 = vrot.slane %v3821_v23, 1  ;;  %v3210_v43 = vrot.slane %v3209_v1, 4  ;;  %v2044_v52 = vrot.slane %v2043_v12, 2 }
 0xcff   : > { %v933_v44 = vmax.f32 %v931_v19, %v932_v13  ;;  %v2101_v19 = vsel %vm959_vm2, %v9059_v36, -inf }
 0xd00   : > { %2142 = vrot.lane.b32.xlu1 %v2116_v3, %s6555_s22  ;;  %v3823_v59 = vmax.f32 %v3821_v23, %v3822_v42  ;;  %v3180_v3 = vrot.slane %v3179_v33, 4  ;;  %v963_v42 = vrot.slane %v962_v60, 2  ;;  %v2102_v13 = vrot.slane %v2101_v19, 4 }
 0xd01   : > { %v934_v23 = vrot.slane %v933_v44, 1 }
 0xd02   : > { %v964_v48 = vmax.f32 %v962_v60, %v963_v42  ;;  %v3779_v60 = vrot.slane %v3778_v37, 4 }
 0xd04   : > { %2711 = vrot.lane.b32.xlu1 %v2685_v39, %s6555_s22 }
 0xd08   : > { %6511 = vrot.lane.b32.xlu1 %v6510_v4, %s6557_s25  ;;  %v1472_v4 = vsel %vm894_vm12, %v9050_v22, -inf  ;;  %v3211_v22 = vmax.f32 %v3209_v1, %v3210_v43 }
 0xd09   : > { %v1473_v40 = vrot.slane %v1472_v4, 4 }
 0xd0a   : > { %v3212_v46 = vrot.slane %v3211_v22, 2 }
 0xd0b   : > { %v1474_v49 = vmax.f32 %v1472_v4, %v1473_v40  ;;  %v3181_v4 = vmax.f32 %v3179_v33, %v3180_v3  ;;  %v1535_v40 = vrot.slane %v1534_v38, 2  ;;  %v2671_v33 = vrot.slane %v2670_v28, 4 }
 0xd0c   : > { %6516 = vrot.lane.b32.xlu1 %v6515_v21, %s6556_s10 }
 0xd0d   : > { %v1475_v39 = vrot.slane %v1474_v49, 2  ;;  %v3182_v25 = vrot.slane %v3181_v4, 2  ;;  %v8566_v1 = vmax.f32 %v1534_v38, %v1535_v40 }
 0xd10   : > { %3849 = vrot.lane.b32.xlu1 %v3823_v59, %s6555_s22  ;;  %v1505_v59 = vrot.slane %v1504_v61, 2 }
 0xd12   : > { %v1506_v47 = vmax.f32 %v1504_v61, %v1505_v59  ;;  %v8579_v59 = vmax.f32 %v2670_v28, %v2671_v33 }
 0xd38   : > { %v4747_v21 = vpop.permute.xlu0 %4746 }
 0xd39   : > { %v4777_v50 = vsel %vm622_vm8, %v8376_v45, %v4747_v21  ;;  %v2610_v45 = vsel %vm894_vm12, %v9056_v6, -inf }
 0xd3a   : > { %v4753_v20 = vpop.permute.xlu1 %4752  ;;  %v2611_v56 = vrot.slane %v2610_v45, 4 }
 0xd3b   : > { %v4780_v21 = vsel %vm622_vm8, %v8384_v34, %v4753_v20  ;;  %v2075_v34 = vmax.f32 %v2073_v29, %v2074_v26  ;;  %v2045_v20 = vmax.f32 %v2043_v12, %v2044_v52  ;;  %v3183_v12 = vmax.f32 %v3181_v4, %v3182_v25 }
 0xd3c   : > { %v4766_v15 = vpop.permute.xlu0 %4765  ;;  %v2612_v41 = vmax.f32 %v2610_v45, %v2611_v56  ;;  %v1507_v45 = vrot.slane %v1506_v47, 1  ;;  %v8571_v56 = vmax.f32 %v8539_v51, %v900_v30 }
 0xd3d   : > { %v4781_v24 = vsel %vm781_vm10, %v4777_v50, %v4766_v15  ;;  %v3748_v50 = vsel %vm894_vm12, %v9061_v11, -inf  ;;  %v2076_v61 = vrot.slane %v2075_v34, 1  ;;  %v2046_v54 = vrot.slane %v2045_v20, 1 }
 0xd3e   : > { %v4749_v31 = vpop.permute.xlu1 %4748  ;;  %6121 = vmatprep.mubr.msk.f32.mxu0 %vm792_vm11, %v4781_v24  ;;  %v2613_v15 = vrot.slane %v2612_v41, 2  ;;  %v3749_v6 = vrot.slane %v3748_v50, 4  ;;  %v3184_v36 = vrot.slane %v3183_v12, 1 }
 0xd3f   : > { %v4778_v9 = vsel %vm622_vm8, %v8374_v7, %v4749_v31  ;;  %v2642_v7 = vmax.f32 %v2640_v16, %v2641_v18  ;;  %v935_v16 = vmax.f32 %v933_v44, %v934_v23  ;;  %v965_v31 = vrot.slane %v964_v48, 1 }
 0xd40   : > { %v4751_v53 = vpop.permute.xlu0 %4750  ;;  %v2614_v29 = vmax.f32 %v2612_v41, %v2613_v15  ;;  %v3780_v44 = vmax.f32 %v3778_v37, %v3779_v60  ;;  %v1537_v23 = vrot.slane %v8566_v1, 1  ;;  %v2077_v38 = vmax.f32 %v2075_v34, %v2076_v61 }
 0xd41   : > { %v4779_v62 = vsel %vm622_vm8, %v8386_v32, %v4751_v53  ;;  %v1476_v32 = vmax.f32 %v1474_v49, %v1475_v39  ;;  %v2643_v58 = vrot.slane %v2642_v7, 2  ;;  %v2103_v49 = vmax.f32 %v2101_v19, %v2102_v13 }
 0xd42   : > { %v4768_v35 = vpop.permute.xlu1 %4767  ;;  %v3213_v53 = vmax.f32 %v3211_v22, %v3212_v46  ;;  %v1508_v39 = vmax.f32 %v1506_v47, %v1507_v45  ;;  %v8581_v26 = vmax.f32 %v2045_v20, %v2046_v54  ;;  %v2615_v52 = vrot.slane %v2614_v29, 1 }
 0xd43   : > { %v4782_v63 = vsel %vm781_vm10, %v4778_v9, %v4768_v35  ;;  %v1477_v5 = vrot.slane %v1476_v32, 1  ;;  %v2644_v57 = vmax.f32 %v2642_v7, %v2643_v58  ;;  %v8574_v9 = vmax.f32 %v964_v48, %v965_v31 }
 0xd44   : > { %6122 = vmatmul.mubr.msk.f32.vlgmr.msra.gmra.mrb[44].mxu0 %vm792_vm11, %v4782_v63  ;;  %v4770_v17 = vpop.permute.xlu0 %4769  ;;  %v3750_v35 = vmax.f32 %v3748_v50, %v3749_v6  ;;  %v2104_v42 = vrot.slane %v2103_v49, 2  ;;  %v3214_v19 = vrot.slane %v3213_v53, 1  ;;  %v3781_v7 = vrot.slane %v3780_v44, 2 }
 0xd45   : > { %v4783_v2 = vsel %vm781_vm10, %v4779_v62, %v4770_v17  ;;  %v1478_v43 = vmax.f32 %v1476_v32, %v1477_v5  ;;  %v2645_v51 = vrot.slane %v2644_v57, 1  ;;  %v2673_v48 = vrot.slane %v8579_v59, 2 }
 0xd46   : > { %v4772_v8 = vpop.permute.xlu1 %4771  ;;  %6124 = vmatprep.mubr.msk.f32.mxu0 %vm792_vm11, %v4783_v2  ;;  %v3751_v22 = vrot.slane %v3750_v35, 2  ;;  %v2616_v37 = vmax.f32 %v2614_v29, %v2615_v52  ;;  %v8593_v34 = vmax.f32 %v3780_v44, %v3781_v7  ;;  %v3185_v20 = vmax.f32 %v3183_v12, %v3184_v36 }
 0xd47   : > { %v4784_v27 = vsel %vm781_vm10, %v4780_v21, %v4772_v8  ;;  %v8589_v8 = vmax.f32 %v2103_v49, %v2104_v42  ;;  %v2646_v30 = vmax.f32 %v2644_v57, %v2645_v51  ;;  %v3215_v58 = vmax.f32 %v3213_v53, %v3214_v19  ;;  %v9063_v53 = vld [vmem:[#allocation30_spill] sm:$0xff] }
 0xd48   : > { %6125 = vmatmul.mubr.msk.f32.gmra.mrb[46].mxu0 %vm792_vm11, %v4784_v27  ;;  %v8558_v10 = vpop.permute.xlu0 %6416  ;;  %v8596_v11 = vmax.f32 %v3750_v35, %v3751_v22  ;;  %vm5064_vm8 = vcmask 1041408   ;;  %v8612_v12 = vsel %vm928_vm0, %v9063_v53, -inf  ;;  %vm9065_vm11 = vcmask 1043456  }
 0xd49   : > { %v6418_v3 = vunpack.i.l.bf16 %v8558_v10  ;;  %v6419_v4 = vunpack.i.h.bf16 %v8558_v10  ;;  %vm9066_vm3 = vmmov %vm9065_vm11 }
 0xd4a   : > { %v8564_v24 = vpop.permute.xlu1 %6421 }
 0xd4b   : > { %v6423_v62 = vunpack.i.l.bf16 %v8564_v24  ;;  %v1579_v2 = vsel %vm781_vm10, %v1508_v39, %v6418_v3  ;;  %v1576_v50 = vsel %vm781_vm10, %v1478_v43, %v6419_v4  ;;  %v6424_v60 = vunpack.i.h.bf16 %v8564_v24  ;;  %v9064_v3 = vld [vmem:[#allocation31_spill] sm:$0xff] }
 0xd4c   : > { %v6427_v14 = vpop.permute.xlu0 %6426  ;;  %v3783_v43 = vrot.slane %v8593_v34, 1  ;;  %v8618_v35 = vsel %vm894_vm12, %v9064_v3, -inf }
 0xd4d   : > { %v6429_v32 = vunpack.i.h.bf16 %v6427_v14  ;;  %v6428_v27 = vunpack.i.l.bf16 %v6427_v14  ;;  %v1580_v47 = vsel %vm1006_vm5, %v1579_v2, %v6423_v62  ;;  %v1577_v39 = vsel %vm1006_vm5, %v1576_v50, %v6424_v60 }
 0xd4e   : > { %v8568_v18 = vpop.permute.xlu1 %6431 }
 0xd4f   : > { %v6433_v41 = vunpack.i.l.bf16 %v8568_v18  ;;  %v1010_v55 = vsel %vm781_vm10, %v935_v16, %v6429_v32  ;;  %v2148_v28 = vsel %vm781_vm10, %v2077_v38, %v6428_v27  ;;  %v6434_v45 = vunpack.i.h.bf16 %v8568_v18 }
 0xd50   : > { %v8576_v63 = vpop.permute.xlu0 %6436  ;;  %v3753_v18 = vrot.slane %v8596_v11, 1 }
 0xd51   : > { %v1581_v10 = vsel %vm1008_vm6, %v1580_v47, %v6433_v41  ;;  %v6439_v14 = vunpack.i.h.bf16 %v8576_v63  ;;  %v6438_v33 = vunpack.i.l.bf16 %v8576_v63  ;;  %v1578_v38 = vsel %vm1008_vm6, %v1577_v39, %v6434_v45 }
 0xd52   : > { %v6442_v17 = vpop.permute.xlu1 %6441  ;;  %v5001_v5 = vrot.slane %v1581_v10, 7  ;;  %v5000_v10 = vrot.slane %v1578_v38, 7 }
 0xd53   : > { %v6444_v13 = vunpack.i.h.bf16 %v6442_v17  ;;  %v6443_v0 = vunpack.i.l.bf16 %v6442_v17  ;;  %v2717_v51 = vsel %vm781_vm10, %v2646_v30, %v6439_v14  ;;  %v2145_v52 = vsel %vm781_vm10, %v8581_v26, %v6438_v33 }
 0xd54   : > { %v8587_v21 = vpop.permute.xlu0 %6446  ;;  %v4348_v26 = vrot.slane %v8612_v12, 4 }
 0xd55   : > { %v1011_v31 = vsel %vm1006_vm5, %v1010_v55, %v6444_v13  ;;  %v2149_v49 = vsel %vm1006_vm5, %v2148_v28, %v6443_v0  ;;  %v6449_v36 = vunpack.i.h.bf16 %v8587_v21  ;;  %v6448_v19 = vunpack.i.l.bf16 %v8587_v21 }
 0xd56   : > { %v6452_v40 = vpop.permute.xlu1 %6451 }
 0xd57   : > { %v6454_v61 = vunpack.i.h.bf16 %v6452_v40  ;;  %v6453_v44 = vunpack.i.l.bf16 %v6452_v40  ;;  %v4318_v40 = vrot.slane %v8618_v35, 4  ;;  %v2714_v50 = vsel %vm781_vm10, %v2616_v37, %v6449_v36 }
 0xd58   : > { %v6457_v15 = vpop.permute.xlu0 %6456  ;;  %v2106_v36 = vrot.slane %v8589_v8, 1 }
 0xd59   : > { %v6459_v46 = vunpack.i.h.bf16 %v6457_v15  ;;  %v6458_v25 = vunpack.i.l.bf16 %v6457_v15  ;;  %v2718_v7 = vsel %vm1006_vm5, %v2717_v51, %v6454_v61  ;;  %v2146_v41 = vsel %vm1006_vm5, %v2145_v52, %v6453_v44 }
 0xd5a   : > { %v6462_v6 = vpop.permute.xlu1 %6461  ;;  %v1005_v15 = vsel %vm781_vm10, %v8571_v56, %v6448_v19  ;;  %v1538_v52 = vmax.f32 %v8566_v1, %v1537_v23  ;;  %v4349_v19 = vmax.f32 %v8612_v12, %v4348_v26  ;;  %v4319_v1 = vmax.f32 %v8618_v35, %v4318_v40 }
 0xd5b   : > { %v1012_v57 = vsel %vm1008_vm6, %v1011_v31, %v6459_v46  ;;  %v2150_v16 = vsel %vm1008_vm6, %v2149_v49, %v6458_v25  ;;  %v6464_v22 = vunpack.i.h.bf16 %v6462_v6  ;;  %v6463_v4 = vunpack.i.l.bf16 %v6462_v6 }
 0xd5c   : > { %v5010_v54 = vrot.slane %v2150_v16, 6  ;;  %v6467_v29 = vpop.permute.xlu0 %6466  ;;  %v5062_v24 = vsel %vm5060_vm7, %v1012_v57, %v5001_v5  ;;  %v4350_v26 = vrot.slane %v4349_v19, 2  ;;  %v2107_v40 = vmax.f32 %v8589_v8, %v2106_v36  ;;  %v5102_v36 = vld [vmem:[%s8941_s7 + $0x88] sm:$0xff] }
 0xd5d   : > { %v6469_v27 = vunpack.i.h.bf16 %v6467_v29  ;;  %v6468_v30 = vunpack.i.l.bf16 %v6467_v29  ;;  %v3283_v25 = vsel %vm781_vm10, %v3185_v20, %v6464_v22  ;;  %v3286_v60 = vsel %vm781_vm10, %v3215_v58, %v6463_v4 }
 0xd5e   : > { %v6472_v63 = vpop.permute.xlu1 %6471  ;;  %v5066_v42 = vsel %vm5064_vm8, %v5062_v24, %v5010_v54 }
 0xd5f   : > { %v6474_v62 = vunpack.i.h.bf16 %v6472_v63  ;;  %v6473_v17 = vunpack.i.l.bf16 %v6472_v63  ;;  %v1007_v49 = vsel %vm1006_vm5, %v1005_v15, %v6468_v30  ;;  %v2715_v6 = vsel %vm1006_vm5, %v2714_v50, %v6469_v27 }
 0xd60   : > { %v6477_v2 = vpop.permute.xlu0 %6476 }
 0xd61   : > { %v2719_v32 = vsel %vm1008_vm6, %v2718_v7, %v6474_v62  ;;  %v6479_v13 = vunpack.i.h.bf16 %v6477_v2  ;;  %v2147_v21 = vsel %vm1008_vm6, %v2146_v41, %v6473_v17  ;;  %v6478_v55 = vunpack.i.l.bf16 %v6477_v2 }
 0xd62   : > { %v5019_v47 = vrot.slane %v2719_v32, 5  ;;  %v6482_v0 = vpop.permute.xlu1 %6481  ;;  %v5009_v45 = vrot.slane %v2147_v21, 6  ;;  %v3754_v62 = vmax.f32 %v8596_v11, %v3753_v18  ;;  %v3784_v17 = vmax.f32 %v8593_v34, %v3783_v43 }
 0xd63   : > { %v3284_v37 = vsel %vm1006_vm5, %v3283_v25, %v6479_v13  ;;  %v3287_v20 = vsel %vm1006_vm5, %v3286_v60, %v6478_v55  ;;  %v6484_v61 = vunpack.i.h.bf16 %v6482_v0  ;;  %v6483_v24 = vunpack.i.l.bf16 %v6482_v0 }
 0xd64   : > { %v6487_v28 = vpop.permute.xlu0 %6486  ;;  %v5070_v46 = vsel %vm5068_vm9, %v5066_v42, %v5019_v47  ;;  %v2674_v2 = vmax.f32 %v8579_v59, %v2673_v48  ;;  %v4320_v21 = vrot.slane %v4319_v1, 2 }
 0xd65   : > { %v6489_v5 = vunpack.i.h.bf16 %v6487_v28  ;;  %v6488_v31 = vunpack.i.l.bf16 %v6487_v28  ;;  %v3852_v11 = vsel %vm781_vm10, %v3754_v62, %v6484_v61  ;;  %v3855_v34 = vsel %vm781_vm10, %v3784_v17, %v6483_v24 }
 0xd66   : > { %v6492_v14 = vpop.permute.xlu1 %6491 }
 0xd67   : > { %v1009_v56 = vsel %vm1008_vm6, %v1007_v49, %v6488_v31  ;;  %v2716_v57 = vsel %vm1008_vm6, %v2715_v6, %v6489_v5  ;;  %v6494_v16 = vunpack.i.h.bf16 %v6492_v14  ;;  %v6493_v33 = vunpack.i.l.bf16 %v6492_v14 }
 0xd68   : > { %v5018_v58 = vrot.slane %v2716_v57, 5  ;;  %v6497_v54 = vpop.permute.xlu0 %6496  ;;  %v5061_v29 = vsel %vm5060_vm7, %v1009_v56, %v5000_v10  ;;  %v2675_v10 = vrot.slane %v2674_v2, 1  ;;  %v4351_v5 = vmax.f32 %v4349_v19, %v4350_v26  ;;  %v5085_v19 = vld [vmem:[%s8941_s7] sm:$0xff] }
 0xd69   : > { %v3285_v53 = vsel %vm1008_vm6, %v3284_v37, %v6494_v16  ;;  %v3288_v44 = vsel %vm1008_vm6, %v3287_v20, %v6493_v33  ;;  %v6499_v3 = vunpack.i.h.bf16 %v6497_v54  ;;  %v6498_v42 = vunpack.i.l.bf16 %v6497_v54 }
 0xd6a   : > { %v5027_v39 = vrot.slane %v3285_v53, 4  ;;  %v5028_v63 = vrot.slane %v3288_v44, 4  ;;  %v6502_v38 = vpop.permute.xlu1 %6501  ;;  %v5065_v51 = vsel %vm5064_vm8, %v5061_v29, %v5009_v45  ;;  %v2676_v60 = vmax.f32 %v2674_v2, %v2675_v10  ;;  %v5086_v2 = vld [vmem:[%s8941_s7 + $0x8] sm:$0xff] }
 0xd6b   : > { %v5069_v41 = vsel %vm5068_vm9, %v5065_v51, %v5018_v58  ;;  %v3853_v23 = vsel %vm1006_vm5, %v3852_v11, %v6499_v3  ;;  %v3856_v12 = vsel %vm1006_vm5, %v3855_v34, %v6498_v42  ;;  %v4321_v31 = vmax.f32 %v4319_v1, %v4320_v21  ;;  %v5105_v1 = vld [vmem:[%s8941_s7 + $0xa0] sm:$0xff] }
 0xd6c   : > { %v6507_v7 = vpop.permute.xlu0 %6506  ;;  %v5073_v22 = vsel %vm9065_vm11, %v5070_v46, %v5028_v63  ;;  %v5072_v32 = vsel %vm9066_vm3, %v5069_v41, %v5027_v39  ;;  %vm5075_vm11 = vcmask 1044480   ;;  %v4352_v37 = vrot.slane %v4351_v5, 1  ;;  %v5103_v41 = vld [vmem:[%s8941_s7 + $0x90] sm:$0xff] }
 0xd6d   : > { %v6509_v18 = vunpack.i.h.bf16 %v6507_v7  ;;  %v6508_v43 = vunpack.i.l.bf16 %v6507_v7  ;;  %v4322_v45 = vrot.slane %v4321_v31, 1  ;;  %v6504_v57 = vunpack.i.h.bf16 %v6502_v38 }
 0xd6e   : > { %v1574_v4 = vpop.permute.xlu1 %1573  ;;  %v6503_v16 = vunpack.i.l.bf16 %v6502_v38  ;;  %v4353_v20 = vmax.f32 %v4351_v5, %v4352_v37  ;;  %v6343_v11 = vpack.c.bf16 %v5086_v2, %v5085_v19  ;;  %vm6559_vm3 = vmmov 0  }
 0xd6f   : > { %v3854_v59 = vsel %vm1008_vm6, %v3853_v23, %v6509_v18  ;;  %v3857_v48 = vsel %vm1008_vm6, %v3856_v12, %v6508_v43  ;;  %v1582_v27 = vsel %vm781_vm10, %v1538_v52, %v1574_v4  ;;  %v4323_v33 = vmax.f32 %v4321_v31, %v4322_v45  ;;  %v5101_v52 = vld [vmem:[%s8941_s7 + $0x80] sm:$0xff]  ;;  %v5087_v18 = vld [vmem:[%s8941_s7 + $0x10] sm:$0xff]  ;;  %v5088_v43 = vld [vmem:[%s8941_s7 + $0x18] sm:$0xff] }
 0xd70   : > { %v5036_v30 = vrot.slane %v3854_v59, 3  ;;  %v5037_v47 = vrot.slane %v3857_v48, 3  ;;  %v5002_v13 = vrot.slane %v1582_v27, 7  ;;  %v1003_v0 = vpop.permute.xlu0 %1002  ;;  %v4424_v24 = vsel %vm781_vm10, %v4353_v20, %v6503_v16  ;;  %v5106_v23 = vld [vmem:[%s8941_s7 + $0xa8] sm:$0xff]  ;;  %v5107_v48 = vld [vmem:[%s8941_s7 + $0xb0] sm:$0xff]  ;;  %v5108_v27 = vld [vmem:[%s8941_s7 + $0xb8] sm:$0xff] }
 0xd71   : > { %v1013_v35 = vsel %vm781_vm10, %v8574_v9, %v1003_v0  ;;  %v4421_v29 = vsel %vm781_vm10, %v4323_v33, %v6504_v57  ;;  %v6341_v7 = vpack.c.bf16 %v5102_v36, %v5101_v52  ;;  %v6347_v12 = vpack.c.bf16 %v5088_v43, %v5087_v18  ;;  %v5090_v59 = vld [vmem:[%s8941_s7 + $0x28] sm:$0xff]  ;;  %v5092_v0 = vld [vmem:[%s8941_s7 + $0x38] sm:$0xff] }
 0xd72   : > { %v5063_v50 = vsel %vm5060_vm7, %v1013_v35, %v5002_v13  ;;  %v2143_v15 = vpop.permute.xlu1 %2142  ;;  %v5077_v55 = vsel %vm5075_vm11, %v5073_v22, %v5037_v47  ;;  %v5076_v28 = vsel %vm5075_vm11, %v5072_v32, %v5036_v30  ;;  %v5104_v22 = vld [vmem:[%s8941_s7 + $0x98] sm:$0xff]  ;;  %v6349_v4 = vpack.c.bf16 %v5106_v23, %v5105_v1  ;;  %v5089_v32 = vld [vmem:[%s8941_s7 + $0x20] sm:$0xff]  ;;  %v5091_v13 = vld [vmem:[%s8941_s7 + $0x30] sm:$0xff] }
 0xd73   : > { %v2151_v46 = vsel %vm781_vm10, %v2107_v40, %v2143_v15  ;;  %v6345_v34 = vpack.c.bf16 %v5104_v22, %v5103_v41  ;;  %6342 = vmatprep.subr.bf16.mxu1 %v6341_v7  ;;  %v6351_v30 = vpack.c.bf16 %v5090_v59, %v5089_v32  ;;  %v6353_v47 = vpack.c.bf16 %v5108_v27, %v5107_v48  ;;  %v9067_v40 = vld [vmem:[#allocation29_spill] sm:$0xff] }
 0xd74   : > { %v5011_v25 = vrot.slane %v2151_v46, 6  ;;  %6344 = vmatpush3.bf16.msra.mxu1 %v6343_v11  ;;  %v6355_v26 = vpack.c.bf16 %v5092_v0, %v5091_v13  ;;  %v9069_v43 = vld [vmem:[#allocation33_spill] sm:$0xff]  ;;  %v5109_v0 = vld [vmem:[%s8941_s7 + $0xc0] sm:$0xff] }
 0xd75   : > { %6346 = vmatprep.subr.bf16.mxu1 %v6345_v34  ;;  %v4387_v1 = vrot.slane %v9069_v43, 4 }
 0xd76   : > { %v5067_v49 = vsel %vm5064_vm8, %v5063_v50, %v5011_v25  ;;  %v2712_v9 = vpop.permute.xlu1 %2711 }
 0xd77   : > { %v2720_v8 = vsel %vm781_vm10, %v2676_v60, %v2712_v9 }
 0xd78   : > { %v5020_v6 = vrot.slane %v2720_v8, 5  ;;  %6348 = vmatpush3.bf16.msra.mxu1 %v6347_v12 }
 0xd79   : > { %6350 = vmatprep.subr.bf16.mxu1 %v6349_v4 }
 0xd7a   : > { %v8681_v14 = vsel %vm5068_vm9, %v5067_v49, %v5020_v6  ;;  %v6512_v56 = vpop.permute.xlu1 %6511 }
 0xd7b   : > { %v6514_v53 = vunpack.i.h.bf16 %v6512_v56  ;;  %v6513_v44 = vunpack.i.l.bf16 %v6512_v56 }
 0xd7c   : > { %6352 = vmatpush3.bf16.msra.mxu1 %v6351_v30 }
 0xd7d   : > { %6354 = vmatprep.subr.bf16.mxu1 %v6353_v47 }
 0xd7e   : > { %v6517_v61 = vpop.permute.xlu1 %6516 }
 0xd7f   : > { %v6519_v58 = vunpack.i.h.bf16 %v6517_v61  ;;  %v6518_v54 = vunpack.i.l.bf16 %v6517_v61 }
 0xd80   : > { %6356 = vmatpush3.bf16.msra.mxu1 %v6355_v26  ;;  %v5110_v26 = vld [vmem:[%s8941_s7 + $0xc8] sm:$0xff] }
 0xd81   : > { %v4422_v3 = vsel %vm1006_vm5, %v4421_v29, %v6519_v58  ;;  %v4425_v39 = vsel %vm1006_vm5, %v4424_v24, %v6518_v54  ;;  %v9068_v58 = vld [vmem:[#allocation24_spill] sm:$0xff] }
 0xd82   : > { %v4423_v63 = vsel %vm1008_vm6, %v4422_v3, %v6514_v53  ;;  %v4426_v42 = vsel %vm1008_vm6, %v4425_v39, %v6513_v44  ;;  %v3249_v54 = vrot.slane %v9068_v58, 4 }
 0xd83   : > { %v5045_v38 = vrot.slane %v4423_v63, 2  ;;  %v5046_v51 = vrot.slane %v4426_v42, 2 }
 0xd84   : > { %v3250_v22 = vmax.f32 %v9068_v58, %v3249_v54  ;;  %v5114_v58 = vld [vmem:[%s8941_s7 + $0xe8] sm:$0xff] }
 0xd85   : > { %v8690_v62 = vsel %vm434_vm4, %v5077_v55, %v5046_v51  ;;  %v8693_v17 = vsel %vm434_vm4, %v5076_v28, %v5045_v38 }
 0xd86   : > { %v3251_v13 = vrot.slane %v3250_v22, 2 }
 0xe17   : > { %v6123_v35 = vpop.f32.mrb[44].mxu0 }
 0xe18   : > { %v4869_v10 = vadd.f32 %v9067_v40, %v6123_v35  ;;  %v4863_v21 = vpop.f32.mrb[45].mxu0  ;;  %v5093_v35 = vld [vmem:[%s8941_s7 + $0x40] sm:$0xff] }
 0xe19   : > { %v4864_v50 = vadd.f32 %v9067_v40, %v4863_v21 }
 0xe1a   : > { %v8745_v15 = vmax.f32 %v4869_v10, 0.0 }
 0xe1b   : > { %v8747_v55 = vmax.f32 %v4864_v50, 0.0  ;;  %v6126_v28 = vpop.f32.mrb[46].mxu0  ;;  %v5094_v50 = vld [vmem:[%s8941_s7 + $0x48] sm:$0xff] }
 0xe1c   : > { %v4908_v46 = vsel %vm894_vm12, %v8745_v15, -inf  ;;  %v4923_v25 = vsel %vm910_vm15, %v8745_v15, -inf  ;;  %v4873_v60 = vpop.f32.mrb[47].mxu0  ;;  %v4879_v57 = vadd.f32 %v9067_v40, %v6126_v28  ;;  %v4930_v39 = vsel %vm918_vm13, %v8745_v15, -inf  ;;  %v5111_v28 = vld [vmem:[%s8941_s7 + $0xd0] sm:$0xff] }
 0xe1d   : > { %v4924_v5 = vrot.slane %v4923_v25, 4  ;;  %v4893_v31 = vsel %vm902_vm1, %v8747_v55, -inf  ;;  %v4900_v9 = vsel %vm910_vm15, %v8747_v55, -inf  ;;  %v4907_v8 = vsel %vm918_vm13, %v8747_v55, -inf }
 0xe1e   : > { %v4894_v49 = vrot.slane %v4893_v31, 4  ;;  %v4901_v45 = vrot.slane %v4900_v9, 4  ;;  %v4909_v37 = vmax.f32 %v4907_v8, %v4908_v46  ;;  %v4874_v16 = vadd.f32 %v9067_v40, %v4873_v60  ;;  %v5112_v46 = vld [vmem:[%s8941_s7 + $0xd8] sm:$0xff] }
 0xe1f   : > { %v4925_v6 = vmax.f32 %v4923_v25, %v4924_v5  ;;  %v4885_v24 = vmax.f32 %v4879_v57, 0.0  ;;  %v4388_v5 = vmax.f32 %v9069_v43, %v4387_v1  ;;  %v5121_v1 = vld [vmem:[%s8941_s7 + $0x120] sm:$0xff] }
 0xe20   : > { %v4895_v56 = vmax.f32 %v4893_v31, %v4894_v49  ;;  %v4902_v20 = vmax.f32 %v4900_v9, %v4901_v45  ;;  %v4910_v61 = vrot.slane %v4909_v37, 4  ;;  %v8762_v53 = vmax.f32 %v4874_v16, 0.0  ;;  %v5095_v31 = vld [vmem:[%s8941_s7 + $0x50] sm:$0xff]  ;;  %v5096_v45 = vld [vmem:[%s8941_s7 + $0x58] sm:$0xff] }
 0xe21   : > { %v4926_v33 = vrot.slane %v4925_v6, 2  ;;  %v4954_v63 = vsel %vm968_vm14, %v4885_v24, -inf  ;;  %v3252_v16 = vmax.f32 %v3250_v22, %v3251_v13  ;;  %v5123_v13 = vld [vmem:[%s8941_s7 + $0x130] sm:$0xff] }
 0xe22   : > { %v4896_v29 = vrot.slane %v4895_v56, 2  ;;  %v4911_v44 = vmax.f32 %v4909_v37, %v4910_v61  ;;  %v4931_v42 = vsel %vm894_vm12, %v8762_v53, -inf  ;;  %v4939_v38 = vsel %vm928_vm0, %v8762_v53, -inf  ;;  %v5117_v37 = vld [vmem:[%s8941_s7 + $0x100] sm:$0xff] }
 0xe23   : > { %v4927_v3 = vmax.f32 %v4925_v6, %v4926_v33  ;;  %v4903_v51 = vrot.slane %v4902_v20, 2  ;;  %v4932_v52 = vmax.f32 %v4930_v39, %v4931_v42  ;;  %v4940_v36 = vrot.slane %v4939_v38, 4  ;;  %v5113_v61 = vld [vmem:[%s8941_s7 + $0xe0] sm:$0xff] }
 0xe24   : > { %v4953_v19 = vsel %vm918_vm13, %v8762_v53, -inf  ;;  %v4897_v2 = vmax.f32 %v4895_v56, %v4896_v29  ;;  %v4912_v18 = vrot.slane %v4911_v44, 2  ;;  %v6357_v6 = vpack.c.bf16 %v5110_v26, %v5109_v0  ;;  %v5118_v56 = vld [vmem:[%s8941_s7 + $0x108] sm:$0xff]  ;;  %v5124_v0 = vld [vmem:[%s8941_s7 + $0x138] sm:$0xff] }
 0xe25   : > { %v4955_v7 = vmax.f32 %v4953_v19, %v4954_v63  ;;  %v4928_v41 = vrot.slane %v4927_v3, 1  ;;  %v4933_v11 = vrot.slane %v4932_v52, 4  ;;  %v4941_v34 = vmax.f32 %v4939_v38, %v4940_v36 }
 0xe26   : > { %v4898_v12 = vrot.slane %v4897_v2, 1  ;;  %v4913_v48 = vmax.f32 %v4911_v44, %v4912_v18  ;;  %v4904_v27 = vmax.f32 %v4902_v20, %v4903_v51  ;;  %v6359_v33 = vpack.c.bf16 %v5094_v50, %v5093_v35  ;;  %6358 = vmatprep.subr.bf16.mxu1 %v6357_v6  ;;  %v5119_v44 = vld [vmem:[%s8941_s7 + $0x110] sm:$0xff]  ;;  %v5116_v18 = vld [vmem:[%s8941_s7 + $0xf8] sm:$0xff] }
 0xe27   : > { %v4956_v23 = vrot.slane %v4955_v7, 4  ;;  %v4929_v4 = vmax.f32 %v4927_v3, %v4928_v41  ;;  %v4934_v32 = vmax.f32 %v4932_v52, %v4933_v11  ;;  %v4942_v59 = vrot.slane %v4941_v34, 2  ;;  %v5120_v3 = vld [vmem:[%s8941_s7 + $0x118] sm:$0xff]  ;;  %v5098_v41 = vld [vmem:[%s8941_s7 + $0x68] sm:$0xff] }
 0xe28   : > { %v4899_v30 = vmax.f32 %v4897_v2, %v4898_v12  ;;  %v4914_v40 = vrot.slane %v4913_v48, 1  ;;  %v4905_v9 = vrot.slane %v4904_v27, 1  ;;  %v6361_v20 = vpack.c.bf16 %v5112_v46, %v5111_v28  ;;  %6360 = vmatpush3.bf16.msra.mxu1 %v6359_v33  ;;  %v5097_v2 = vld [vmem:[%s8941_s7 + $0x60] sm:$0xff]  ;;  %v9070_v46 = vld [vmem:[#allocation28_spill] sm:$0xff] }
 0xe29   : > { %v4957_v47 = vmax.f32 %v4955_v7, %v4956_v23  ;;  %v4943_v10 = vmax.f32 %v4941_v34, %v4942_v59  ;;  %v4935_v21 = vrot.slane %v4934_v32, 2  ;;  %v4389_v63 = vrot.slane %v4388_v5, 2  ;;  %v5115_v34 = vld [vmem:[%s8941_s7 + $0xf0] sm:$0xff]  ;;  %v5122_v23 = vld [vmem:[%s8941_s7 + $0x128] sm:$0xff] }
 0xe2a   : > { %v6520_v25 = vpack.i.bf16 %v4899_v30, %v4929_v4  ;;  %v4915_v54 = vmax.f32 %v4913_v48, %v4914_v40  ;;  %v6363_v42 = vpack.c.bf16 %v5096_v45, %v5095_v31  ;;  %v6558_v38 = vmov 0.0|0.0   ;;  %6362 = vmatprep.subr.bf16.mxu1 %v6361_v20  ;;  %v5099_v48 = vld [vmem:[%s8941_s7 + $0x70] sm:$0xff] }
 0xe2b   : > { %v4958_v60 = vrot.slane %v4957_v47, 2  ;;  %v4944_v49 = vrot.slane %v4943_v10, 1  ;;  %v4936_v8 = vmax.f32 %v4934_v32, %v4935_v21  ;;  %6373 = vmatprep.subr.bf16.mxu0 %v6558_v38  ;;  %v6374_v51 = vpack.c.bf16 %v5118_v56, %v5117_v37  ;;  %v9072_v45 = vld [vmem:[#allocation32_spill] sm:$0xff] }
 0xe2c   : > { %6521 = vrot.lane.b32.xlu0 %v6520_v25, %s6555_s22  ;;  %v4906_v36 = vmax.f32 %v4904_v27, %v4905_v9  ;;  %v6365_v7 = vpack.c.bf16 %v5114_v58, %v5113_v61  ;;  %v6377_v11 = vpack.c.bf16 %v5120_v3, %v5119_v44  ;;  %v3253_v12 = vrot.slane %v3252_v16, 1  ;;  %6364 = vmatpush3.bf16.msra.mxu1 %v6363_v42  ;;  %v5100_v27 = vld [vmem:[%s8941_s7 + $0x78] sm:$0xff] }
 0xe2d   : > { %v4959_v57 = vmax.f32 %v4957_v47, %v4958_v60  ;;  %v4945_v29 = vmax.f32 %v4943_v10, %v4944_v49  ;;  %v4937_v24 = vrot.slane %v4936_v8, 1  ;;  %6375 = vmatpush3.bf16.msra.mxu0 %v6374_v51  ;;  %v6367_v4 = vpack.c.bf16 %v5098_v41, %v5097_v2  ;;  %v9071_v60 = vld [vmem:[#allocation23_spill] sm:$0xff] }
 0xe2e   : > { %6376 = vmatprep.subr.bf16.mxu0 %v6558_v38  ;;  %v4390_v32 = vmax.f32 %v4388_v5, %v4389_v63  ;;  %6366 = vmatprep.subr.bf16.mxu1 %v6365_v7  ;;  %v6369_v59 = vpack.c.bf16 %v5116_v18, %v5115_v34  ;;  %v6380_v30 = vpack.c.bf16 %v5122_v23, %v5121_v1  ;;  %v6560_v47 = vmov 0.0  }
 0xe2f   : > { %v4960_v39 = vrot.slane %v4959_v57, 1  ;;  %v6525_v52 = vpack.i.bf16 %v4915_v54, %v4945_v29  ;;  %v4938_v19 = vmax.f32 %v4936_v8, %v4937_v24  ;;  %6143 = vmatprep.mubr.msk.f32.mxu0 %vm6559_vm3, %v6560_v47  ;;  %v6371_v26 = vpack.c.bf16 %v5100_v27, %v5099_v48 }
 0xe30   : > { %6368 = vmatpush3.bf16.msra.mxu1 %v6367_v4  ;;  %v3254_v35 = vmax.f32 %v3252_v16, %v3253_v12  ;;  %v4391_v40 = vrot.slane %v4390_v32, 1  ;;  %v6383_v10 = vpack.c.bf16 %v5124_v0, %v5123_v13  ;;  %v4916_v50 = vsel %vm928_vm0, %v8745_v15, -inf  ;;  %v3850_v12 = vpop.permute.xlu1 %3849 }
 0xe31   : > { %v4961_v22 = vmax.f32 %v4959_v57, %v4960_v39  ;;  %6526 = vrot.lane.b32.xlu0 %v6525_v52, %s6557_s25  ;;  %v6530_v43 = vpack.i.bf16 %v4906_v36, %v4938_v19  ;;  %6378 = vmatpush3.bf16.msra.mxu0 %v6377_v11  ;;  %v4886_v28 = vsel %vm894_vm12, %v8747_v55, -inf  ;;  %v3808_v25 = vsel %vm959_vm2, %v9070_v46, -inf }
 0xe32   : > { %6379 = vmatprep.subr.bf16.mxu0 %v6558_v38  ;;  %6370 = vmatprep.subr.bf16.mxu1 %v6369_v59  ;;  %v4392_v21 = vmax.f32 %v4390_v32, %v4391_v40  ;;  %v3239_v5 = vsel %vm959_vm2, %v9071_v60, -inf  ;;  %v4917_v31 = vrot.slane %v4916_v50, 4  ;;  %v4887_v49 = vrot.slane %v4886_v28, 4 }
 0xe33   : > { %4987 = vrot.lane.b32.xlu1 %v4961_v22, %s6555_s22  ;;  %v3809_v9 = vrot.slane %v3808_v25, 4  ;;  %v4946_v8 = vsel %vm959_vm2, %v8762_v53, -inf  ;;  %v3240_v6 = vrot.slane %v3239_v5, 4  ;;  %v4377_v37 = vsel %vm959_vm2, %v9072_v45, -inf }
 0xe34   : > { %6372 = vmatpush3.bf16.msra.mxu1 %v6371_v26  ;;  %v4918_v15 = vmax.f32 %v4916_v50, %v4917_v31  ;;  %v4888_v56 = vmax.f32 %v4886_v28, %v4887_v49  ;;  %v4947_v55 = vrot.slane %v4946_v8, 4  ;;  %v4378_v33 = vrot.slane %v4377_v37, 4 }
 0xe35   : > { %6531 = vrot.lane.b32.xlu0 %v6530_v43, %s6556_s10  ;;  %6381 = vmatpush3.bf16.msra.mxu0 %v6380_v30  ;;  %v3810_v57 = vmax.f32 %v3808_v25, %v3809_v9  ;;  %v3241_v16 = vmax.f32 %v3239_v5, %v3240_v6  ;;  %vm9073_vm0 = vcmask 1046528   ;;  %vm9075_vm13 = vcmask 1043456  }
 0xe36   : > { %6382 = vmatprep.subr.bf16.mxu0 %v6558_v38  ;;  %v4919_v20 = vrot.slane %v4918_v15, 2  ;;  %v4889_v61 = vrot.slane %v4888_v56, 2  ;;  %v4948_v54 = vmax.f32 %v4946_v8, %v4947_v55  ;;  %v4379_v29 = vmax.f32 %v4377_v37, %v4378_v33  ;;  %vm9074_vm12 = vmmov %vm9073_vm0  ;;  %v5277_v55 = vld [vmem:[%s8943_s9 + $0x8] sm:$0xff] }
 0xe37   : > { %v3811_v58 = vrot.slane %v3810_v57, 2  ;;  %v3242_v44 = vrot.slane %v3241_v16, 2  ;;  %vm9076_vm14 = vmmov %vm9073_vm0 }
 0xe38   : > { %v4920_v3 = vmax.f32 %v4918_v15, %v4919_v20  ;;  %v4890_v39 = vmax.f32 %v4888_v56, %v4889_v61  ;;  %v4949_v63 = vrot.slane %v4948_v54, 2  ;;  %v4380_v51 = vrot.slane %v4379_v29, 2  ;;  %v5278_v61 = vld [vmem:[%s8943_s9 + $0x10] sm:$0xff] }
 0xe39   : > { %3280 = vrot.lane.b32.xlu0 %v3254_v35, %s6555_s22  ;;  %6384 = vmatpush3.bf16.msra.mxu0 %v6383_v10  ;;  %v3812_v53 = vmax.f32 %v3810_v57, %v3811_v58  ;;  %v3243_v42 = vmax.f32 %v3241_v16, %v3242_v44  ;;  %v5276_v57 = vld [vmem:[%s8943_s9] sm:$0xff]  ;;  %v5279_v58 = vld [vmem:[%s8943_s9 + $0x18] sm:$0xff]  ;;  %v5281_v44 = vld [vmem:[%s8943_s9 + $0x28] sm:$0xff] }
 0xe3a   : > { %6385 = vmatprep.subr.bf16.mxu0 %v6558_v38  ;;  %v4891_v52 = vrot.slane %v4890_v39, 1  ;;  %v4921_v36 = vrot.slane %v4920_v3, 1  ;;  %v4950_v2 = vmax.f32 %v4948_v54, %v4949_v63  ;;  %v4381_v34 = vmax.f32 %v4379_v29, %v4380_v51  ;;  %v5563_v51 = vld [vmem:[%s8942_s8] ss:$0 sm:$0xff] }
 0xe3b   : > { %v3813_v7 = vrot.slane %v3812_v53, 1  ;;  %v3244_v11 = vrot.slane %v3243_v42, 1  ;;  %v6386_v20 = vpack.c.bf16 %v5277_v55, %v5276_v57  ;;  %v6389_v29 = vpack.c.bf16 %v5279_v58, %v5278_v61 }
 0xe3c   : > { %v4892_v18 = vmax.f32 %v4890_v39, %v4891_v52  ;;  %v4922_v43 = vmax.f32 %v4920_v3, %v4921_v36  ;;  %v4951_v4 = vrot.slane %v4950_v2, 1  ;;  %v4382_v40 = vrot.slane %v4381_v34, 1  ;;  %v5283_v39 = vld [vmem:[%s8943_s9 + $0x38] sm:$0xff] }
 0xe3d   : > { %4418 = vrot.lane.b32.xlu0 %v4392_v21, %s6555_s22  ;;  %v3814_v23 = vmax.f32 %v3812_v53, %v3813_v7  ;;  %v3245_v35 = vmax.f32 %v3243_v42, %v3244_v11  ;;  %s5427_s22 = sshll.u32 %s9080_s20, 3 }
 0xe3e   : > { %v4952_v31 = vmax.f32 %v4950_v2, %v4951_v4  ;;  %v4383_v8 = vmax.f32 %v4381_v34, %v4382_v40  ;;  %s391_s15 = scalar_lea.vmem %s8945_s11, %s5427_s22 }
 0xe3f   : > { %v3858_v10 = vsel %vm781_vm10, %v3814_v23, %v3850_v12 }
 0xe40   : > { %v5038_v9 = vrot.slane %v3858_v10, 3 }
 0xe9e   : > { %v6522_v24 = vpop.permute.xlu0 %6521 }
 0xe9f   : > { %v6524_v41 = vunpack.i.h.bf16 %v6522_v24  ;;  %v6523_v22 = vunpack.i.l.bf16 %v6522_v24  ;;  %v5280_v24 = vld [vmem:[%s8943_s9 + $0x20] sm:$0xff] }
 0xea0   : > { %v6392_v3 = vpack.c.bf16 %v5281_v44, %v5280_v24 }
 0xea1   : > { %v4990_v48 = vsel %vm781_vm10, %v4892_v18, %v6524_v41  ;;  %v4993_v27 = vsel %vm781_vm10, %v4922_v43, %v6523_v22  ;;  %v5565_v41 = vld [vmem:[#allocation2] ss:$0 sm:$0xff] }
 0xea3   : > { %v6527_v19 = vpop.permute.xlu0 %6526 }
 0xea4   : > { %v6529_v30 = vunpack.i.h.bf16 %v6527_v19  ;;  %v6528_v13 = vunpack.i.l.bf16 %v6527_v19 }
 0xea5   : > { %v4988_v46 = vpop.permute.xlu1 %4987 }
 0xea6   : > { %v4996_v37 = vsel %vm781_vm10, %v4952_v31, %v4988_v46 }
 0xea7   : > { %v6532_v1 = vpop.permute.xlu0 %6531  ;;  %v5056_v33 = vrot.slane %v4996_v37, 1 }
 0xea8   : > { %v6534_v32 = vunpack.i.h.bf16 %v6532_v1  ;;  %v6533_v59 = vunpack.i.l.bf16 %v6532_v1 }
 0xeaa   : > { %v4991_v0 = vsel %vm1006_vm5, %v4990_v48, %v6534_v32  ;;  %v4994_v26 = vsel %vm1006_vm5, %v4993_v27, %v6533_v59 }
 0xeab   : > { %v4992_v21 = vsel %vm1008_vm6, %v4991_v0, %v6529_v30  ;;  %v3281_v50 = vpop.permute.xlu0 %3280  ;;  %v4995_v28 = vsel %vm1008_vm6, %v4994_v26, %v6528_v13 }
 0xeac   : > { %v5054_v25 = vrot.slane %v4992_v21, 1  ;;  %v3289_v60 = vsel %vm781_vm10, %v3245_v35, %v3281_v50  ;;  %v5055_v5 = vrot.slane %v4995_v28, 1 }
 0xead   : > { %v5029_v49 = vrot.slane %v3289_v60, 4 }
 0xeae   : > { %v5083_v6 = vsel %vm9073_vm0, %v8690_v62, %v5055_v5  ;;  %v5082_v45 = vsel %vm9074_vm12, %v8693_v17, %v5054_v25 }
 0xeaf   : > { %v5074_v15 = vsel %vm9075_vm13, %v8681_v14, %v5029_v49  ;;  %v4419_v56 = vpop.permute.xlu0 %4418  ;;  %5199 = vmatprep.mubr.f32.mxu1 %v5083_v6 }
 0xeb0   : > { %v5078_v62 = vsel %vm5075_vm11, %v5074_v15, %v5038_v9  ;;  %v4427_v16 = vsel %vm781_vm10, %v4383_v8, %v4419_v56  ;;  %5200 = vmatmul.mubr.f32.vlgmr.msra.gmra.mrb[48].mxu1 %v5082_v45 }
 0xeb1   : > { %v5047_v17 = vrot.slane %v4427_v16, 2 }
 0xeb3   : > { %v5081_v14 = vsel %vm434_vm4, %v5078_v62, %v5047_v17  ;;  %vm5364_vm4 = vcmask 7168  }
 0xeb4   : > { %v5084_v54 = vsel %vm9076_vm14, %v5081_v14, %v5056_v33 }
 0xeb5   : > { %6144 = vmatmul.mubr.msk.f32.vlgmr.msra.gmra.mrb[48].mxu0 %vm1006_vm5, %v5084_v54 }
 0xeb6   : > { %6387 = vmatpush3.bf16.msra.mxu0 %v6386_v20  ;;  %6162 = vmatprep.mubr.msk.f32.mxu0 %vm6559_vm3, %v6560_v47  ;;  %v5282_v47 = vld [vmem:[%s8943_s9 + $0x30] sm:$0xff] }
 0xeb7   : > { %6388 = vmatprep.subr.bf16.mxu0 %v6558_v38  ;;  %v6395_v53 = vpack.c.bf16 %v5283_v39, %v5282_v47 }
 0xeba   : > { %6390 = vmatpush3.bf16.msra.mxu0 %v6389_v29 }
 0xebb   : > { %6391 = vmatprep.subr.bf16.mxu0 %v6558_v38 }
 0xebe   : > { %6393 = vmatpush3.bf16.msra.mxu0 %v6392_v3 }
 0xebf   : > { %6394 = vmatprep.subr.bf16.mxu0 %v6558_v38 }
 0xec2   : > { %6396 = vmatpush3.bf16.msra.mxu0 %v6395_v53 }
 0xf83   : > { %v5786_v63 = vpop.f32.mrb[48].mxu1 }
 0xf84   : > { %v5787_v42 = vpop.f32.mrb[49].mxu1 }
 0xf85   : > { %v5788_v52 = vadd.f32 %v5787_v42, %v5786_v63 }
 0xf87   : > { %v5202_v36 = vadd.f32 %v5788_v52, %v5563_v51 }
 0xf88   : > { %v5271_v38 = vpop.f32.mrb[48].mxu0 }
 0xf89   : > { %v5272_v19 = vadd.f32 %v5271_v38, %v5202_v36  ;;  %v6145_v7 = vpop.f32.mrb[49].mxu0 }
 0xf8b   : > { %v5275_v2 = vmax.f32 %v5272_v19, 0.0 }
 0xf8d   : > { %6163 = vmatmul.mubr.msk.f32.vlgmr.msra.gmra.mrb[50].mxu0 %vm1006_vm5, %v5275_v2 }
0x1060   : > { %v5360_v22 = vpop.f32.mrb[50].mxu0 }
0x1061   : > { %v5361_v11 = vadd.f32 %v5565_v41, %v5360_v22  ;;  %v6164_v34 = vpop.f32.mrb[51].mxu0 }
0x1063   : > { %5365 = vst.msk [vmem:[%s391_s15] sm:$0xff] %vm5364_vm4, %v5361_v11 }
0x1064 PF: > { %s23_s19 = sadd.s32 1, %s6549_s19  }
0x1065   : > { %p20_p5 = scmp.ge.s32.totalorder %s23_s19, 4  }
0x1067   :  { %22 = sbr.rel (!%p20_p5) target bundleno = 3 (0x3), region = 101 }

</bundles_post_ra>
